<compile_context>
chip_gen: v6e
topology: v6e:2x2x1
jax: 0.10.0
libtpu: 0.0.40
codegen_flags: <defaults>
</compile_context>

<pallas_src>
import functools
import math

import jax
import jax.numpy as jnp
from jax.experimental import pallas as pl
from jax.experimental.pallas import tpu as pltpu

HIDDEN = 32
HEADS = 4
HEAD_DIM = HIDDEN // HEADS
NUM_LAYERS = 2
NODE_TYPES = ("n1", "n2")
EDGE_TYPES = (("n1", "to", "n2"), ("n2", "to", "n1"))

_VMEM = pl.BlockSpec(memory_space=pltpu.MemorySpace.VMEM)
_SMEM = pl.BlockSpec(memory_space=pltpu.MemorySpace.SMEM)


def _round_up(x, m):
    return ((x + m - 1) // m) * m


def _gelu(x):
    # tanh-approximation GELU (matches torch.nn.functional.gelu to ~1e-3)
    return 0.5 * x * (1.0 + jnp.tanh(0.7978845608028654 * (x + 0.044715 * x * x * x)))


# --------------------------- Pallas kernels ---------------------------------

def _input_proj_kernel(x_ref, w_ref, b_ref, s_ref, o_ref):
    # x_ref: (S, N_pad, F_pad) stacked padded inputs, one slab per stream
    # w_ref: (S, F_pad, HIDDEN), b_ref: (S, 1, HIDDEN), s_ref: (S,) post-ReLU scale (SMEM)
    # o_ref: (N_pad, S*HIDDEN) lane-dense stacked output
    cols = []
    for s in range(x_ref.shape[0]):
        y = jnp.dot(x_ref[s], w_ref[s], preferred_element_type=jnp.float32) + b_ref[s]
        cols.append(jnp.maximum(y, 0.0) * s_ref[s])
    o_ref[...] = jnp.concatenate(cols, axis=-1)


def pallas_input_proj(xin, w, b, scales):
    n_stream, n_pad, _ = xin.shape
    hidden = w.shape[-1]
    return pl.pallas_call(
        _input_proj_kernel,
        out_shape=jax.ShapeDtypeStruct((n_pad, n_stream * hidden), jnp.float32),
        in_specs=[_VMEM, _VMEM, _VMEM, _SMEM],
        out_specs=_VMEM,
    )(xin, w, b, scales)


def _hgt_layer_kernel(x_ref, wq_ref, bq_ref, wkv_ref, bkv_ref, wo_ref, bo_ref,
                      skip_ref, mask_ref, o_ref, *, heads, head_dim, hidden):
    # x_ref   : (N_pad, 4*hidden)  streams: 0=main/n1 1=main/n2 2=bias/n1 3=bias/n2
    # wq_ref  : (4, hidden, hidden)    Q projection of the DESTINATION node type
    # wkv_ref : (4, hidden, 2*hidden)  [K|V] projection of the SOURCE node type with the
    #                                  relation transform, p_rel and 1/sqrt(d) folded in
    # wo_ref  : (4, hidden, hidden)    output projection of the destination type
    # skip_ref: (4,)  SMEM             sigmoid(skip) gate per stream
    # mask_ref: (2, N_pad, N_pad)      mask[dst%2][i, j] = 1 iff edge src-node j -> dst-node i
    x = x_ref[...]
    n_pad = x.shape[0]
    masks = [mask_ref[0], mask_ref[1]]
    maskb = [m > 0.0 for m in masks]
    has_edge = [(jnp.sum(m, axis=-1, keepdims=True) > 0.0).astype(jnp.float32)
                for m in masks]

    outs = []
    for s in range(4):
        src = s ^ 1                                    # other node type, same stream
        xd = x[:, s * hidden:(s + 1) * hidden]         # destination features
        xs = x[:, src * hidden:(src + 1) * hidden]     # source features
        q = jnp.dot(xd, wq_ref[s], preferred_element_type=jnp.float32) + bq_ref[s]
        kv = jnp.dot(xs, wkv_ref[s], preferred_element_type=jnp.float32) + bkv_ref[s]
        k, v = kv[:, :hidden], kv[:, hidden:]
        mb = maskb[s % 2]

        # per-head scores stacked on sublanes -> one softmax over (heads*N_pad, N_pad)
        scores = []
        for h in range(heads):
            qh = q[:, h * head_dim:(h + 1) * head_dim]
            kh = k[:, h * head_dim:(h + 1) * head_dim]
            sh = jax.lax.dot_general(qh, kh, (((1,), (1,)), ((), ())),
                                     preferred_element_type=jnp.float32)
            scores.append(jnp.where(mb, sh, jnp.float32(-1e30)))
        sc = jnp.concatenate(scores, axis=0)
        m = jnp.max(sc, axis=-1, keepdims=True)
        e = jnp.exp(sc - m)                  # masked entries underflow to exactly 0
        denom = jnp.sum(e, axis=-1, keepdims=True)
        alpha = e * pl.reciprocal(denom, approx=True)

        head_out = []
        for h in range(heads):
            ah = alpha[h * n_pad:(h + 1) * n_pad, :]
            vh = v[:, h * head_dim:(h + 1) * head_dim]
            head_out.append(jnp.dot(ah, vh, preferred_element_type=jnp.float32))
        # zero destinations with no incoming edges (and padded rows)
        agg = jnp.concatenate(head_out, axis=-1) * has_edge[s % 2]

        a = jnp.dot(_gelu(agg), wo_ref[s], preferred_element_type=jnp.float32) + bo_ref[s]
        sk = skip_ref[s]
        outs.append(sk * a + (1.0 - sk) * xd)

    o_ref[...] = jnp.concatenate(outs, axis=-1)        # lane-dense (N_pad, 4*hidden)


def pallas_hgt_layer(x, masks, wq, bq, wkv, bkv, wo, bo, skip):
    n_pad, width = x.shape
    kernel = functools.partial(_hgt_layer_kernel, heads=HEADS, head_dim=HEAD_DIM,
                               hidden=HIDDEN)
    return pl.pallas_call(
        kernel,
        out_shape=jax.ShapeDtypeStruct((n_pad, width), jnp.float32),
        in_specs=[_VMEM] * 7 + [_SMEM, _VMEM],
        out_specs=_VMEM,
    )(x, wq, bq, wkv, bkv, wo, bo, skip, masks)


def _final_kernel(y_ref, ab_ref, o_ref, *, hidden, num_layers):
    # y_ref: (L, N_pad, 4*hidden) per-layer stream-stacked outputs; ab_ref: (2,) SMEM
    a0, a1 = ab_ref[0], ab_ref[1]
    em_m = [y_ref[l][:, 0 * hidden:1 * hidden] for l in range(num_layers)]
    ed_m = [y_ref[l][:, 1 * hidden:2 * hidden] for l in range(num_layers)]
    em_b = [y_ref[l][:, 2 * hidden:3 * hidden] for l in range(num_layers)]
    ed_b = [y_ref[l][:, 3 * hidden:4 * hidden] for l in range(num_layers)]
    em = a0 * jnp.concatenate(em_m, axis=-1) + a1 * jnp.concatenate(em_b, axis=-1)
    ed = a0 * jnp.concatenate(ed_m, axis=-1) + a1 * jnp.concatenate(ed_b, axis=-1)
    o_ref[...] = jax.lax.dot_general(em, ed, (((1,), (1,)), ((), ())),
                                     preferred_element_type=jnp.float32)


def pallas_final_scores(y_stack, att_bias):
    num_layers, n_pad, width = y_stack.shape
    kernel = functools.partial(_final_kernel, hidden=width // 4, num_layers=num_layers)
    return pl.pallas_call(
        kernel,
        out_shape=jax.ShapeDtypeStruct((n_pad, n_pad), jnp.float32),
        in_specs=[_VMEM, _SMEM],
        out_specs=_VMEM,
    )(y_stack, att_bias)


# ------------------------ parameter initialization --------------------------

def glorot(key, shape):
    fan_in, fan_out = shape[-2], shape[-1]
    limit = math.sqrt(6.0 / (fan_in + fan_out))
    return jax.random.uniform(key, shape, jnp.float32, -limit, limit)


def init_hgt_conv(key, in_dim, hidden, heads):
    d = hidden // heads
    keys = jax.random.split(key, 16)
    p = {"kqv_w": {}, "kqv_b": {}, "out_w": {}, "out_b": {}, "skip": {},
         "k_rel": {}, "v_rel": {}, "p_rel": {}}
    i = 0
    for nt in NODE_TYPES:
        p["kqv_w"][nt] = glorot(keys[i], (in_dim, 3 * hidden)); i += 1
        p["kqv_b"][nt] = jnp.zeros((3 * hidden,), jnp.float32)
        p["out_w"][nt] = glorot(keys[i], (hidden, hidden)); i += 1
        p["out_b"][nt] = jnp.zeros((hidden,), jnp.float32)
        p["skip"][nt] = jnp.float32(1.0)
    for et in EDGE_TYPES:
        p["k_rel"][et] = glorot(keys[i], (heads, d, d)); i += 1
        p["v_rel"][et] = glorot(keys[i], (heads, d, d)); i += 1
        p["p_rel"][et] = jnp.ones((heads,), jnp.float32)
    return p


def init_model(key, in_dims, xe_dims, hidden_bias_len, n1, n2):
    keys = jax.random.split(key, 32)
    i = 0
    P = {"lin": {}, "lin_xe": {}, "lin_bias": {}}
    for nt in NODE_TYPES:
        P["lin"][nt] = (glorot(keys[i], (in_dims[nt], HIDDEN)), jnp.zeros((HIDDEN,), jnp.float32)); i += 1
        P["lin_xe"][nt] = (glorot(keys[i], (xe_dims[nt], HIDDEN)), jnp.zeros((HIDDEN,), jnp.float32)); i += 1
        P["lin_bias"][nt] = (glorot(keys[i], (hidden_bias_len, HIDDEN)), jnp.zeros((HIDDEN,), jnp.float32)); i += 1
    P["x_bias"] = {"n1": jax.random.normal(keys[i], (n1, hidden_bias_len), jnp.float32),
                   "n2": jax.random.normal(keys[i + 1], (n2, hidden_bias_len), jnp.float32)}
    i += 2
    P["convs"] = [init_hgt_conv(keys[i + j], HIDDEN, HIDDEN, HEADS) for j in range(NUM_LAYERS)]
    i += NUM_LAYERS
    P["convs_bias"] = [init_hgt_conv(keys[i + j], HIDDEN, HIDDEN, HEADS) for j in range(NUM_LAYERS)]
    i += NUM_LAYERS
    P["att"] = jnp.ones((2,), jnp.float32)
    P["att_bias"] = jnp.ones((2,), jnp.float32)
    # NOTE: self.fc, self.att_dict and nn.Dropout exist in the torch module but are unused /
    #       identity in this forward pass, so they carry no kernel work here.
    return P


# --------------------------- parameter folding -------------------------------

def _fold_layer_params(conv_main, conv_bias, hidden, heads):
    """Stack (per stream s in {main/n1, main/n2, bias/n1, bias/n2}) the fused weights."""
    d = hidden // heads
    scale = 1.0 / math.sqrt(d)
    wq, bq, wkv, bkv, wo, bo, skip = [], [], [], [], [], [], []
    for s in range(4):
        conv = conv_main if s < 2 else conv_bias
        dst = NODE_TYPES[s % 2]
        src = NODE_TYPES[1 - (s % 2)]
        et = (src, "to", dst)
        # Q from the destination type (kqv column order is [K | Q | V])
        wq.append(conv["kqv_w"][dst][:, hidden:2 * hidden])
        bq.append(conv["kqv_b"][dst][hidden:2 * hidden].reshape(1, hidden))
        # K / V from the source type with relation transform, p_rel and 1/sqrt(d) folded in
        wk = conv["kqv_w"][src][:, :hidden].reshape(hidden, heads, d)
        bk = conv["kqv_b"][src][:hidden].reshape(heads, d)
        wv = conv["kqv_w"][src][:, 2 * hidden:].reshape(hidden, heads, d)
        bv = conv["kqv_b"][src][2 * hidden:].reshape(heads, d)
        prel = conv["p_rel"][et] * scale
        wk_e = jnp.einsum("ihd,hde->ihe", wk, conv["k_rel"][et]) * prel[None, :, None]
        bk_e = jnp.einsum("hd,hde->he", bk, conv["k_rel"][et]) * prel[:, None]
        wv_e = jnp.einsum("ihd,hde->ihe", wv, conv["v_rel"][et])
        bv_e = jnp.einsum("hd,hde->he", bv, conv["v_rel"][et])
        wkv.append(jnp.concatenate([wk_e.reshape(hidden, hidden),
                                    wv_e.reshape(hidden, hidden)], axis=1))
        bkv.append(jnp.concatenate([bk_e.reshape(hidden),
                                    bv_e.reshape(hidden)]).reshape(1, 2 * hidden))
        wo.append(conv["out_w"][dst])
        bo.append(conv["out_b"][dst].reshape(1, hidden))
        skip.append(jax.nn.sigmoid(conv["skip"][dst]))
    return (jnp.stack(wq), jnp.stack(bq), jnp.stack(wkv), jnp.stack(bkv),
            jnp.stack(wo), jnp.stack(bo), jnp.stack(skip))


# ------------------------------ model forward --------------------------------

def _pad2(a, rows, cols):
    return jnp.pad(a, ((0, rows - a.shape[0]), (0, cols - a.shape[1])))


def hgt_forward(P, x_dict_, edge_index_dict, edge_index, xe_):
    n1 = x_dict_["n1"].shape[0]
    n2 = x_dict_["n2"].shape[0]
    n_pad = _round_up(max(n1, n2), 8)

    # dense edge masks: built ONCE, reused by both layers and both (main/bias) streams
    ei_to_n1 = edge_index_dict[("n2", "to", "n1")]     # row0 = src (n2), row1 = dst (n1)
    ei_to_n2 = edge_index_dict[("n1", "to", "n2")]     # row0 = src (n1), row1 = dst (n2)
    mask_n1 = jnp.zeros((n_pad, n_pad), jnp.float32).at[ei_to_n1[1], ei_to_n1[0]].set(1.0)
    mask_n2 = jnp.zeros((n_pad, n_pad), jnp.float32).at[ei_to_n2[1], ei_to_n2[0]].set(1.0)
    masks = jnp.stack([mask_n1, mask_n2])

    # ---- input projections for the 4 streams, one fused Pallas call ----
    if xe_ is not None:
        # TODO(synk): torch also computes relu(lin(x)) here but multiplies it by 0; skipped.
        main_feats = [xe_["n1"][0], xe_["n2"][0]]
        main_wb = [P["lin_xe"]["n1"], P["lin_xe"]["n2"]]
        main_scale = [P["att"][1], P["att"][1]]
    else:
        main_feats = [x_dict_["n1"], x_dict_["n2"]]
        main_wb = [P["lin"]["n1"], P["lin"]["n2"]]
        main_scale = [jnp.float32(1.0), jnp.float32(1.0)]
    feats = main_feats + [P["x_bias"]["n1"], P["x_bias"]["n2"]]
    wbs = main_wb + [P["lin_bias"]["n1"], P["lin_bias"]["n2"]]
    scales = jnp.stack(main_scale + [jnp.float32(1.0), jnp.float32(1.0)])
    f_pad = _round_up(max(f.shape[1] for f in feats), 8)
    xin = jnp.stack([_pad2(f, n_pad, f_pad) for f in feats])
    wstk = jnp.stack([jnp.pad(w, ((0, f_pad - w.shape[0]), (0, 0))) for w, _ in wbs])
    bstk = jnp.stack([b.reshape(1, -1) for _, b in wbs])
    x_cur = pallas_input_proj(xin, wstk, bstk, scales)           # (n_pad, 4*HIDDEN)

    # ---- HGTConv layers: ONE fused kernel per layer (both node types, both streams) ----
    layer_outs = []
    for li in range(NUM_LAYERS):
        lp = _fold_layer_params(P["convs"][li], P["convs_bias"][li], HIDDEN, HEADS)
        x_cur = pallas_hgt_layer(x_cur, masks, *lp)
        layer_outs.append(x_cur)

    # ---- layer concat + att_bias combine + Em @ Ed.T, one fused kernel ----
    # TODO(synk): nn.Dropout(0.5) treated as eval-mode identity (training mask is nondeterministic).
    y_full = pallas_final_scores(jnp.stack(layer_outs), P["att_bias"])
    y_all = y_full[:n1, :n2]                                      # (N1, N2) = Em @ Ed.T
    y = y_all[edge_index[0], edge_index[1]][:, None]              # (E, 1) plain-JAX gather
    return y, y_all


hgt_forward_jit = jax.jit(hgt_forward)


# ----------------------------------- main ------------------------------------

if __name__ == "__main__":
    key = jax.random.PRNGKey(0)
    N1, N2 = 16, 12              # edge_m shape -> (N1, N2)
    F1, F2 = 8, 6                # raw node feature dims
    FE1, FE2 = 10, 7             # xe feature dims
    HIDDEN_BIAS_LEN = 8
    E12, E21, E = 40, 36, 20

    ks = jax.random.split(key, 12)
    x_dict_in = {"n1": jax.random.normal(ks[0], (N1, F1), jnp.float32),
                 "n2": jax.random.normal(ks[1], (N2, F2), jnp.float32)}
    xe_in = {"n1": [jax.random.normal(ks[2], (N1, FE1), jnp.float32)],
             "n2": [jax.random.normal(ks[3], (N2, FE2), jnp.float32)]}
    edge_index_dict = {
        ("n1", "to", "n2"): jnp.stack([jax.random.randint(ks[4], (E12,), 0, N1),
                                       jax.random.randint(ks[5], (E12,), 0, N2)]),
        ("n2", "to", "n1"): jnp.stack([jax.random.randint(ks[6], (E21,), 0, N2),
                                       jax.random.randint(ks[7], (E21,), 0, N1)]),
    }
    edge_index = jnp.stack([jax.random.randint(ks[8], (E,), 0, N1),
                            jax.random.randint(ks[9], (E,), 0, N2)])

    params = init_model(ks[10], {"n1": F1, "n2": F2}, {"n1": FE1, "n2": FE2},
                        HIDDEN_BIAS_LEN, N1, N2)

    y, y_all = hgt_forward_jit(params, x_dict_in, edge_index_dict, edge_index, xe_in)
    jax.block_until_ready((y, y_all))
    assert y.shape == (E, 1), y.shape
    assert y_all.shape == (N1, N2), y_all.shape
    assert bool(jnp.all(jnp.isfinite(y_all)))
    print("KERNEL_OK")
</pallas_src>

<mosaic_0001>
module attributes {stable_mosaic.version = 11 : i64} {
  func.func @_input_proj_kernel(%arg0: memref<4x16x16xf32, #tpu.memory_space<vmem>>, %arg1: memref<4x16x32xf32, #tpu.memory_space<vmem>>, %arg2: memref<4x1x32xf32, #tpu.memory_space<vmem>>, %arg3: memref<4xf32, #tpu.memory_space<smem>>, %arg4: memref<16x128xf32, #tpu.memory_space<vmem>>) attributes {dimension_semantics = [], scalar_prefetch = 0 : i64, scratch_operands = 0 : i64, tpu.core_type = #tpu.core_type<tc>} {
    %c0 = arith.constant 0 : index
    %c0_0 = arith.constant 0 : index
    %c0_1 = arith.constant 0 : index
    %0 = vector.load %arg0[%c0, %c0_0, %c0_1] : memref<4x16x16xf32, #tpu.memory_space<vmem>>, vector<1x16x16xf32>
    %1 = vector.shape_cast %0 : vector<1x16x16xf32> to vector<16x16xf32>
    %c0_2 = arith.constant 0 : index
    %c0_3 = arith.constant 0 : index
    %c0_4 = arith.constant 0 : index
    %2 = vector.load %arg1[%c0_2, %c0_3, %c0_4] : memref<4x16x32xf32, #tpu.memory_space<vmem>>, vector<1x16x32xf32>
    %3 = vector.shape_cast %2 : vector<1x16x32xf32> to vector<16x32xf32>
    %cst = arith.constant dense<0.000000e+00> : vector<16x32xf32>
    %4 = tpu.matmul %1, %3, %cst {dimension_numbers = #tpu.dot_dimension_numbers<[1], [0], [0], [1], [0, 0, 1, 1], [], []>} : vector<16x16xf32>, vector<16x32xf32>, vector<16x32xf32> -> vector<16x32xf32>
    %c0_5 = arith.constant 0 : index
    %c0_6 = arith.constant 0 : index
    %c0_7 = arith.constant 0 : index
    %5 = vector.load %arg2[%c0_5, %c0_6, %c0_7] : memref<4x1x32xf32, #tpu.memory_space<vmem>>, vector<1x1x32xf32>
    %6 = vector.shape_cast %5 : vector<1x1x32xf32> to vector<1x32xf32>
    %7 = vector.broadcast %6 : vector<1x32xf32> to vector<16x32xf32>
    %8 = arith.addf %4, %7 : vector<16x32xf32>
    %cst_8 = arith.constant 0.000000e+00 : f32
    %9 = vector.broadcast %cst_8 : f32 to vector<16x32xf32>
    %10 = arith.maximumf %8, %9 : vector<16x32xf32>
    %c0_9 = arith.constant 0 : index
    %11 = memref.load %arg3[%c0_9] : memref<4xf32, #tpu.memory_space<smem>>
    %12 = vector.broadcast %11 : f32 to vector<16x32xf32>
    %13 = arith.mulf %10, %12 : vector<16x32xf32>
    %c1 = arith.constant 1 : index
    %c0_10 = arith.constant 0 : index
    %c0_11 = arith.constant 0 : index
    %14 = vector.load %arg0[%c1, %c0_10, %c0_11] : memref<4x16x16xf32, #tpu.memory_space<vmem>>, vector<1x16x16xf32>
    %15 = vector.shape_cast %14 : vector<1x16x16xf32> to vector<16x16xf32>
    %c1_12 = arith.constant 1 : index
    %c0_13 = arith.constant 0 : index
    %c0_14 = arith.constant 0 : index
    %16 = vector.load %arg1[%c1_12, %c0_13, %c0_14] : memref<4x16x32xf32, #tpu.memory_space<vmem>>, vector<1x16x32xf32>
    %17 = vector.shape_cast %16 : vector<1x16x32xf32> to vector<16x32xf32>
    %cst_15 = arith.constant dense<0.000000e+00> : vector<16x32xf32>
    %18 = tpu.matmul %15, %17, %cst_15 {dimension_numbers = #tpu.dot_dimension_numbers<[1], [0], [0], [1], [0, 0, 1, 1], [], []>} : vector<16x16xf32>, vector<16x32xf32>, vector<16x32xf32> -> vector<16x32xf32>
    %c1_16 = arith.constant 1 : index
    %c0_17 = arith.constant 0 : index
    %c0_18 = arith.constant 0 : index
    %19 = vector.load %arg2[%c1_16, %c0_17, %c0_18] : memref<4x1x32xf32, #tpu.memory_space<vmem>>, vector<1x1x32xf32>
    %20 = vector.shape_cast %19 : vector<1x1x32xf32> to vector<1x32xf32>
    %21 = vector.broadcast %20 : vector<1x32xf32> to vector<16x32xf32>
    %22 = arith.addf %18, %21 : vector<16x32xf32>
    %cst_19 = arith.constant 0.000000e+00 : f32
    %23 = vector.broadcast %cst_19 : f32 to vector<16x32xf32>
    %24 = arith.maximumf %22, %23 : vector<16x32xf32>
    %c1_20 = arith.constant 1 : index
    %25 = memref.load %arg3[%c1_20] : memref<4xf32, #tpu.memory_space<smem>>
    %26 = vector.broadcast %25 : f32 to vector<16x32xf32>
    %27 = arith.mulf %24, %26 : vector<16x32xf32>
    %c2 = arith.constant 2 : index
    %c0_21 = arith.constant 0 : index
    %c0_22 = arith.constant 0 : index
    %28 = vector.load %arg0[%c2, %c0_21, %c0_22] : memref<4x16x16xf32, #tpu.memory_space<vmem>>, vector<1x16x16xf32>
    %29 = vector.shape_cast %28 : vector<1x16x16xf32> to vector<16x16xf32>
    %c2_23 = arith.constant 2 : index
    %c0_24 = arith.constant 0 : index
    %c0_25 = arith.constant 0 : index
    %30 = vector.load %arg1[%c2_23, %c0_24, %c0_25] : memref<4x16x32xf32, #tpu.memory_space<vmem>>, vector<1x16x32xf32>
    %31 = vector.shape_cast %30 : vector<1x16x32xf32> to vector<16x32xf32>
    %cst_26 = arith.constant dense<0.000000e+00> : vector<16x32xf32>
    %32 = tpu.matmul %29, %31, %cst_26 {dimension_numbers = #tpu.dot_dimension_numbers<[1], [0], [0], [1], [0, 0, 1, 1], [], []>} : vector<16x16xf32>, vector<16x32xf32>, vector<16x32xf32> -> vector<16x32xf32>
    %c2_27 = arith.constant 2 : index
    %c0_28 = arith.constant 0 : index
    %c0_29 = arith.constant 0 : index
    %33 = vector.load %arg2[%c2_27, %c0_28, %c0_29] : memref<4x1x32xf32, #tpu.memory_space<vmem>>, vector<1x1x32xf32>
    %34 = vector.shape_cast %33 : vector<1x1x32xf32> to vector<1x32xf32>
    %35 = vector.broadcast %34 : vector<1x32xf32> to vector<16x32xf32>
    %36 = arith.addf %32, %35 : vector<16x32xf32>
    %cst_30 = arith.constant 0.000000e+00 : f32
    %37 = vector.broadcast %cst_30 : f32 to vector<16x32xf32>
    %38 = arith.maximumf %36, %37 : vector<16x32xf32>
    %c2_31 = arith.constant 2 : index
    %39 = memref.load %arg3[%c2_31] : memref<4xf32, #tpu.memory_space<smem>>
    %40 = vector.broadcast %39 : f32 to vector<16x32xf32>
    %41 = arith.mulf %38, %40 : vector<16x32xf32>
    %c3 = arith.constant 3 : index
    %c0_32 = arith.constant 0 : index
    %c0_33 = arith.constant 0 : index
    %42 = vector.load %arg0[%c3, %c0_32, %c0_33] : memref<4x16x16xf32, #tpu.memory_space<vmem>>, vector<1x16x16xf32>
    %43 = vector.shape_cast %42 : vector<1x16x16xf32> to vector<16x16xf32>
    %c3_34 = arith.constant 3 : index
    %c0_35 = arith.constant 0 : index
    %c0_36 = arith.constant 0 : index
    %44 = vector.load %arg1[%c3_34, %c0_35, %c0_36] : memref<4x16x32xf32, #tpu.memory_space<vmem>>, vector<1x16x32xf32>
    %45 = vector.shape_cast %44 : vector<1x16x32xf32> to vector<16x32xf32>
    %cst_37 = arith.constant dense<0.000000e+00> : vector<16x32xf32>
    %46 = tpu.matmul %43, %45, %cst_37 {dimension_numbers = #tpu.dot_dimension_numbers<[1], [0], [0], [1], [0, 0, 1, 1], [], []>} : vector<16x16xf32>, vector<16x32xf32>, vector<16x32xf32> -> vector<16x32xf32>
    %c3_38 = arith.constant 3 : index
    %c0_39 = arith.constant 0 : index
    %c0_40 = arith.constant 0 : index
    %47 = vector.load %arg2[%c3_38, %c0_39, %c0_40] : memref<4x1x32xf32, #tpu.memory_space<vmem>>, vector<1x1x32xf32>
    %48 = vector.shape_cast %47 : vector<1x1x32xf32> to vector<1x32xf32>
    %49 = vector.broadcast %48 : vector<1x32xf32> to vector<16x32xf32>
    %50 = arith.addf %46, %49 : vector<16x32xf32>
    %cst_41 = arith.constant 0.000000e+00 : f32
    %51 = vector.broadcast %cst_41 : f32 to vector<16x32xf32>
    %52 = arith.maximumf %50, %51 : vector<16x32xf32>
    %c3_42 = arith.constant 3 : index
    %53 = memref.load %arg3[%c3_42] : memref<4xf32, #tpu.memory_space<smem>>
    %54 = vector.broadcast %53 : f32 to vector<16x32xf32>
    %55 = arith.mulf %52, %54 : vector<16x32xf32>
    %56 = tpu.concatenate %13, %27, %41, %55 in 1 : vector<16x32xf32>, vector<16x32xf32>, vector<16x32xf32>, vector<16x32xf32> -> vector<16x128xf32>
    %c0_43 = arith.constant 0 : index
    %c0_44 = arith.constant 0 : index
    %57 = vector.load %arg4[%c0_43, %c0_44] : memref<16x128xf32, #tpu.memory_space<vmem>>, vector<16x128xf32>
    tpu.vector_store %arg4[%c0_43, %c0_44], %56 {strides = array<i32>} : memref<16x128xf32, #tpu.memory_space<vmem>>, vector<16x128xf32>,
    return
  }
}

module attributes {stable_mosaic.version = 11 : i64} {
  func.func @_hgt_layer_kernel(%arg0: memref<16x128xf32, #tpu.memory_space<vmem>>, %arg1: memref<4x32x32xf32, #tpu.memory_space<vmem>>, %arg2: memref<4x1x32xf32, #tpu.memory_space<vmem>>, %arg3: memref<4x32x64xf32, #tpu.memory_space<vmem>>, %arg4: memref<4x1x64xf32, #tpu.memory_space<vmem>>, %arg5: memref<4x32x32xf32, #tpu.memory_space<vmem>>, %arg6: memref<4x1x32xf32, #tpu.memory_space<vmem>>, %arg7: memref<4xf32, #tpu.memory_space<smem>>, %arg8: memref<2x16x16xf32, #tpu.memory_space<vmem>>, %arg9: memref<16x128xf32, #tpu.memory_space<vmem>>) attributes {dimension_semantics = [], scalar_prefetch = 0 : i64, scratch_operands = 0 : i64, tpu.core_type = #tpu.core_type<tc>} {
    %c0 = arith.constant 0 : index
    %c0_0 = arith.constant 0 : index
    %0 = vector.load %arg0[%c0, %c0_0] : memref<16x128xf32, #tpu.memory_space<vmem>>, vector<16x128xf32>
    %c0_1 = arith.constant 0 : index
    %c0_2 = arith.constant 0 : index
    %c0_3 = arith.constant 0 : index
    %1 = vector.load %arg8[%c0_1, %c0_2, %c0_3] : memref<2x16x16xf32, #tpu.memory_space<vmem>>, vector<1x16x16xf32>
    %2 = vector.shape_cast %1 : vector<1x16x16xf32> to vector<16x16xf32>
    %c1 = arith.constant 1 : index
    %c0_4 = arith.constant 0 : index
    %c0_5 = arith.constant 0 : index
    %3 = vector.load %arg8[%c1, %c0_4, %c0_5] : memref<2x16x16xf32, #tpu.memory_space<vmem>>, vector<1x16x16xf32>
    %4 = vector.shape_cast %3 : vector<1x16x16xf32> to vector<16x16xf32>
    %cst = arith.constant 0.000000e+00 : f32
    %5 = vector.broadcast %cst : f32 to vector<16x16xf32>
    %6 = arith.cmpf ogt, %2, %5 : vector<16x16xf32>
    %cst_6 = arith.constant 0.000000e+00 : f32
    %7 = vector.broadcast %cst_6 : f32 to vector<16x16xf32>
    %8 = arith.cmpf ogt, %4, %7 : vector<16x16xf32>
    %cst_7 = arith.constant dense<0.000000e+00> : vector<16xf32>
    %9 = vector.multi_reduction <add>, %2, %cst_7 [1] : vector<16x16xf32> to vector<16xf32>
    %10 = vector.shape_cast %9 : vector<16xf32> to vector<16x1xf32>
    %cst_8 = arith.constant 0.000000e+00 : f32
    %11 = vector.broadcast %cst_8 : f32 to vector<16x1xf32>
    %12 = arith.cmpf ogt, %10, %11 : vector<16x1xf32>
    %13 = arith.extui %12 : vector<16x1xi1> to vector<16x1xi32>
    %14 = arith.sitofp %13 : vector<16x1xi32> to vector<16x1xf32>
    %cst_9 = arith.constant dense<0.000000e+00> : vector<16xf32>
    %15 = vector.multi_reduction <add>, %4, %cst_9 [1] : vector<16x16xf32> to vector<16xf32>
    %16 = vector.shape_cast %15 : vector<16xf32> to vector<16x1xf32>
    %cst_10 = arith.constant 0.000000e+00 : f32
    %17 = vector.broadcast %cst_10 : f32 to vector<16x1xf32>
    %18 = arith.cmpf ogt, %16, %17 : vector<16x1xf32>
    %19 = arith.extui %18 : vector<16x1xi1> to vector<16x1xi32>
    %20 = arith.sitofp %19 : vector<16x1xi32> to vector<16x1xf32>
    %21 = vector.extract_strided_slice %0 {offsets = [0, 0], sizes = [16, 32], strides = [1, 1]} : vector<16x128xf32> to vector<16x32xf32>
    %22 = vector.extract_strided_slice %0 {offsets = [0, 32], sizes = [16, 32], strides = [1, 1]} : vector<16x128xf32> to vector<16x32xf32>
    %c0_11 = arith.constant 0 : index
    %c0_12 = arith.constant 0 : index
    %c0_13 = arith.constant 0 : index
    %23 = vector.load %arg1[%c0_11, %c0_12, %c0_13] : memref<4x32x32xf32, #tpu.memory_space<vmem>>, vector<1x32x32xf32>
    %24 = vector.shape_cast %23 : vector<1x32x32xf32> to vector<32x32xf32>
    %cst_14 = arith.constant dense<0.000000e+00> : vector<16x32xf32>
    %25 = tpu.matmul %21, %24, %cst_14 {dimension_numbers = #tpu.dot_dimension_numbers<[1], [0], [0], [1], [0, 0, 1, 1], [], []>} : vector<16x32xf32>, vector<32x32xf32>, vector<16x32xf32> -> vector<16x32xf32>
    %c0_15 = arith.constant 0 : index
    %c0_16 = arith.constant 0 : index
    %c0_17 = arith.constant 0 : index
    %26 = vector.load %arg2[%c0_15, %c0_16, %c0_17] : memref<4x1x32xf32, #tpu.memory_space<vmem>>, vector<1x1x32xf32>
    %27 = vector.shape_cast %26 : vector<1x1x32xf32> to vector<1x32xf32>
    %28 = vector.broadcast %27 : vector<1x32xf32> to vector<16x32xf32>
    %29 = arith.addf %25, %28 : vector<16x32xf32>
    %c0_18 = arith.constant 0 : index
    %c0_19 = arith.constant 0 : index
    %c0_20 = arith.constant 0 : index
    %30 = vector.load %arg3[%c0_18, %c0_19, %c0_20] : memref<4x32x64xf32, #tpu.memory_space<vmem>>, vector<1x32x64xf32>
    %31 = vector.shape_cast %30 : vector<1x32x64xf32> to vector<32x64xf32>
    %cst_21 = arith.constant dense<0.000000e+00> : vector<16x64xf32>
    %32 = tpu.matmul %22, %31, %cst_21 {dimension_numbers = #tpu.dot_dimension_numbers<[1], [0], [0], [1], [0, 0, 1, 1], [], []>} : vector<16x32xf32>, vector<32x64xf32>, vector<16x64xf32> -> vector<16x64xf32>
    %c0_22 = arith.constant 0 : index
    %c0_23 = arith.constant 0 : index
    %c0_24 = arith.constant 0 : index
    %33 = vector.load %arg4[%c0_22, %c0_23, %c0_24] : memref<4x1x64xf32, #tpu.memory_space<vmem>>, vector<1x1x64xf32>
    %34 = vector.shape_cast %33 : vector<1x1x64xf32> to vector<1x64xf32>
    %35 = vector.broadcast %34 : vector<1x64xf32> to vector<16x64xf32>
    %36 = arith.addf %32, %35 : vector<16x64xf32>
    %37 = vector.extract_strided_slice %36 {offsets = [0, 0], sizes = [16, 32], strides = [1, 1]} : vector<16x64xf32> to vector<16x32xf32>
    %38 = vector.extract_strided_slice %36 {offsets = [0, 32], sizes = [16, 32], strides = [1, 1]} : vector<16x64xf32> to vector<16x32xf32>
    %39 = vector.extract_strided_slice %29 {offsets = [0, 0], sizes = [16, 8], strides = [1, 1]} : vector<16x32xf32> to vector<16x8xf32>
    %40 = vector.extract_strided_slice %37 {offsets = [0, 0], sizes = [16, 8], strides = [1, 1]} : vector<16x32xf32> to vector<16x8xf32>
    %cst_25 = arith.constant dense<0.000000e+00> : vector<16x16xf32>
    %41 = tpu.matmul %39, %40, %cst_25 {dimension_numbers = #tpu.dot_dimension_numbers<[1], [1], [0], [0], [0, 0, 1, 0], [], []>} : vector<16x8xf32>, vector<16x8xf32>, vector<16x16xf32> -> vector<16x16xf32>
    %cst_26 = arith.constant -1.000000e+30 : f32
    %42 = vector.broadcast %cst_26 : f32 to vector<16x16xf32>
    %43 = arith.select %6, %41, %42 : vector<16x16xi1>, vector<16x16xf32>
    %44 = vector.extract_strided_slice %29 {offsets = [0, 8], sizes = [16, 8], strides = [1, 1]} : vector<16x32xf32> to vector<16x8xf32>
    %45 = vector.extract_strided_slice %37 {offsets = [0, 8], sizes = [16, 8], strides = [1, 1]} : vector<16x32xf32> to vector<16x8xf32>
    %cst_27 = arith.constant dense<0.000000e+00> : vector<16x16xf32>
    %46 = tpu.matmul %44, %45, %cst_27 {dimension_numbers = #tpu.dot_dimension_numbers<[1], [1], [0], [0], [0, 0, 1, 0], [], []>} : vector<16x8xf32>, vector<16x8xf32>, vector<16x16xf32> -> vector<16x16xf32>
    %cst_28 = arith.constant -1.000000e+30 : f32
    %47 = vector.broadcast %cst_28 : f32 to vector<16x16xf32>
    %48 = arith.select %6, %46, %47 : vector<16x16xi1>, vector<16x16xf32>
    %49 = vector.extract_strided_slice %29 {offsets = [0, 16], sizes = [16, 8], strides = [1, 1]} : vector<16x32xf32> to vector<16x8xf32>
    %50 = vector.extract_strided_slice %37 {offsets = [0, 16], sizes = [16, 8], strides = [1, 1]} : vector<16x32xf32> to vector<16x8xf32>
    %cst_29 = arith.constant dense<0.000000e+00> : vector<16x16xf32>
    %51 = tpu.matmul %49, %50, %cst_29 {dimension_numbers = #tpu.dot_dimension_numbers<[1], [1], [0], [0], [0, 0, 1, 0], [], []>} : vector<16x8xf32>, vector<16x8xf32>, vector<16x16xf32> -> vector<16x16xf32>
    %cst_30 = arith.constant -1.000000e+30 : f32
    %52 = vector.broadcast %cst_30 : f32 to vector<16x16xf32>
    %53 = arith.select %6, %51, %52 : vector<16x16xi1>, vector<16x16xf32>
    %54 = vector.extract_strided_slice %29 {offsets = [0, 24], sizes = [16, 8], strides = [1, 1]} : vector<16x32xf32> to vector<16x8xf32>
    %55 = vector.extract_strided_slice %37 {offsets = [0, 24], sizes = [16, 8], strides = [1, 1]} : vector<16x32xf32> to vector<16x8xf32>
    %cst_31 = arith.constant dense<0.000000e+00> : vector<16x16xf32>
    %56 = tpu.matmul %54, %55, %cst_31 {dimension_numbers = #tpu.dot_dimension_numbers<[1], [1], [0], [0], [0, 0, 1, 0], [], []>} : vector<16x8xf32>, vector<16x8xf32>, vector<16x16xf32> -> vector<16x16xf32>
    %cst_32 = arith.constant -1.000000e+30 : f32
    %57 = vector.broadcast %cst_32 : f32 to vector<16x16xf32>
    %58 = arith.select %6, %56, %57 : vector<16x16xi1>, vector<16x16xf32>
    %59 = tpu.concatenate %43, %48, %53, %58 in 0 : vector<16x16xf32>, vector<16x16xf32>, vector<16x16xf32>, vector<16x16xf32> -> vector<64x16xf32>
    %cst_33 = arith.constant dense<0xFF800000> : vector<64xf32>
    %60 = vector.multi_reduction <maximumf>, %59, %cst_33 [1] : vector<64x16xf32> to vector<64xf32>
    %61 = vector.shape_cast %60 : vector<64xf32> to vector<64x1xf32>
    %62 = vector.broadcast %61 : vector<64x1xf32> to vector<64x16xf32>
    %63 = arith.subf %59, %62 : vector<64x16xf32>
    %64 = math.exp %63 : vector<64x16xf32>
    %cst_34 = arith.constant dense<0.000000e+00> : vector<64xf32>
    %65 = vector.multi_reduction <add>, %64, %cst_34 [1] : vector<64x16xf32> to vector<64xf32>
    %66 = vector.shape_cast %65 : vector<64xf32> to vector<64x1xf32>
    %67 = tpu.reciprocal %66 {approx = true} : vector<64x1xf32> -> vector<64x1xf32>
    %68 = vector.broadcast %67 : vector<64x1xf32> to vector<64x16xf32>
    %69 = arith.mulf %64, %68 : vector<64x16xf32>
    %70 = vector.extract_strided_slice %69 {offsets = [0, 0], sizes = [16, 16], strides = [1, 1]} : vector<64x16xf32> to vector<16x16xf32>
    %71 = vector.extract_strided_slice %38 {offsets = [0, 0], sizes = [16, 8], strides = [1, 1]} : vector<16x32xf32> to vector<16x8xf32>
    %cst_35 = arith.constant dense<0.000000e+00> : vector<16x8xf32>
    %72 = tpu.matmul %70, %71, %cst_35 {dimension_numbers = #tpu.dot_dimension_numbers<[1], [0], [0], [1], [0, 0, 1, 1], [], []>} : vector<16x16xf32>, vector<16x8xf32>, vector<16x8xf32> -> vector<16x8xf32>
    %73 = vector.extract_strided_slice %69 {offsets = [16, 0], sizes = [16, 16], strides = [1, 1]} : vector<64x16xf32> to vector<16x16xf32>
    %74 = vector.extract_strided_slice %38 {offsets = [0, 8], sizes = [16, 8], strides = [1, 1]} : vector<16x32xf32> to vector<16x8xf32>
    %cst_36 = arith.constant dense<0.000000e+00> : vector<16x8xf32>
    %75 = tpu.matmul %73, %74, %cst_36 {dimension_numbers = #tpu.dot_dimension_numbers<[1], [0], [0], [1], [0, 0, 1, 1], [], []>} : vector<16x16xf32>, vector<16x8xf32>, vector<16x8xf32> -> vector<16x8xf32>
    %76 = vector.extract_strided_slice %69 {offsets = [32, 0], sizes = [16, 16], strides = [1, 1]} : vector<64x16xf32> to vector<16x16xf32>
    %77 = vector.extract_strided_slice %38 {offsets = [0, 16], sizes = [16, 8], strides = [1, 1]} : vector<16x32xf32> to vector<16x8xf32>
    %cst_37 = arith.constant dense<0.000000e+00> : vector<16x8xf32>
    %78 = tpu.matmul %76, %77, %cst_37 {dimension_numbers = #tpu.dot_dimension_numbers<[1], [0], [0], [1], [0, 0, 1, 1], [], []>} : vector<16x16xf32>, vector<16x8xf32>, vector<16x8xf32> -> vector<16x8xf32>
    %79 = vector.extract_strided_slice %69 {offsets = [48, 0], sizes = [16, 16], strides = [1, 1]} : vector<64x16xf32> to vector<16x16xf32>
    %80 = vector.extract_strided_slice %38 {offsets = [0, 24], sizes = [16, 8], strides = [1, 1]} : vector<16x32xf32> to vector<16x8xf32>
    %cst_38 = arith.constant dense<0.000000e+00> : vector<16x8xf32>
    %81 = tpu.matmul %79, %80, %cst_38 {dimension_numbers = #tpu.dot_dimension_numbers<[1], [0], [0], [1], [0, 0, 1, 1], [], []>} : vector<16x16xf32>, vector<16x8xf32>, vector<16x8xf32> -> vector<16x8xf32>
    %82 = tpu.concatenate %72, %75, %78, %81 in 1 : vector<16x8xf32>, vector<16x8xf32>, vector<16x8xf32>, vector<16x8xf32> -> vector<16x32xf32>
    %83 = vector.broadcast %14 : vector<16x1xf32> to vector<16x32xf32>
    %84 = arith.mulf %82, %83 : vector<16x32xf32>
    %cst_39 = arith.constant 5.000000e-01 : f32
    %85 = vector.broadcast %cst_39 : f32 to vector<16x32xf32>
    %86 = arith.mulf %85, %84 : vector<16x32xf32>
    %cst_40 = arith.constant 4.471500e-02 : f32
    %87 = vector.broadcast %cst_40 : f32 to vector<16x32xf32>
    %88 = arith.mulf %87, %84 : vector<16x32xf32>
    %89 = arith.mulf %88, %84 : vector<16x32xf32>
    %90 = arith.mulf %89, %84 : vector<16x32xf32>
    %91 = arith.addf %84, %90 : vector<16x32xf32>
    %cst_41 = arith.constant 0.797884583 : f32
    %92 = vector.broadcast %cst_41 : f32 to vector<16x32xf32>
    %93 = arith.mulf %92, %91 : vector<16x32xf32>
    %94 = math.tanh %93 : vector<16x32xf32>
    %cst_42 = arith.constant 1.000000e+00 : f32
    %95 = vector.broadcast %cst_42 : f32 to vector<16x32xf32>
    %96 = arith.addf %95, %94 : vector<16x32xf32>
    %97 = arith.mulf %86, %96 : vector<16x32xf32>
    %c0_43 = arith.constant 0 : index
    %c0_44 = arith.constant 0 : index
    %c0_45 = arith.constant 0 : index
    %98 = vector.load %arg5[%c0_43, %c0_44, %c0_45] : memref<4x32x32xf32, #tpu.memory_space<vmem>>, vector<1x32x32xf32>
    %99 = vector.shape_cast %98 : vector<1x32x32xf32> to vector<32x32xf32>
    %cst_46 = arith.constant dense<0.000000e+00> : vector<16x32xf32>
    %100 = tpu.matmul %97, %99, %cst_46 {dimension_numbers = #tpu.dot_dimension_numbers<[1], [0], [0], [1], [0, 0, 1, 1], [], []>} : vector<16x32xf32>, vector<32x32xf32>, vector<16x32xf32> -> vector<16x32xf32>
    %c0_47 = arith.constant 0 : index
    %c0_48 = arith.constant 0 : index
    %c0_49 = arith.constant 0 : index
    %101 = vector.load %arg6[%c0_47, %c0_48, %c0_49] : memref<4x1x32xf32, #tpu.memory_space<vmem>>, vector<1x1x32xf32>
    %102 = vector.shape_cast %101 : vector<1x1x32xf32> to vector<1x32xf32>
    %103 = vector.broadcast %102 : vector<1x32xf32> to vector<16x32xf32>
    %104 = arith.addf %100, %103 : vector<16x32xf32>
    %c0_50 = arith.constant 0 : index
    %105 = memref.load %arg7[%c0_50] : memref<4xf32, #tpu.memory_space<smem>>
    %106 = vector.broadcast %105 : f32 to vector<16x32xf32>
    %107 = arith.mulf %106, %104 : vector<16x32xf32>
    %cst_51 = arith.constant 1.000000e+00 : f32
    %108 = arith.subf %cst_51, %105 : f32
    %109 = vector.broadcast %108 : f32 to vector<16x32xf32>
    %110 = arith.mulf %109, %21 : vector<16x32xf32>
    %111 = arith.addf %107, %110 : vector<16x32xf32>
    %112 = vector.extract_strided_slice %0 {offsets = [0, 32], sizes = [16, 32], strides = [1, 1]} : vector<16x128xf32> to vector<16x32xf32>
    %113 = vector.extract_strided_slice %0 {offsets = [0, 0], sizes = [16, 32], strides = [1, 1]} : vector<16x128xf32> to vector<16x32xf32>
    %c1_52 = arith.constant 1 : index
    %c0_53 = arith.constant 0 : index
    %c0_54 = arith.constant 0 : index
    %114 = vector.load %arg1[%c1_52, %c0_53, %c0_54] : memref<4x32x32xf32, #tpu.memory_space<vmem>>, vector<1x32x32xf32>
    %115 = vector.shape_cast %114 : vector<1x32x32xf32> to vector<32x32xf32>
    %cst_55 = arith.constant dense<0.000000e+00> : vector<16x32xf32>
    %116 = tpu.matmul %112, %115, %cst_55 {dimension_numbers = #tpu.dot_dimension_numbers<[1], [0], [0], [1], [0, 0, 1, 1], [], []>} : vector<16x32xf32>, vector<32x32xf32>, vector<16x32xf32> -> vector<16x32xf32>
    %c1_56 = arith.constant 1 : index
    %c0_57 = arith.constant 0 : index
    %c0_58 = arith.constant 0 : index
    %117 = vector.load %arg2[%c1_56, %c0_57, %c0_58] : memref<4x1x32xf32, #tpu.memory_space<vmem>>, vector<1x1x32xf32>
    %118 = vector.shape_cast %117 : vector<1x1x32xf32> to vector<1x32xf32>
    %119 = vector.broadcast %118 : vector<1x32xf32> to vector<16x32xf32>
    %120 = arith.addf %116, %119 : vector<16x32xf32>
    %c1_59 = arith.constant 1 : index
    %c0_60 = arith.constant 0 : index
    %c0_61 = arith.constant 0 : index
    %121 = vector.load %arg3[%c1_59, %c0_60, %c0_61] : memref<4x32x64xf32, #tpu.memory_space<vmem>>, vector<1x32x64xf32>
    %122 = vector.shape_cast %121 : vector<1x32x64xf32> to vector<32x64xf32>
    %cst_62 = arith.constant dense<0.000000e+00> : vector<16x64xf32>
    %123 = tpu.matmul %113, %122, %cst_62 {dimension_numbers = #tpu.dot_dimension_numbers<[1], [0], [0], [1], [0, 0, 1, 1], [], []>} : vector<16x32xf32>, vector<32x64xf32>, vector<16x64xf32> -> vector<16x64xf32>
    %c1_63 = arith.constant 1 : index
    %c0_64 = arith.constant 0 : index
    %c0_65 = arith.constant 0 : index
    %124 = vector.load %arg4[%c1_63, %c0_64, %c0_65] : memref<4x1x64xf32, #tpu.memory_space<vmem>>, vector<1x1x64xf32>
    %125 = vector.shape_cast %124 : vector<1x1x64xf32> to vector<1x64xf32>
    %126 = vector.broadcast %125 : vector<1x64xf32> to vector<16x64xf32>
    %127 = arith.addf %123, %126 : vector<16x64xf32>
    %128 = vector.extract_strided_slice %127 {offsets = [0, 0], sizes = [16, 32], strides = [1, 1]} : vector<16x64xf32> to vector<16x32xf32>
    %129 = vector.extract_strided_slice %127 {offsets = [0, 32], sizes = [16, 32], strides = [1, 1]} : vector<16x64xf32> to vector<16x32xf32>
    %130 = vector.extract_strided_slice %120 {offsets = [0, 0], sizes = [16, 8], strides = [1, 1]} : vector<16x32xf32> to vector<16x8xf32>
    %131 = vector.extract_strided_slice %128 {offsets = [0, 0], sizes = [16, 8], strides = [1, 1]} : vector<16x32xf32> to vector<16x8xf32>
    %cst_66 = arith.constant dense<0.000000e+00> : vector<16x16xf32>
    %132 = tpu.matmul %130, %131, %cst_66 {dimension_numbers = #tpu.dot_dimension_numbers<[1], [1], [0], [0], [0, 0, 1, 0], [], []>} : vector<16x8xf32>, vector<16x8xf32>, vector<16x16xf32> -> vector<16x16xf32>
    %cst_67 = arith.constant -1.000000e+30 : f32
    %133 = vector.broadcast %cst_67 : f32 to vector<16x16xf32>
    %134 = arith.select %8, %132, %133 : vector<16x16xi1>, vector<16x16xf32>
    %135 = vector.extract_strided_slice %120 {offsets = [0, 8], sizes = [16, 8], strides = [1, 1]} : vector<16x32xf32> to vector<16x8xf32>
    %136 = vector.extract_strided_slice %128 {offsets = [0, 8], sizes = [16, 8], strides = [1, 1]} : vector<16x32xf32> to vector<16x8xf32>
    %cst_68 = arith.constant dense<0.000000e+00> : vector<16x16xf32>
    %137 = tpu.matmul %135, %136, %cst_68 {dimension_numbers = #tpu.dot_dimension_numbers<[1], [1], [0], [0], [0, 0, 1, 0], [], []>} : vector<16x8xf32>, vector<16x8xf32>, vector<16x16xf32> -> vector<16x16xf32>
    %cst_69 = arith.constant -1.000000e+30 : f32
    %138 = vector.broadcast %cst_69 : f32 to vector<16x16xf32>
    %139 = arith.select %8, %137, %138 : vector<16x16xi1>, vector<16x16xf32>
    %140 = vector.extract_strided_slice %120 {offsets = [0, 16], sizes = [16, 8], strides = [1, 1]} : vector<16x32xf32> to vector<16x8xf32>
    %141 = vector.extract_strided_slice %128 {offsets = [0, 16], sizes = [16, 8], strides = [1, 1]} : vector<16x32xf32> to vector<16x8xf32>
    %cst_70 = arith.constant dense<0.000000e+00> : vector<16x16xf32>
    %142 = tpu.matmul %140, %141, %cst_70 {dimension_numbers = #tpu.dot_dimension_numbers<[1], [1], [0], [0], [0, 0, 1, 0], [], []>} : vector<16x8xf32>, vector<16x8xf32>, vector<16x16xf32> -> vector<16x16xf32>
    %cst_71 = arith.constant -1.000000e+30 : f32
    %143 = vector.broadcast %cst_71 : f32 to vector<16x16xf32>
    %144 = arith.select %8, %142, %143 : vector<16x16xi1>, vector<16x16xf32>
    %145 = vector.extract_strided_slice %120 {offsets = [0, 24], sizes = [16, 8], strides = [1, 1]} : vector<16x32xf32> to vector<16x8xf32>
    %146 = vector.extract_strided_slice %128 {offsets = [0, 24], sizes = [16, 8], strides = [1, 1]} : vector<16x32xf32> to vector<16x8xf32>
    %cst_72 = arith.constant dense<0.000000e+00> : vector<16x16xf32>
    %147 = tpu.matmul %145, %146, %cst_72 {dimension_numbers = #tpu.dot_dimension_numbers<[1], [1], [0], [0], [0, 0, 1, 0], [], []>} : vector<16x8xf32>, vector<16x8xf32>, vector<16x16xf32> -> vector<16x16xf32>
    %cst_73 = arith.constant -1.000000e+30 : f32
    %148 = vector.broadcast %cst_73 : f32 to vector<16x16xf32>
    %149 = arith.select %8, %147, %148 : vector<16x16xi1>, vector<16x16xf32>
    %150 = tpu.concatenate %134, %139, %144, %149 in 0 : vector<16x16xf32>, vector<16x16xf32>, vector<16x16xf32>, vector<16x16xf32> -> vector<64x16xf32>
    %cst_74 = arith.constant dense<0xFF800000> : vector<64xf32>
    %151 = vector.multi_reduction <maximumf>, %150, %cst_74 [1] : vector<64x16xf32> to vector<64xf32>
    %152 = vector.shape_cast %151 : vector<64xf32> to vector<64x1xf32>
    %153 = vector.broadcast %152 : vector<64x1xf32> to vector<64x16xf32>
    %154 = arith.subf %150, %153 : vector<64x16xf32>
    %155 = math.exp %154 : vector<64x16xf32>
    %cst_75 = arith.constant dense<0.000000e+00> : vector<64xf32>
    %156 = vector.multi_reduction <add>, %155, %cst_75 [1] : vector<64x16xf32> to vector<64xf32>
    %157 = vector.shape_cast %156 : vector<64xf32> to vector<64x1xf32>
    %158 = tpu.reciprocal %157 {approx = true} : vector<64x1xf32> -> vector<64x1xf32>
    %159 = vector.broadcast %158 : vector<64x1xf32> to vector<64x16xf32>
    %160 = arith.mulf %155, %159 : vector<64x16xf32>
    %161 = vector.extract_strided_slice %160 {offsets = [0, 0], sizes = [16, 16], strides = [1, 1]} : vector<64x16xf32> to vector<16x16xf32>
    %162 = vector.extract_strided_slice %129 {offsets = [0, 0], sizes = [16, 8], strides = [1, 1]} : vector<16x32xf32> to vector<16x8xf32>
    %cst_76 = arith.constant dense<0.000000e+00> : vector<16x8xf32>
    %163 = tpu.matmul %161, %162, %cst_76 {dimension_numbers = #tpu.dot_dimension_numbers<[1], [0], [0], [1], [0, 0, 1, 1], [], []>} : vector<16x16xf32>, vector<16x8xf32>, vector<16x8xf32> -> vector<16x8xf32>
    %164 = vector.extract_strided_slice %160 {offsets = [16, 0], sizes = [16, 16], strides = [1, 1]} : vector<64x16xf32> to vector<16x16xf32>
    %165 = vector.extract_strided_slice %129 {offsets = [0, 8], sizes = [16, 8], strides = [1, 1]} : vector<16x32xf32> to vector<16x8xf32>
    %cst_77 = arith.constant dense<0.000000e+00> : vector<16x8xf32>
    %166 = tpu.matmul %164, %165, %cst_77 {dimension_numbers = #tpu.dot_dimension_numbers<[1], [0], [0], [1], [0, 0, 1, 1], [], []>} : vector<16x16xf32>, vector<16x8xf32>, vector<16x8xf32> -> vector<16x8xf32>
    %167 = vector.extract_strided_slice %160 {offsets = [32, 0], sizes = [16, 16], strides = [1, 1]} : vector<64x16xf32> to vector<16x16xf32>
    %168 = vector.extract_strided_slice %129 {offsets = [0, 16], sizes = [16, 8], strides = [1, 1]} : vector<16x32xf32> to vector<16x8xf32>
    %cst_78 = arith.constant dense<0.000000e+00> : vector<16x8xf32>
    %169 = tpu.matmul %167, %168, %cst_78 {dimension_numbers = #tpu.dot_dimension_numbers<[1], [0], [0], [1], [0, 0, 1, 1], [], []>} : vector<16x16xf32>, vector<16x8xf32>, vector<16x8xf32> -> vector<16x8xf32>
    %170 = vector.extract_strided_slice %160 {offsets = [48, 0], sizes = [16, 16], strides = [1, 1]} : vector<64x16xf32> to vector<16x16xf32>
    %171 = vector.extract_strided_slice %129 {offsets = [0, 24], sizes = [16, 8], strides = [1, 1]} : vector<16x32xf32> to vector<16x8xf32>
    %cst_79 = arith.constant dense<0.000000e+00> : vector<16x8xf32>
    %172 = tpu.matmul %170, %171, %cst_79 {dimension_numbers = #tpu.dot_dimension_numbers<[1], [0], [0], [1], [0, 0, 1, 1], [], []>} : vector<16x16xf32>, vector<16x8xf32>, vector<16x8xf32> -> vector<16x8xf32>
    %173 = tpu.concatenate %163, %166, %169, %172 in 1 : vector<16x8xf32>, vector<16x8xf32>, vector<16x8xf32>, vector<16x8xf32> -> vector<16x32xf32>
    %174 = vector.broadcast %20 : vector<16x1xf32> to vector<16x32xf32>
    %175 = arith.mulf %173, %174 : vector<16x32xf32>
    %cst_80 = arith.constant 5.000000e-01 : f32
    %176 = vector.broadcast %cst_80 : f32 to vector<16x32xf32>
    %177 = arith.mulf %176, %175 : vector<16x32xf32>
    %cst_81 = arith.constant 4.471500e-02 : f32
    %178 = vector.broadcast %cst_81 : f32 to vector<16x32xf32>
    %179 = arith.mulf %178, %175 : vector<16x32xf32>
    %180 = arith.mulf %179, %175 : vector<16x32xf32>
    %181 = arith.mulf %180, %175 : vector<16x32xf32>
    %182 = arith.addf %175, %181 : vector<16x32xf32>
    %cst_82 = arith.constant 0.797884583 : f32
    %183 = vector.broadcast %cst_82 : f32 to vector<16x32xf32>
    %184 = arith.mulf %183, %182 : vector<16x32xf32>
    %185 = math.tanh %184 : vector<16x32xf32>
    %cst_83 = arith.constant 1.000000e+00 : f32
    %186 = vector.broadcast %cst_83 : f32 to vector<16x32xf32>
    %187 = arith.addf %186, %185 : vector<16x32xf32>
    %188 = arith.mulf %177, %187 : vector<16x32xf32>
    %c1_84 = arith.constant 1 : index
    %c0_85 = arith.constant 0 : index
    %c0_86 = arith.constant 0 : index
    %189 = vector.load %arg5[%c1_84, %c0_85, %c0_86] : memref<4x32x32xf32, #tpu.memory_space<vmem>>, vector<1x32x32xf32>
    %190 = vector.shape_cast %189 : vector<1x32x32xf32> to vector<32x32xf32>
    %cst_87 = arith.constant dense<0.000000e+00> : vector<16x32xf32>
    %191 = tpu.matmul %188, %190, %cst_87 {dimension_numbers = #tpu.dot_dimension_numbers<[1], [0], [0], [1], [0, 0, 1, 1], [], []>} : vector<16x32xf32>, vector<32x32xf32>, vector<16x32xf32> -> vector<16x32xf32>
    %c1_88 = arith.constant 1 : index
    %c0_89 = arith.constant 0 : index
    %c0_90 = arith.constant 0 : index
    %192 = vector.load %arg6[%c1_88, %c0_89, %c0_90] : memref<4x1x32xf32, #tpu.memory_space<vmem>>, vector<1x1x32xf32>
    %193 = vector.shape_cast %192 : vector<1x1x32xf32> to vector<1x32xf32>
    %194 = vector.broadcast %193 : vector<1x32xf32> to vector<16x32xf32>
    %195 = arith.addf %191, %194 : vector<16x32xf32>
    %c1_91 = arith.constant 1 : index
    %196 = memref.load %arg7[%c1_91] : memref<4xf32, #tpu.memory_space<smem>>
    %197 = vector.broadcast %196 : f32 to vector<16x32xf32>
    %198 = arith.mulf %197, %195 : vector<16x32xf32>
    %cst_92 = arith.constant 1.000000e+00 : f32
    %199 = arith.subf %cst_92, %196 : f32
    %200 = vector.broadcast %199 : f32 to vector<16x32xf32>
    %201 = arith.mulf %200, %112 : vector<16x32xf32>
    %202 = arith.addf %198, %201 : vector<16x32xf32>
    %203 = vector.extract_strided_slice %0 {offsets = [0, 64], sizes = [16, 32], strides = [1, 1]} : vector<16x128xf32> to vector<16x32xf32>
    %204 = vector.extract_strided_slice %0 {offsets = [0, 96], sizes = [16, 32], strides = [1, 1]} : vector<16x128xf32> to vector<16x32xf32>
    %c2 = arith.constant 2 : index
    %c0_93 = arith.constant 0 : index
    %c0_94 = arith.constant 0 : index
    %205 = vector.load %arg1[%c2, %c0_93, %c0_94] : memref<4x32x32xf32, #tpu.memory_space<vmem>>, vector<1x32x32xf32>
    %206 = vector.shape_cast %205 : vector<1x32x32xf32> to vector<32x32xf32>
    %cst_95 = arith.constant dense<0.000000e+00> : vector<16x32xf32>
    %207 = tpu.matmul %203, %206, %cst_95 {dimension_numbers = #tpu.dot_dimension_numbers<[1], [0], [0], [1], [0, 0, 1, 1], [], []>} : vector<16x32xf32>, vector<32x32xf32>, vector<16x32xf32> -> vector<16x32xf32>
    %c2_96 = arith.constant 2 : index
    %c0_97 = arith.constant 0 : index
    %c0_98 = arith.constant 0 : index
    %208 = vector.load %arg2[%c2_96, %c0_97, %c0_98] : memref<4x1x32xf32, #tpu.memory_space<vmem>>, vector<1x1x32xf32>
    %209 = vector.shape_cast %208 : vector<1x1x32xf32> to vector<1x32xf32>
    %210 = vector.broadcast %209 : vector<1x32xf32> to vector<16x32xf32>
    %211 = arith.addf %207, %210 : vector<16x32xf32>
    %c2_99 = arith.constant 2 : index
    %c0_100 = arith.constant 0 : index
    %c0_101 = arith.constant 0 : index
    %212 = vector.load %arg3[%c2_99, %c0_100, %c0_101] : memref<4x32x64xf32, #tpu.memory_space<vmem>>, vector<1x32x64xf32>
    %213 = vector.shape_cast %212 : vector<1x32x64xf32> to vector<32x64xf32>
    %cst_102 = arith.constant dense<0.000000e+00> : vector<16x64xf32>
    %214 = tpu.matmul %204, %213, %cst_102 {dimension_numbers = #tpu.dot_dimension_numbers<[1], [0], [0], [1], [0, 0, 1, 1], [], []>} : vector<16x32xf32>, vector<32x64xf32>, vector<16x64xf32> -> vector<16x64xf32>
    %c2_103 = arith.constant 2 : index
    %c0_104 = arith.constant 0 : index
    %c0_105 = arith.constant 0 : index
    %215 = vector.load %arg4[%c2_103, %c0_104, %c0_105] : memref<4x1x64xf32, #tpu.memory_space<vmem>>, vector<1x1x64xf32>
    %216 = vector.shape_cast %215 : vector<1x1x64xf32> to vector<1x64xf32>
    %217 = vector.broadcast %216 : vector<1x64xf32> to vector<16x64xf32>
    %218 = arith.addf %214, %217 : vector<16x64xf32>
    %219 = vector.extract_strided_slice %218 {offsets = [0, 0], sizes = [16, 32], strides = [1, 1]} : vector<16x64xf32> to vector<16x32xf32>
    %220 = vector.extract_strided_slice %218 {offsets = [0, 32], sizes = [16, 32], strides = [1, 1]} : vector<16x64xf32> to vector<16x32xf32>
    %221 = vector.extract_strided_slice %211 {offsets = [0, 0], sizes = [16, 8], strides = [1, 1]} : vector<16x32xf32> to vector<16x8xf32>
    %222 = vector.extract_strided_slice %219 {offsets = [0, 0], sizes = [16, 8], strides = [1, 1]} : vector<16x32xf32> to vector<16x8xf32>
    %cst_106 = arith.constant dense<0.000000e+00> : vector<16x16xf32>
    %223 = tpu.matmul %221, %222, %cst_106 {dimension_numbers = #tpu.dot_dimension_numbers<[1], [1], [0], [0], [0, 0, 1, 0], [], []>} : vector<16x8xf32>, vector<16x8xf32>, vector<16x16xf32> -> vector<16x16xf32>
    %cst_107 = arith.constant -1.000000e+30 : f32
    %224 = vector.broadcast %cst_107 : f32 to vector<16x16xf32>
    %225 = arith.select %6, %223, %224 : vector<16x16xi1>, vector<16x16xf32>
    %226 = vector.extract_strided_slice %211 {offsets = [0, 8], sizes = [16, 8], strides = [1, 1]} : vector<16x32xf32> to vector<16x8xf32>
    %227 = vector.extract_strided_slice %219 {offsets = [0, 8], sizes = [16, 8], strides = [1, 1]} : vector<16x32xf32> to vector<16x8xf32>
    %cst_108 = arith.constant dense<0.000000e+00> : vector<16x16xf32>
    %228 = tpu.matmul %226, %227, %cst_108 {dimension_numbers = #tpu.dot_dimension_numbers<[1], [1], [0], [0], [0, 0, 1, 0], [], []>} : vector<16x8xf32>, vector<16x8xf32>, vector<16x16xf32> -> vector<16x16xf32>
    %cst_109 = arith.constant -1.000000e+30 : f32
    %229 = vector.broadcast %cst_109 : f32 to vector<16x16xf32>
    %230 = arith.select %6, %228, %229 : vector<16x16xi1>, vector<16x16xf32>
    %231 = vector.extract_strided_slice %211 {offsets = [0, 16], sizes = [16, 8], strides = [1, 1]} : vector<16x32xf32> to vector<16x8xf32>
    %232 = vector.extract_strided_slice %219 {offsets = [0, 16], sizes = [16, 8], strides = [1, 1]} : vector<16x32xf32> to vector<16x8xf32>
    %cst_110 = arith.constant dense<0.000000e+00> : vector<16x16xf32>
    %233 = tpu.matmul %231, %232, %cst_110 {dimension_numbers = #tpu.dot_dimension_numbers<[1], [1], [0], [0], [0, 0, 1, 0], [], []>} : vector<16x8xf32>, vector<16x8xf32>, vector<16x16xf32> -> vector<16x16xf32>
    %cst_111 = arith.constant -1.000000e+30 : f32
    %234 = vector.broadcast %cst_111 : f32 to vector<16x16xf32>
    %235 = arith.select %6, %233, %234 : vector<16x16xi1>, vector<16x16xf32>
    %236 = vector.extract_strided_slice %211 {offsets = [0, 24], sizes = [16, 8], strides = [1, 1]} : vector<16x32xf32> to vector<16x8xf32>
    %237 = vector.extract_strided_slice %219 {offsets = [0, 24], sizes = [16, 8], strides = [1, 1]} : vector<16x32xf32> to vector<16x8xf32>
    %cst_112 = arith.constant dense<0.000000e+00> : vector<16x16xf32>
    %238 = tpu.matmul %236, %237, %cst_112 {dimension_numbers = #tpu.dot_dimension_numbers<[1], [1], [0], [0], [0, 0, 1, 0], [], []>} : vector<16x8xf32>, vector<16x8xf32>, vector<16x16xf32> -> vector<16x16xf32>
    %cst_113 = arith.constant -1.000000e+30 : f32
    %239 = vector.broadcast %cst_113 : f32 to vector<16x16xf32>
    %240 = arith.select %6, %238, %239 : vector<16x16xi1>, vector<16x16xf32>
    %241 = tpu.concatenate %225, %230, %235, %240 in 0 : vector<16x16xf32>, vector<16x16xf32>, vector<16x16xf32>, vector<16x16xf32> -> vector<64x16xf32>
    %cst_114 = arith.constant dense<0xFF800000> : vector<64xf32>
    %242 = vector.multi_reduction <maximumf>, %241, %cst_114 [1] : vector<64x16xf32> to vector<64xf32>
    %243 = vector.shape_cast %242 : vector<64xf32> to vector<64x1xf32>
    %244 = vector.broadcast %243 : vector<64x1xf32> to vector<64x16xf32>
    %245 = arith.subf %241, %244 : vector<64x16xf32>
    %246 = math.exp %245 : vector<64x16xf32>
    %cst_115 = arith.constant dense<0.000000e+00> : vector<64xf32>
    %247 = vector.multi_reduction <add>, %246, %cst_115 [1] : vector<64x16xf32> to vector<64xf32>
    %248 = vector.shape_cast %247 : vector<64xf32> to vector<64x1xf32>
    %249 = tpu.reciprocal %248 {approx = true} : vector<64x1xf32> -> vector<64x1xf32>
    %250 = vector.broadcast %249 : vector<64x1xf32> to vector<64x16xf32>
    %251 = arith.mulf %246, %250 : vector<64x16xf32>
    %252 = vector.extract_strided_slice %251 {offsets = [0, 0], sizes = [16, 16], strides = [1, 1]} : vector<64x16xf32> to vector<16x16xf32>
    %253 = vector.extract_strided_slice %220 {offsets = [0, 0], sizes = [16, 8], strides = [1, 1]} : vector<16x32xf32> to vector<16x8xf32>
    %cst_116 = arith.constant dense<0.000000e+00> : vector<16x8xf32>
    %254 = tpu.matmul %252, %253, %cst_116 {dimension_numbers = #tpu.dot_dimension_numbers<[1], [0], [0], [1], [0, 0, 1, 1], [], []>} : vector<16x16xf32>, vector<16x8xf32>, vector<16x8xf32> -> vector<16x8xf32>
    %255 = vector.extract_strided_slice %251 {offsets = [16, 0], sizes = [16, 16], strides = [1, 1]} : vector<64x16xf32> to vector<16x16xf32>
    %256 = vector.extract_strided_slice %220 {offsets = [0, 8], sizes = [16, 8], strides = [1, 1]} : vector<16x32xf32> to vector<16x8xf32>
    %cst_117 = arith.constant dense<0.000000e+00> : vector<16x8xf32>
    %257 = tpu.matmul %255, %256, %cst_117 {dimension_numbers = #tpu.dot_dimension_numbers<[1], [0], [0], [1], [0, 0, 1, 1], [], []>} : vector<16x16xf32>, vector<16x8xf32>, vector<16x8xf32> -> vector<16x8xf32>
    %258 = vector.extract_strided_slice %251 {offsets = [32, 0], sizes = [16, 16], strides = [1, 1]} : vector<64x16xf32> to vector<16x16xf32>
    %259 = vector.extract_strided_slice %220 {offsets = [0, 16], sizes = [16, 8], strides = [1, 1]} : vector<16x32xf32> to vector<16x8xf32>
    %cst_118 = arith.constant dense<0.000000e+00> : vector<16x8xf32>
    %260 = tpu.matmul %258, %259, %cst_118 {dimension_numbers = #tpu.dot_dimension_numbers<[1], [0], [0], [1], [0, 0, 1, 1], [], []>} : vector<16x16xf32>, vector<16x8xf32>, vector<16x8xf32> -> vector<16x8xf32>
    %261 = vector.extract_strided_slice %251 {offsets = [48, 0], sizes = [16, 16], strides = [1, 1]} : vector<64x16xf32> to vector<16x16xf32>
    %262 = vector.extract_strided_slice %220 {offsets = [0, 24], sizes = [16, 8], strides = [1, 1]} : vector<16x32xf32> to vector<16x8xf32>
    %cst_119 = arith.constant dense<0.000000e+00> : vector<16x8xf32>
    %263 = tpu.matmul %261, %262, %cst_119 {dimension_numbers = #tpu.dot_dimension_numbers<[1], [0], [0], [1], [0, 0, 1, 1], [], []>} : vector<16x16xf32>, vector<16x8xf32>, vector<16x8xf32> -> vector<16x8xf32>
    %264 = tpu.concatenate %254, %257, %260, %263 in 1 : vector<16x8xf32>, vector<16x8xf32>, vector<16x8xf32>, vector<16x8xf32> -> vector<16x32xf32>
    %265 = vector.broadcast %14 : vector<16x1xf32> to vector<16x32xf32>
    %266 = arith.mulf %264, %265 : vector<16x32xf32>
    %cst_120 = arith.constant 5.000000e-01 : f32
    %267 = vector.broadcast %cst_120 : f32 to vector<16x32xf32>
    %268 = arith.mulf %267, %266 : vector<16x32xf32>
    %cst_121 = arith.constant 4.471500e-02 : f32
    %269 = vector.broadcast %cst_121 : f32 to vector<16x32xf32>
    %270 = arith.mulf %269, %266 : vector<16x32xf32>
    %271 = arith.mulf %270, %266 : vector<16x32xf32>
    %272 = arith.mulf %271, %266 : vector<16x32xf32>
    %273 = arith.addf %266, %272 : vector<16x32xf32>
    %cst_122 = arith.constant 0.797884583 : f32
    %274 = vector.broadcast %cst_122 : f32 to vector<16x32xf32>
    %275 = arith.mulf %274, %273 : vector<16x32xf32>
    %276 = math.tanh %275 : vector<16x32xf32>
    %cst_123 = arith.constant 1.000000e+00 : f32
    %277 = vector.broadcast %cst_123 : f32 to vector<16x32xf32>
    %278 = arith.addf %277, %276 : vector<16x32xf32>
    %279 = arith.mulf %268, %278 : vector<16x32xf32>
    %c2_124 = arith.constant 2 : index
    %c0_125 = arith.constant 0 : index
    %c0_126 = arith.constant 0 : index
    %280 = vector.load %arg5[%c2_124, %c0_125, %c0_126] : memref<4x32x32xf32, #tpu.memory_space<vmem>>, vector<1x32x32xf32>
    %281 = vector.shape_cast %280 : vector<1x32x32xf32> to vector<32x32xf32>
    %cst_127 = arith.constant dense<0.000000e+00> : vector<16x32xf32>
    %282 = tpu.matmul %279, %281, %cst_127 {dimension_numbers = #tpu.dot_dimension_numbers<[1], [0], [0], [1], [0, 0, 1, 1], [], []>} : vector<16x32xf32>, vector<32x32xf32>, vector<16x32xf32> -> vector<16x32xf32>
    %c2_128 = arith.constant 2 : index
    %c0_129 = arith.constant 0 : index
    %c0_130 = arith.constant 0 : index
    %283 = vector.load %arg6[%c2_128, %c0_129, %c0_130] : memref<4x1x32xf32, #tpu.memory_space<vmem>>, vector<1x1x32xf32>
    %284 = vector.shape_cast %283 : vector<1x1x32xf32> to vector<1x32xf32>
    %285 = vector.broadcast %284 : vector<1x32xf32> to vector<16x32xf32>
    %286 = arith.addf %282, %285 : vector<16x32xf32>
    %c2_131 = arith.constant 2 : index
    %287 = memref.load %arg7[%c2_131] : memref<4xf32, #tpu.memory_space<smem>>
    %288 = vector.broadcast %287 : f32 to vector<16x32xf32>
    %289 = arith.mulf %288, %286 : vector<16x32xf32>
    %cst_132 = arith.constant 1.000000e+00 : f32
    %290 = arith.subf %cst_132, %287 : f32
    %291 = vector.broadcast %290 : f32 to vector<16x32xf32>
    %292 = arith.mulf %291, %203 : vector<16x32xf32>
    %293 = arith.addf %289, %292 : vector<16x32xf32>
    %294 = vector.extract_strided_slice %0 {offsets = [0, 96], sizes = [16, 32], strides = [1, 1]} : vector<16x128xf32> to vector<16x32xf32>
    %295 = vector.extract_strided_slice %0 {offsets = [0, 64], sizes = [16, 32], strides = [1, 1]} : vector<16x128xf32> to vector<16x32xf32>
    %c3 = arith.constant 3 : index
    %c0_133 = arith.constant 0 : index
    %c0_134 = arith.constant 0 : index
    %296 = vector.load %arg1[%c3, %c0_133, %c0_134] : memref<4x32x32xf32, #tpu.memory_space<vmem>>, vector<1x32x32xf32>
    %297 = vector.shape_cast %296 : vector<1x32x32xf32> to vector<32x32xf32>
    %cst_135 = arith.constant dense<0.000000e+00> : vector<16x32xf32>
    %298 = tpu.matmul %294, %297, %cst_135 {dimension_numbers = #tpu.dot_dimension_numbers<[1], [0], [0], [1], [0, 0, 1, 1], [], []>} : vector<16x32xf32>, vector<32x32xf32>, vector<16x32xf32> -> vector<16x32xf32>
    %c3_136 = arith.constant 3 : index
    %c0_137 = arith.constant 0 : index
    %c0_138 = arith.constant 0 : index
    %299 = vector.load %arg2[%c3_136, %c0_137, %c0_138] : memref<4x1x32xf32, #tpu.memory_space<vmem>>, vector<1x1x32xf32>
    %300 = vector.shape_cast %299 : vector<1x1x32xf32> to vector<1x32xf32>
    %301 = vector.broadcast %300 : vector<1x32xf32> to vector<16x32xf32>
    %302 = arith.addf %298, %301 : vector<16x32xf32>
    %c3_139 = arith.constant 3 : index
    %c0_140 = arith.constant 0 : index
    %c0_141 = arith.constant 0 : index
    %303 = vector.load %arg3[%c3_139, %c0_140, %c0_141] : memref<4x32x64xf32, #tpu.memory_space<vmem>>, vector<1x32x64xf32>
    %304 = vector.shape_cast %303 : vector<1x32x64xf32> to vector<32x64xf32>
    %cst_142 = arith.constant dense<0.000000e+00> : vector<16x64xf32>
    %305 = tpu.matmul %295, %304, %cst_142 {dimension_numbers = #tpu.dot_dimension_numbers<[1], [0], [0], [1], [0, 0, 1, 1], [], []>} : vector<16x32xf32>, vector<32x64xf32>, vector<16x64xf32> -> vector<16x64xf32>
    %c3_143 = arith.constant 3 : index
    %c0_144 = arith.constant 0 : index
    %c0_145 = arith.constant 0 : index
    %306 = vector.load %arg4[%c3_143, %c0_144, %c0_145] : memref<4x1x64xf32, #tpu.memory_space<vmem>>, vector<1x1x64xf32>
    %307 = vector.shape_cast %306 : vector<1x1x64xf32> to vector<1x64xf32>
    %308 = vector.broadcast %307 : vector<1x64xf32> to vector<16x64xf32>
    %309 = arith.addf %305, %308 : vector<16x64xf32>
    %310 = vector.extract_strided_slice %309 {offsets = [0, 0], sizes = [16, 32], strides = [1, 1]} : vector<16x64xf32> to vector<16x32xf32>
    %311 = vector.extract_strided_slice %309 {offsets = [0, 32], sizes = [16, 32], strides = [1, 1]} : vector<16x64xf32> to vector<16x32xf32>
    %312 = vector.extract_strided_slice %302 {offsets = [0, 0], sizes = [16, 8], strides = [1, 1]} : vector<16x32xf32> to vector<16x8xf32>
    %313 = vector.extract_strided_slice %310 {offsets = [0, 0], sizes = [16, 8], strides = [1, 1]} : vector<16x32xf32> to vector<16x8xf32>
    %cst_146 = arith.constant dense<0.000000e+00> : vector<16x16xf32>
    %314 = tpu.matmul %312, %313, %cst_146 {dimension_numbers = #tpu.dot_dimension_numbers<[1], [1], [0], [0], [0, 0, 1, 0], [], []>} : vector<16x8xf32>, vector<16x8xf32>, vector<16x16xf32> -> vector<16x16xf32>
    %cst_147 = arith.constant -1.000000e+30 : f32
    %315 = vector.broadcast %cst_147 : f32 to vector<16x16xf32>
    %316 = arith.select %8, %314, %315 : vector<16x16xi1>, vector<16x16xf32>
    %317 = vector.extract_strided_slice %302 {offsets = [0, 8], sizes = [16, 8], strides = [1, 1]} : vector<16x32xf32> to vector<16x8xf32>
    %318 = vector.extract_strided_slice %310 {offsets = [0, 8], sizes = [16, 8], strides = [1, 1]} : vector<16x32xf32> to vector<16x8xf32>
    %cst_148 = arith.constant dense<0.000000e+00> : vector<16x16xf32>
    %319 = tpu.matmul %317, %318, %cst_148 {dimension_numbers = #tpu.dot_dimension_numbers<[1], [1], [0], [0], [0, 0, 1, 0], [], []>} : vector<16x8xf32>, vector<16x8xf32>, vector<16x16xf32> -> vector<16x16xf32>
    %cst_149 = arith.constant -1.000000e+30 : f32
    %320 = vector.broadcast %cst_149 : f32 to vector<16x16xf32>
    %321 = arith.select %8, %319, %320 : vector<16x16xi1>, vector<16x16xf32>
    %322 = vector.extract_strided_slice %302 {offsets = [0, 16], sizes = [16, 8], strides = [1, 1]} : vector<16x32xf32> to vector<16x8xf32>
    %323 = vector.extract_strided_slice %310 {offsets = [0, 16], sizes = [16, 8], strides = [1, 1]} : vector<16x32xf32> to vector<16x8xf32>
    %cst_150 = arith.constant dense<0.000000e+00> : vector<16x16xf32>
    %324 = tpu.matmul %322, %323, %cst_150 {dimension_numbers = #tpu.dot_dimension_numbers<[1], [1], [0], [0], [0, 0, 1, 0], [], []>} : vector<16x8xf32>, vector<16x8xf32>, vector<16x16xf32> -> vector<16x16xf32>
    %cst_151 = arith.constant -1.000000e+30 : f32
    %325 = vector.broadcast %cst_151 : f32 to vector<16x16xf32>
    %326 = arith.select %8, %324, %325 : vector<16x16xi1>, vector<16x16xf32>
    %327 = vector.extract_strided_slice %302 {offsets = [0, 24], sizes = [16, 8], strides = [1, 1]} : vector<16x32xf32> to vector<16x8xf32>
    %328 = vector.extract_strided_slice %310 {offsets = [0, 24], sizes = [16, 8], strides = [1, 1]} : vector<16x32xf32> to vector<16x8xf32>
    %cst_152 = arith.constant dense<0.000000e+00> : vector<16x16xf32>
    %329 = tpu.matmul %327, %328, %cst_152 {dimension_numbers = #tpu.dot_dimension_numbers<[1], [1], [0], [0], [0, 0, 1, 0], [], []>} : vector<16x8xf32>, vector<16x8xf32>, vector<16x16xf32> -> vector<16x16xf32>
    %cst_153 = arith.constant -1.000000e+30 : f32
    %330 = vector.broadcast %cst_153 : f32 to vector<16x16xf32>
    %331 = arith.select %8, %329, %330 : vector<16x16xi1>, vector<16x16xf32>
    %332 = tpu.concatenate %316, %321, %326, %331 in 0 : vector<16x16xf32>, vector<16x16xf32>, vector<16x16xf32>, vector<16x16xf32> -> vector<64x16xf32>
    %cst_154 = arith.constant dense<0xFF800000> : vector<64xf32>
    %333 = vector.multi_reduction <maximumf>, %332, %cst_154 [1] : vector<64x16xf32> to vector<64xf32>
    %334 = vector.shape_cast %333 : vector<64xf32> to vector<64x1xf32>
    %335 = vector.broadcast %334 : vector<64x1xf32> to vector<64x16xf32>
    %336 = arith.subf %332, %335 : vector<64x16xf32>
    %337 = math.exp %336 : vector<64x16xf32>
    %cst_155 = arith.constant dense<0.000000e+00> : vector<64xf32>
    %338 = vector.multi_reduction <add>, %337, %cst_155 [1] : vector<64x16xf32> to vector<64xf32>
    %339 = vector.shape_cast %338 : vector<64xf32> to vector<64x1xf32>
    %340 = tpu.reciprocal %339 {approx = true} : vector<64x1xf32> -> vector<64x1xf32>
    %341 = vector.broadcast %340 : vector<64x1xf32> to vector<64x16xf32>
    %342 = arith.mulf %337, %341 : vector<64x16xf32>
    %343 = vector.extract_strided_slice %342 {offsets = [0, 0], sizes = [16, 16], strides = [1, 1]} : vector<64x16xf32> to vector<16x16xf32>
    %344 = vector.extract_strided_slice %311 {offsets = [0, 0], sizes = [16, 8], strides = [1, 1]} : vector<16x32xf32> to vector<16x8xf32>
    %cst_156 = arith.constant dense<0.000000e+00> : vector<16x8xf32>
    %345 = tpu.matmul %343, %344, %cst_156 {dimension_numbers = #tpu.dot_dimension_numbers<[1], [0], [0], [1], [0, 0, 1, 1], [], []>} : vector<16x16xf32>, vector<16x8xf32>, vector<16x8xf32> -> vector<16x8xf32>
    %346 = vector.extract_strided_slice %342 {offsets = [16, 0], sizes = [16, 16], strides = [1, 1]} : vector<64x16xf32> to vector<16x16xf32>
    %347 = vector.extract_strided_slice %311 {offsets = [0, 8], sizes = [16, 8], strides = [1, 1]} : vector<16x32xf32> to vector<16x8xf32>
    %cst_157 = arith.constant dense<0.000000e+00> : vector<16x8xf32>
    %348 = tpu.matmul %346, %347, %cst_157 {dimension_numbers = #tpu.dot_dimension_numbers<[1], [0], [0], [1], [0, 0, 1, 1], [], []>} : vector<16x16xf32>, vector<16x8xf32>, vector<16x8xf32> -> vector<16x8xf32>
    %349 = vector.extract_strided_slice %342 {offsets = [32, 0], sizes = [16, 16], strides = [1, 1]} : vector<64x16xf32> to vector<16x16xf32>
    %350 = vector.extract_strided_slice %311 {offsets = [0, 16], sizes = [16, 8], strides = [1, 1]} : vector<16x32xf32> to vector<16x8xf32>
    %cst_158 = arith.constant dense<0.000000e+00> : vector<16x8xf32>
    %351 = tpu.matmul %349, %350, %cst_158 {dimension_numbers = #tpu.dot_dimension_numbers<[1], [0], [0], [1], [0, 0, 1, 1], [], []>} : vector<16x16xf32>, vector<16x8xf32>, vector<16x8xf32> -> vector<16x8xf32>
    %352 = vector.extract_strided_slice %342 {offsets = [48, 0], sizes = [16, 16], strides = [1, 1]} : vector<64x16xf32> to vector<16x16xf32>
    %353 = vector.extract_strided_slice %311 {offsets = [0, 24], sizes = [16, 8], strides = [1, 1]} : vector<16x32xf32> to vector<16x8xf32>
    %cst_159 = arith.constant dense<0.000000e+00> : vector<16x8xf32>
    %354 = tpu.matmul %352, %353, %cst_159 {dimension_numbers = #tpu.dot_dimension_numbers<[1], [0], [0], [1], [0, 0, 1, 1], [], []>} : vector<16x16xf32>, vector<16x8xf32>, vector<16x8xf32> -> vector<16x8xf32>
    %355 = tpu.concatenate %345, %348, %351, %354 in 1 : vector<16x8xf32>, vector<16x8xf32>, vector<16x8xf32>, vector<16x8xf32> -> vector<16x32xf32>
    %356 = vector.broadcast %20 : vector<16x1xf32> to vector<16x32xf32>
    %357 = arith.mulf %355, %356 : vector<16x32xf32>
    %cst_160 = arith.constant 5.000000e-01 : f32
    %358 = vector.broadcast %cst_160 : f32 to vector<16x32xf32>
    %359 = arith.mulf %358, %357 : vector<16x32xf32>
    %cst_161 = arith.constant 4.471500e-02 : f32
    %360 = vector.broadcast %cst_161 : f32 to vector<16x32xf32>
    %361 = arith.mulf %360, %357 : vector<16x32xf32>
    %362 = arith.mulf %361, %357 : vector<16x32xf32>
    %363 = arith.mulf %362, %357 : vector<16x32xf32>
    %364 = arith.addf %357, %363 : vector<16x32xf32>
    %cst_162 = arith.constant 0.797884583 : f32
    %365 = vector.broadcast %cst_162 : f32 to vector<16x32xf32>
    %366 = arith.mulf %365, %364 : vector<16x32xf32>
    %367 = math.tanh %366 : vector<16x32xf32>
    %cst_163 = arith.constant 1.000000e+00 : f32
    %368 = vector.broadcast %cst_163 : f32 to vector<16x32xf32>
    %369 = arith.addf %368, %367 : vector<16x32xf32>
    %370 = arith.mulf %359, %369 : vector<16x32xf32>
    %c3_164 = arith.constant 3 : index
    %c0_165 = arith.constant 0 : index
    %c0_166 = arith.constant 0 : index
    %371 = vector.load %arg5[%c3_164, %c0_165, %c0_166] : memref<4x32x32xf32, #tpu.memory_space<vmem>>, vector<1x32x32xf32>
    %372 = vector.shape_cast %371 : vector<1x32x32xf32> to vector<32x32xf32>
    %cst_167 = arith.constant dense<0.000000e+00> : vector<16x32xf32>
    %373 = tpu.matmul %370, %372, %cst_167 {dimension_numbers = #tpu.dot_dimension_numbers<[1], [0], [0], [1], [0, 0, 1, 1], [], []>} : vector<16x32xf32>, vector<32x32xf32>, vector<16x32xf32> -> vector<16x32xf32>
    %c3_168 = arith.constant 3 : index
    %c0_169 = arith.constant 0 : index
    %c0_170 = arith.constant 0 : index
    %374 = vector.load %arg6[%c3_168, %c0_169, %c0_170] : memref<4x1x32xf32, #tpu.memory_space<vmem>>, vector<1x1x32xf32>
    %375 = vector.shape_cast %374 : vector<1x1x32xf32> to vector<1x32xf32>
    %376 = vector.broadcast %375 : vector<1x32xf32> to vector<16x32xf32>
    %377 = arith.addf %373, %376 : vector<16x32xf32>
    %c3_171 = arith.constant 3 : index
    %378 = memref.load %arg7[%c3_171] : memref<4xf32, #tpu.memory_space<smem>>
    %379 = vector.broadcast %378 : f32 to vector<16x32xf32>
    %380 = arith.mulf %379, %377 : vector<16x32xf32>
    %cst_172 = arith.constant 1.000000e+00 : f32
    %381 = arith.subf %cst_172, %378 : f32
    %382 = vector.broadcast %381 : f32 to vector<16x32xf32>
    %383 = arith.mulf %382, %294 : vector<16x32xf32>
    %384 = arith.addf %380, %383 : vector<16x32xf32>
    %385 = tpu.concatenate %111, %202, %293, %384 in 1 : vector<16x32xf32>, vector<16x32xf32>, vector<16x32xf32>, vector<16x32xf32> -> vector<16x128xf32>
    %c0_173 = arith.constant 0 : index
    %c0_174 = arith.constant 0 : index
    %386 = vector.load %arg9[%c0_173, %c0_174] : memref<16x128xf32, #tpu.memory_space<vmem>>, vector<16x128xf32>
    tpu.vector_store %arg9[%c0_173, %c0_174], %385 {strides = array<i32>} : memref<16x128xf32, #tpu.memory_space<vmem>>, vector<16x128xf32>,
    return
  }
}

module attributes {stable_mosaic.version = 11 : i64} {
  func.func @_final_kernel(%arg0: memref<2x16x128xf32, #tpu.memory_space<vmem>>, %arg1: memref<2xf32, #tpu.memory_space<smem>>, %arg2: memref<16x16xf32, #tpu.memory_space<vmem>>) attributes {dimension_semantics = [], scalar_prefetch = 0 : i64, scratch_operands = 0 : i64, tpu.core_type = #tpu.core_type<tc>} {
    %c0 = arith.constant 0 : index
    %0 = memref.load %arg1[%c0] : memref<2xf32, #tpu.memory_space<smem>>
    %c1 = arith.constant 1 : index
    %1 = memref.load %arg1[%c1] : memref<2xf32, #tpu.memory_space<smem>>
    %c0_0 = arith.constant 0 : index
    %c0_1 = arith.constant 0 : index
    %c0_2 = arith.constant 0 : index
    %2 = vector.load %arg0[%c0_0, %c0_1, %c0_2] : memref<2x16x128xf32, #tpu.memory_space<vmem>>, vector<1x16x128xf32>
    %3 = vector.shape_cast %2 : vector<1x16x128xf32> to vector<16x128xf32>
    %4 = vector.extract_strided_slice %3 {offsets = [0, 0], sizes = [16, 32], strides = [1, 1]} : vector<16x128xf32> to vector<16x32xf32>
    %c1_3 = arith.constant 1 : index
    %c0_4 = arith.constant 0 : index
    %c0_5 = arith.constant 0 : index
    %5 = vector.load %arg0[%c1_3, %c0_4, %c0_5] : memref<2x16x128xf32, #tpu.memory_space<vmem>>, vector<1x16x128xf32>
    %6 = vector.shape_cast %5 : vector<1x16x128xf32> to vector<16x128xf32>
    %7 = vector.extract_strided_slice %6 {offsets = [0, 0], sizes = [16, 32], strides = [1, 1]} : vector<16x128xf32> to vector<16x32xf32>
    %c0_6 = arith.constant 0 : index
    %c0_7 = arith.constant 0 : index
    %c0_8 = arith.constant 0 : index
    %8 = vector.load %arg0[%c0_6, %c0_7, %c0_8] : memref<2x16x128xf32, #tpu.memory_space<vmem>>, vector<1x16x128xf32>
    %9 = vector.shape_cast %8 : vector<1x16x128xf32> to vector<16x128xf32>
    %10 = vector.extract_strided_slice %9 {offsets = [0, 32], sizes = [16, 32], strides = [1, 1]} : vector<16x128xf32> to vector<16x32xf32>
    %c1_9 = arith.constant 1 : index
    %c0_10 = arith.constant 0 : index
    %c0_11 = arith.constant 0 : index
    %11 = vector.load %arg0[%c1_9, %c0_10, %c0_11] : memref<2x16x128xf32, #tpu.memory_space<vmem>>, vector<1x16x128xf32>
    %12 = vector.shape_cast %11 : vector<1x16x128xf32> to vector<16x128xf32>
    %13 = vector.extract_strided_slice %12 {offsets = [0, 32], sizes = [16, 32], strides = [1, 1]} : vector<16x128xf32> to vector<16x32xf32>
    %c0_12 = arith.constant 0 : index
    %c0_13 = arith.constant 0 : index
    %c0_14 = arith.constant 0 : index
    %14 = vector.load %arg0[%c0_12, %c0_13, %c0_14] : memref<2x16x128xf32, #tpu.memory_space<vmem>>, vector<1x16x128xf32>
    %15 = vector.shape_cast %14 : vector<1x16x128xf32> to vector<16x128xf32>
    %16 = vector.extract_strided_slice %15 {offsets = [0, 64], sizes = [16, 32], strides = [1, 1]} : vector<16x128xf32> to vector<16x32xf32>
    %c1_15 = arith.constant 1 : index
    %c0_16 = arith.constant 0 : index
    %c0_17 = arith.constant 0 : index
    %17 = vector.load %arg0[%c1_15, %c0_16, %c0_17] : memref<2x16x128xf32, #tpu.memory_space<vmem>>, vector<1x16x128xf32>
    %18 = vector.shape_cast %17 : vector<1x16x128xf32> to vector<16x128xf32>
    %19 = vector.extract_strided_slice %18 {offsets = [0, 64], sizes = [16, 32], strides = [1, 1]} : vector<16x128xf32> to vector<16x32xf32>
    %c0_18 = arith.constant 0 : index
    %c0_19 = arith.constant 0 : index
    %c0_20 = arith.constant 0 : index
    %20 = vector.load %arg0[%c0_18, %c0_19, %c0_20] : memref<2x16x128xf32, #tpu.memory_space<vmem>>, vector<1x16x128xf32>
    %21 = vector.shape_cast %20 : vector<1x16x128xf32> to vector<16x128xf32>
    %22 = vector.extract_strided_slice %21 {offsets = [0, 96], sizes = [16, 32], strides = [1, 1]} : vector<16x128xf32> to vector<16x32xf32>
    %c1_21 = arith.constant 1 : index
    %c0_22 = arith.constant 0 : index
    %c0_23 = arith.constant 0 : index
    %23 = vector.load %arg0[%c1_21, %c0_22, %c0_23] : memref<2x16x128xf32, #tpu.memory_space<vmem>>, vector<1x16x128xf32>
    %24 = vector.shape_cast %23 : vector<1x16x128xf32> to vector<16x128xf32>
    %25 = vector.extract_strided_slice %24 {offsets = [0, 96], sizes = [16, 32], strides = [1, 1]} : vector<16x128xf32> to vector<16x32xf32>
    %26 = tpu.concatenate %4, %7 in 1 : vector<16x32xf32>, vector<16x32xf32> -> vector<16x64xf32>
    %27 = vector.broadcast %0 : f32 to vector<16x64xf32>
    %28 = arith.mulf %27, %26 : vector<16x64xf32>
    %29 = tpu.concatenate %16, %19 in 1 : vector<16x32xf32>, vector<16x32xf32> -> vector<16x64xf32>
    %30 = vector.broadcast %1 : f32 to vector<16x64xf32>
    %31 = arith.mulf %30, %29 : vector<16x64xf32>
    %32 = arith.addf %28, %31 : vector<16x64xf32>
    %33 = tpu.concatenate %10, %13 in 1 : vector<16x32xf32>, vector<16x32xf32> -> vector<16x64xf32>
    %34 = vector.broadcast %0 : f32 to vector<16x64xf32>
    %35 = arith.mulf %34, %33 : vector<16x64xf32>
    %36 = tpu.concatenate %22, %25 in 1 : vector<16x32xf32>, vector<16x32xf32> -> vector<16x64xf32>
    %37 = vector.broadcast %1 : f32 to vector<16x64xf32>
    %38 = arith.mulf %37, %36 : vector<16x64xf32>
    %39 = arith.addf %35, %38 : vector<16x64xf32>
    %cst = arith.constant dense<0.000000e+00> : vector<16x16xf32>
    %40 = tpu.matmul %32, %39, %cst {dimension_numbers = #tpu.dot_dimension_numbers<[1], [1], [0], [0], [0, 0, 1, 0], [], []>} : vector<16x64xf32>, vector<16x64xf32>, vector<16x16xf32> -> vector<16x16xf32>
    %c0_24 = arith.constant 0 : index
    %c0_25 = arith.constant 0 : index
    %41 = vector.load %arg2[%c0_24, %c0_25] : memref<16x16xf32, #tpu.memory_space<vmem>>, vector<16x16xf32>
    tpu.vector_store %arg2[%c0_24, %c0_25], %40 {strides = array<i32>} : memref<16x16xf32, #tpu.memory_space<vmem>>, vector<16x16xf32>,
    return
  }
}

</mosaic_0001>

<bundles_post_ra>
// kernel: hgt_forward.4
= control target key start
LH: loop header
LB: loop body
LE: loop exit
PB: predicated region body
PF: predicated region fallthrough
CT: control target
= control target key end

     0   :  { %9 = vsyncpa [#allocation3], 0  ;;  %s676_s0 = inlined_call_operand.vmem [shape: f32[4,16,16], index: 0, kind: input, shape index: {}]   ;;  %s677_s1 = inlined_call_operand.vmem [shape: f32[4,16,32], index: 1, kind: input, shape index: {}]   ;;  %s678_s2 = inlined_call_operand.vmem [shape: f32[4,1,32], index: 2, kind: input, shape index: {}]   ;;  %s679_s3 = inlined_call_operand.vmem [shape: f32[4], index: 3, kind: input, shape index: {}]   ;;  %s680_s4 = inlined_call_operand.vmem [shape: f32[16,128], index: 4, kind: output, shape index: {}]  }
   0x1   :  { %s22_s17 = sshll.u32 %s679_s3, 4  ;;  %s23_s17 = int_to_ptr.vmem [resolvable:$true] %s22_s17 }
   0x2   :  { %s550_s18 = scalar_lea.vmem %s23_s17, 16  ;;  %p555_p1 = scmp.lt.s32.totalorder %s23_s17, %s23_s17 }
   0x3   :  { %p551_p0 = scmp.ne.s32.totalorder %s23_s17, %s550_s18  ;;  %p556_p2 = scmp.lt.s32.totalorder %s550_s18, %s550_s18 }
   0x5   :  { %p557_p3 = por %p556_p2, %p555_p1 }
   0x7   :  { %p558_p4 = pnand %p557_p3, %p551_p0 }
   0x9   :  { %561 = shalt.err (!%p558_p4)
}
   0xa   :  { %s564_s19 = smov [#allocation2]  }
   0xb   :  { %25 = dma.vmem_to_smem %s23_s17, 16, %s564_s19, [#allocation3]  }
   0xc   :  { %562 = dma.done.wait [#allocation3], 16  }
   0xd   :  { %563 = vsyncadd [#allocation3], 4294967280 }
   0xe   :  { %29 = sfence }
   0xf   :  { %v33_v0 = vld [vmem:[%s677_s1 + $0x8] sm:$0xff]  ;;  %v478_v1 = vld [vmem:[%s677_s1 + $0x18] sm:$0xff]  ;;  %v32_v2 = vld [vmem:[%s677_s1] sm:$0xff]  ;;  %vm41_vm0 = vcmask 130048   ;;  %s655_s26 = sld [smem:[#allocation2 + $0x2]]  ;;  %s565_s29 = smov 32  }
  0x10   :  { %518 = vmatprep.subr.mxu0 %v33_v0  ;;  %525 = vmatprep.subr.mxu1 %v478_v1  ;;  %v477_v3 = vld [vmem:[%s677_s1 + $0x10] sm:$0xff]  ;;  %v30_v4 = vld [vmem:[%s676_s0] sm:$0xff]  ;;  %v31_v6 = vld [vmem:[%s676_s0 + $0x8] sm:$0xff]  ;;  %s660_s28 = sld [smem:[#allocation2 + $0x3]]  ;;  %s566_s6 = smov 64   ;;  %vm456_vm1 = vcmask 261120  }
  0x11   :  { %519 = vmatpush3.msra.mxu0 %v33_v0  ;;  %526 = vmatpush3.msra.mxu1 %v478_v1  ;;  %v475_v5 = vld [vmem:[%s676_s0 + $0x10] sm:$0xff]  ;;  %v476_v7 = vld [vmem:[%s676_s0 + $0x18] sm:$0xff]  ;;  %v487_v8 = vld [vmem:[%s677_s1 + $0x28] sm:$0xff]  ;;  %s567_s7 = smov 96   ;;  %s125_s10 = sld [smem:[#allocation2]]  ;;  %vm462_vm2 = vcmask 785408  }
  0x12   :  { %520 = vmatprep.subr.mxu0 %v32_v2  ;;  %527 = vmatprep.subr.mxu1 %v477_v3  ;;  %v484_v9 = vld [vmem:[%s676_s0 + $0x20] sm:$0xff]  ;;  %v496_v10 = vld [vmem:[%s677_s1 + $0x38] sm:$0xff]  ;;  %v495_v12 = vld [vmem:[%s677_s1 + $0x30] sm:$0xff]  ;;  %vm459_vm3 = vcmask 523264  }
  0x13   :  { %521 = vmatpush3.msra.mxu0 %v32_v2  ;;  %522 = vmatprep.mubr.msk.f32.mxu0 %vm41_vm0, %v30_v4  ;;  %v486_v11 = vld [vmem:[%s677_s1 + $0x20] sm:$0xff]  ;;  %v485_v13 = vld [vmem:[%s676_s0 + $0x28] sm:$0xff]  ;;  %v493_v14 = vld [vmem:[%s676_s0 + $0x30] sm:$0xff]  ;;  %s483_s1 = sld [smem:[#allocation2 + $0x1]] }
  0x14   :  { %528 = vmatpush3.msra.mxu1 %v477_v3  ;;  %529 = vmatprep.mubr.msk.f32.mxu1 %vm41_vm0, %v475_v5  ;;  %v494_v15 = vld [vmem:[%s676_s0 + $0x38] sm:$0xff]  ;;  %v480_v16 = vld [vmem:[%s678_s2 + $0x1] ss:$0 sm:$0xff]  ;;  %v489_v25 = vld [vmem:[%s678_s2 + $0x2] ss:$0 sm:$0xff] }
  0x15   :  { %523 = vmatmul.mubr.msk.f32.vlgmr.msra.gmra.mxu0 %vm41_vm0, %v31_v6  ;;  %530 = vmatmul.mubr.msk.f32.vlgmr.msra.gmra.mxu1 %vm41_vm0, %v476_v7  ;;  %v498_v33 = vld [vmem:[%s678_s2 + $0x3] ss:$0 sm:$0xff]  ;;  %v328_v34 = vstv %s655_s26  ;;  %v472_v48 = vld [vmem:[%s678_s2] ss:$0 sm:$0xff] }
  0x16   :  { %532 = vmatprep.subr.mxu0 %v487_v8  ;;  %536 = vmatprep.mubr.msk.f32.mxu0 %vm41_vm0, %v484_v9  ;;  %v429_v42 = vstv %s660_s28 }
  0x17   :  { %533 = vmatpush3.msra.mxu0 %v487_v8  ;;  %539 = vmatprep.subr.mxu1 %v496_v10  ;;  %v126_v56 = vstv %s125_s10 }
  0x18   :  { %534 = vmatprep.subr.mxu0 %v486_v11  ;;  %540 = vmatpush3.msra.mxu1 %v496_v10 }
  0x19   :  { %535 = vmatpush3.msra.mxu0 %v486_v11  ;;  %541 = vmatprep.subr.mxu1 %v495_v12  ;;  %v227_v22 = vstv %s483_s1 }
  0x1a   :  { %537 = vmatmul.mubr.msk.f32.vlgmr.msra.gmra.mxu0 %vm41_vm0, %v485_v13  ;;  %542 = vmatpush3.msra.mxu1 %v495_v12 }
  0x1b   :  { %543 = vmatprep.mubr.msk.f32.mxu1 %vm41_vm0, %v493_v14 }
  0x1c   :  { %544 = vmatmul.mubr.msk.f32.vlgmr.msra.gmra.mxu1 %vm41_vm0, %v494_v15 }
  0xd5   :  { %v524_v17 = vpop.f32.mrf.mxu0  ;;  %v531_v18 = vpop.f32.mrf.mxu1 }
  0xd6   :  { %v221_v19 = vadd.f32 %v531_v18, %v480_v16  ;;  %v120_v51 = vadd.f32 %v524_v17, %v472_v48 }
  0xd7   :  { %v114_v20 = vpop.f32.mrf.mxu0  ;;  %v215_v21 = vpop.f32.mrf.mxu1 }
  0xd8   :  { %v225_v23 = vmax.f32 %v221_v19, 0.0  ;;  %v216_v24 = vadd.f32 %v480_v16, %v215_v21  ;;  %v115_v49 = vadd.f32 %v472_v48, %v114_v20  ;;  %v124_v55 = vmax.f32 %v120_v51, 0.0 }
  0xda   :  { %v224_v26 = vmax.f32 %v216_v24, 0.0  ;;  %v538_v27 = vpop.f32.mrf.mxu0  ;;  %v229_v28 = vmul.f32 %v227_v22, %v225_v23  ;;  %v123_v52 = vmax.f32 %v115_v49, 0.0  ;;  %v128_v61 = vmul.f32 %v126_v56, %v124_v55 }
  0xdb   :  { %v322_v29 = vadd.f32 %v538_v27, %v489_v25 }
  0xdc   :  { %v316_v30 = vpop.f32.mrf.mxu0  ;;  %436 = vrot.lane.b32.xlu0 %v229_v28, %s565_s29  ;;  %v228_v31 = vmul.f32 %v227_v22, %v224_v26  ;;  %v545_v32 = vpop.f32.mrf.mxu1  ;;  %v127_v57 = vmul.f32 %v126_v56, %v123_v52 }
  0xdd   :  { %v326_v35 = vmax.f32 %v322_v29, 0.0  ;;  %v317_v36 = vadd.f32 %v489_v25, %v316_v30  ;;  %v423_v39 = vadd.f32 %v545_v32, %v498_v33 }
  0xde   :  { %v417_v37 = vpop.f32.mrf.mxu1 }
  0xdf   :  { %v325_v38 = vmax.f32 %v317_v36, 0.0  ;;  %v418_v40 = vadd.f32 %v498_v33, %v417_v37  ;;  %v330_v41 = vmul.f32 %v328_v34, %v326_v35  ;;  %v427_v44 = vmax.f32 %v423_v39, 0.0 }
  0xe0   :  { %434 = vrot.lane.b32.xlu0 %v228_v31, %s565_s29 }
  0xe1   :  { %v426_v43 = vmax.f32 %v418_v40, 0.0  ;;  %444 = vrot.lane.b32.xlu1 %v330_v41, %s566_s6  ;;  %v329_v46 = vmul.f32 %v328_v34, %v325_v38  ;;  %v431_v47 = vmul.f32 %v429_v42, %v427_v44 }
  0xe3   :  { %v430_v45 = vmul.f32 %v429_v42, %v426_v43 }
  0xe5   :  { %442 = vrot.lane.b32.xlu1 %v329_v46, %s566_s6  ;;  %450 = vrot.lane.b32.xlu0 %v430_v45, %s567_s7 }
  0xe9   :  { %452 = vrot.lane.b32.xlu1 %v431_v47, %s567_s7 }
 0x14e   :  { %v437_v50 = vpop.permute.xlu0 %436 }
 0x14f   :  { %v458_v0 = vsel %vm456_vm1, %v128_v61, %v437_v50 }
 0x152   :  { %v435_v53 = vpop.permute.xlu0 %434 }
 0x153   :  { %v445_v54 = vpop.permute.xlu1 %444  ;;  %v457_v58 = vsel %vm456_vm1, %v127_v57, %v435_v53 }
 0x154   :  { %v461_v1 = vsel %vm459_vm3, %v458_v0, %v445_v54 }
 0x157   :  { %v443_v59 = vpop.permute.xlu1 %442  ;;  %v451_v60 = vpop.permute.xlu0 %450 }
 0x158   :  { %v460_v62 = vsel %vm459_vm3, %v457_v58, %v443_v59 }
 0x159   :  { %v463_v63 = vsel %vm462_vm2, %v460_v62, %v451_v60 }
 0x15a   :  { %465 = vst [vmem:[%s680_s4] sm:$0xff] %v463_v63 }
 0x15b   :  { %v453_v2 = vpop.permute.xlu1 %452 }
 0x15c   :  { %v464_v3 = vsel %vm462_vm2, %v461_v1, %v453_v2 }
 0x15d   :  { %466 = vst [vmem:[%s680_s4 + $0x8] sm:$0xff] %v464_v3 }
 0x15e   :  { %471 = vsyncpa [#allocation3], 1 }

// kernel: hgt_forward.7
= control target key start
LH: loop header
LB: loop body
LE: loop exit
PB: predicated region body
PF: predicated region fallthrough
CT: control target
= control target key end

     0   :  { %7 = vsyncpa [#allocation3], 0  ;;  %s280_s0 = inlined_call_operand.vmem [shape: f32[2,16,128], index: 0, kind: input, shape index: {}]   ;;  %s281_s1 = inlined_call_operand.vmem [shape: f32[2], index: 1, kind: input, shape index: {}]   ;;  %s282_s2 = inlined_call_operand.vmem [shape: f32[16,16], index: 2, kind: output, shape index: {}]  }
   0x1   :  { %s16_s11 = sshll.u32 %s281_s1, 4  ;;  %s17_s11 = int_to_ptr.vmem [resolvable:$true] %s16_s11 }
   0x2   :  { %s212_s12 = scalar_lea.vmem %s17_s11, 16  ;;  %p217_p1 = scmp.lt.s32.totalorder %s17_s11, %s17_s11 }
   0x3   :  { %p213_p0 = scmp.ne.s32.totalorder %s17_s11, %s212_s12  ;;  %p218_p2 = scmp.lt.s32.totalorder %s212_s12, %s212_s12 }
   0x5   :  { %p219_p3 = por %p218_p2, %p217_p1 }
   0x7   :  { %p220_p4 = pnand %p219_p3, %p213_p0 }
   0x9   :  { %223 = shalt.err (!%p220_p4)
}
   0xa   :  { %s226_s13 = smov [#allocation2]  }
   0xb   :  { %19 = dma.vmem_to_smem %s17_s11, 16, %s226_s13, [#allocation3]  }
   0xc   :  { %224 = dma.done.wait [#allocation3], 16  }
   0xd   :  { %225 = vsyncadd [#allocation3], 4294967280 }
   0xe   :  { %23 = sfence }
   0xf   :  { %v192_v0 = vld [vmem:[%s280_s0 + $0x18] sm:$0xff]  ;;  %v27_v1 = vld [vmem:[%s280_s0 + $0x8] sm:$0xff]  ;;  %s227_s1 = smov 64   ;;  %s228_s18 = smov 96   ;;  %v26_v2 = vld [vmem:[%s280_s0] sm:$0xff]  ;;  %vm39_vm0 = vcmask 261120  }
  0x10   :  { %84 = vrot.lane.b32.xlu1 %v192_v0, %s227_s1  ;;  %68 = vrot.lane.b32.xlu0 %v27_v1, %s228_s18  ;;  %s229_s21 = smov 32   ;;  %v191_v3 = vld [vmem:[%s280_s0 + $0x10] sm:$0xff]  ;;  %s24_s24 = sld [smem:[#allocation2]]  ;;  %vm94_vm1 = vcmask 523264   ;;  %vm182_vm2 = vcmask 130048  }
  0x11   :  { %s190_s25 = sld [smem:[#allocation2 + $0x1]] }
  0x14   :  { %78 = vrot.lane.b32.xlu0 %v27_v1, %s229_s21  ;;  %66 = vrot.lane.b32.xlu1 %v26_v2, %s228_s18 }
  0x16   :  { %v42_v6 = vstv %s24_s24 }
  0x17   :  { %v61_v8 = vstv %s190_s25 }
  0x18   :  { %76 = vrot.lane.b32.xlu0 %v26_v2, %s229_s21  ;;  %82 = vrot.lane.b32.xlu1 %v191_v3, %s227_s1 }
  0x1c   :  { %33 = vrot.lane.b32.xlu0 %v191_v3, %s229_s21  ;;  %47 = vrot.lane.b32.xlu1 %v26_v2, %s227_s1 }
  0x20   :  { %53 = vrot.lane.b32.xlu0 %v191_v3, %s228_s18  ;;  %35 = vrot.lane.b32.xlu1 %v192_v0, %s229_s21 }
  0x24   :  { %49 = vrot.lane.b32.xlu0 %v27_v1, %s227_s1  ;;  %55 = vrot.lane.b32.xlu1 %v192_v0, %s228_s18 }
  0x82   :  { %v85_v4 = vpop.permute.xlu1 %84  ;;  %v69_v5 = vpop.permute.xlu0 %68 }
  0x83   :  { %v73_v7 = vsel %vm39_vm0, %v69_v5, %v192_v0 }
  0x84   :  { %v75_v12 = vmul.f32 %v73_v7, %v42_v6 }
  0x86   :  { %v79_v9 = vpop.permute.xlu0 %78  ;;  %v67_v10 = vpop.permute.xlu1 %66 }
  0x87   :  { %v89_v11 = vsel %vm39_vm0, %v79_v9, %v85_v4  ;;  %v72_v14 = vsel %vm39_vm0, %v67_v10, %v191_v3 }
  0x88   :  { %v91_v13 = vmul.f32 %v89_v11, %v61_v8  ;;  %v74_v19 = vmul.f32 %v72_v14, %v42_v6 }
  0x8a   :  { %v77_v15 = vpop.permute.xlu0 %76  ;;  %v83_v16 = vpop.permute.xlu1 %82  ;;  %v93_v17 = vadd.f32 %v91_v13, %v75_v12 }
  0x8b   :  { %v88_v18 = vsel %vm39_vm0, %v77_v15, %v83_v16 }
  0x8c   :  { %v90_v20 = vmul.f32 %v88_v18, %v61_v8  ;;  %201 = vmatprep.subr.msk.mxu0 %vm94_vm1, %v93_v17 }
  0x8d   :  { %202 = vmatpush3.xpose.msk.msra.mxu0 %vm94_vm1, %v93_v17 }
  0x8e   :  { %v92_v21 = vadd.f32 %v90_v20, %v74_v19  ;;  %v34_v22 = vpop.permute.xlu0 %33  ;;  %v48_v23 = vpop.permute.xlu1 %47 }
  0x8f   :  { %v40_v24 = vsel %vm39_vm0, %v26_v2, %v34_v22 }
  0x90   :  { %203 = vmatprep.subr.msk.mxu0 %vm94_vm1, %v92_v21  ;;  %v43_v28 = vmul.f32 %v42_v6, %v40_v24 }
  0x91   :  { %204 = vmatpush3.xpose.msk.msra.mxu0 %vm94_vm1, %v92_v21 }
  0x92   :  { %v54_v25 = vpop.permute.xlu0 %53  ;;  %v36_v26 = vpop.permute.xlu1 %35 }
  0x93   :  { %v59_v27 = vsel %vm39_vm0, %v48_v23, %v54_v25  ;;  %v41_v30 = vsel %vm39_vm0, %v27_v1, %v36_v26 }
  0x94   :  { %v62_v29 = vmul.f32 %v61_v8, %v59_v27  ;;  %v44_v35 = vmul.f32 %v42_v6, %v41_v30 }
  0x96   :  { %v50_v31 = vpop.permute.xlu0 %49  ;;  %v56_v32 = vpop.permute.xlu1 %55  ;;  %v64_v33 = vadd.f32 %v62_v29, %v43_v28 }
  0x97   :  { %v60_v34 = vsel %vm39_vm0, %v50_v31, %v56_v32 }
  0x98   :  { %v63_v36 = vmul.f32 %v61_v8, %v60_v34  ;;  %205 = vmatprep.mubr.msk.f32.mxu0 %vm94_vm1, %v64_v33 }
  0x9a   :  { %v65_v37 = vadd.f32 %v63_v36, %v44_v35 }
  0x9c   :  { %206 = vmatmul.mubr.msk.f32.vlgmr.msra.gmra.mxu0 %vm94_vm1, %v65_v37 }
 0x15c   :  { %v207_v38 = vpop.f32.mrf.mxu0 }
 0x15d   :  { %184 = vst.msk [vmem:[%s282_s2 + $0x8] sm:$0xff] %vm182_vm2, %v207_v38 }
 0x15e   :  { %v173_v39 = vpop.f32.mrf.mxu0 }
 0x15f   :  { %183 = vst.msk [vmem:[%s282_s2] sm:$0xff] %vm182_vm2, %v173_v39 }
 0x160   :  { %189 = vsyncpa [#allocation3], 1 }

// kernel: hgt_forward.5
= control target key start
LH: loop header
LB: loop body
LE: loop exit
PB: predicated region body
PF: predicated region fallthrough
CT: control target
= control target key end

     0   :  { %14 = vsyncpa [#allocation3], 0  ;;  %s6624_s0 = inlined_call_operand.vmem [shape: f32[16,128], index: 0, kind: input, shape index: {}]   ;;  %s6625_s1 = inlined_call_operand.vmem [shape: f32[4,32,32], index: 1, kind: input, shape index: {}]   ;;  %s6626_s2 = inlined_call_operand.vmem [shape: f32[4,1,32], index: 2, kind: input, shape index: {}]   ;;  %s6627_s3 = inlined_call_operand.vmem [shape: f32[4,32,64], index: 3, kind: input, shape index: {}]   ;;  %s6628_s4 = inlined_call_operand.vmem [shape: f32[4,1,64], index: 4, kind: input, shape index: {}]   ;;  %s6629_s5 = inlined_call_operand.vmem [shape: f32[4,32,32], index: 5, kind: input, shape index: {}]   ;;  %s6630_s6 = inlined_call_operand.vmem [shape: f32[4,1,32], index: 6, kind: input, shape index: {}]   ;;  %s6631_s7 = inlined_call_operand.vmem [shape: f32[4], index: 7, kind: input, shape index: {}]   ;;  %s6632_s8 = inlined_call_operand.vmem [shape: f32[2,16,16], index: 8, kind: input, shape index: {}]   ;;  %s6633_s9 = inlined_call_operand.vmem [shape: f32[16,128], index: 9, kind: output, shape index: {}]  }
   0x1   :  { %s35_s11 = sshll.u32 %s6631_s7, 4  ;;  %s36_s11 = int_to_ptr.vmem [resolvable:$true] %s35_s11 }
   0x2   :  { %s5611_s12 = scalar_lea.vmem %s36_s11, 16  ;;  %p5616_p1 = scmp.lt.s32.totalorder %s36_s11, %s36_s11 }
   0x3   :  { %p5612_p0 = scmp.ne.s32.totalorder %s36_s11, %s5611_s12  ;;  %p5617_p2 = scmp.lt.s32.totalorder %s5611_s12, %s5611_s12 }
   0x5   :  { %p5618_p3 = por %p5617_p2, %p5616_p1 }
   0x7   :  { %p5619_p4 = pnand %p5618_p3, %p5612_p0 }
   0x9   :  { %5622 = shalt.err (!%p5619_p4)
}
   0xa   :  { %s5625_s13 = smov [#allocation2]  }
   0xb   :  { %38 = dma.vmem_to_smem %s36_s11, 16, %s5625_s13, [#allocation3]  }
   0xc   :  { %5623 = dma.done.wait [#allocation3], 16  }
   0xd   :  { %5624 = vsyncadd [#allocation3], 4294967280 }
   0xe   :  { %44 = sfence }
   0xf   :  { %v5695_v0 = vld [vmem:[%s6624_s0] sm:$0xff]  ;;  %v84_v1 = vld [vmem:[%s6625_s1 + $0x18] sm:$0xff]  ;;  %vm92_vm0 = vcmask 261120   ;;  %s5626_s17 = smov 96   ;;  %v83_v2 = vld [vmem:[%s6625_s1 + $0x10] sm:$0xff]  ;;  %vm268_vm1 = vcmask 64512  }
  0x10   :  { %185 = vrot.lane.b32.xlu0 %v5695_v0, %s5626_s17  ;;  %5093 = vmatprep.subr.mxu0 %v84_v1  ;;  %v5708_v3 = vld [vmem:[%s6624_s0 + $0x8] sm:$0xff]  ;;  %v177_v5 = vld [vmem:[%s6627_s3 + $0x18] sm:$0xff]  ;;  %v176_v6 = vld [vmem:[%s6627_s3 + $0x10] sm:$0xff]  ;;  %s5627_s15 = smov 120   ;;  %s5628_s16 = smov 112   ;;  %vm56_vm3 = vcmask 130048  }
  0x11   :  { %5094 = vmatpush3.msra.mxu0 %v84_v1  ;;  %v82_v4 = vld [vmem:[%s6625_s1 + $0x8] sm:$0xff]  ;;  %5101 = vmatprep.mubr.msk.f32.mxu0 %vm92_vm0, %v5695_v0  ;;  %v81_v7 = vld [vmem:[%s6625_s1] sm:$0xff]  ;;  %s5629_s19 = smov 104   ;;  %s5630_s24 = smov 88   ;;  %vm1101_vm6 = vcmask 195584   ;;  %vm4694_vm12 = vcmask 523264  }
  0x12   :  { %5095 = vmatprep.subr.mxu0 %v83_v2  ;;  %5104 = vmatprep.subr.mxu1 %v177_v5  ;;  %v175_v8 = vld [vmem:[%s6627_s3 + $0x8] sm:$0xff]  ;;  %v174_v9 = vld [vmem:[%s6627_s3] sm:$0xff]  ;;  %s5631_s25 = smov 80   ;;  %s5632_s26 = smov 72   ;;  %vm4697_vm13 = vcmask 785408  }
  0x13   :  { %5096 = vmatpush3.msra.mxu0 %v83_v2  ;;  %5105 = vmatpush3.msra.mxu1 %v177_v5  ;;  %v4713_v12 = vld [vmem:[%s6626_s2] ss:$0 sm:$0xff]  ;;  %v5801_v34 = vld [vmem:[%s6632_s8 + $0x8] sm:$0xff]  ;;  %s5633_s14 = smov 8   ;;  %s5634_s7 = smov 16  }
  0x14   :  { %187 = vrot.lane.b32.xlu0 %v5708_v3, %s5626_s17  ;;  %5097 = vmatprep.subr.mxu0 %v82_v4  ;;  %v4716_v17 = vld [vmem:[%s6628_s4] ss:$0 sm:$0xff]  ;;  %vm53_vm2 = vcmp.gt.f32.partialorder %v5801_v34, 0.0  ;;  %s5635_s18 = smov 24   ;;  %s5637_s13 = smov 32  }
  0x15   :  { %5098 = vmatpush3.msra.mxu0 %v82_v4  ;;  %5106 = vmatprep.subr.mxu1 %v176_v6  ;;  %v5806_v35 = vld [vmem:[%s6632_s8] sm:$0xff]  ;;  %s5638_s30 = smov 64  }
  0x16   :  { %5099 = vmatprep.subr.mxu0 %v81_v7  ;;  %5107 = vmatpush3.msra.mxu1 %v176_v6  ;;  %vm52_vm4 = vcmp.gt.f32.partialorder %v5806_v35, 0.0 }
  0x17   :  { %5100 = vmatpush3.msra.mxu0 %v81_v7  ;;  %5108 = vmatprep.subr.mxu1 %v175_v8 }
  0x18   :  { %5102 = vmatmul.mubr.msk.f32.vlgmr.msra.gmra.mxu0 %vm92_vm0, %v5708_v3  ;;  %5109 = vmatpush3.msra.mxu1 %v175_v8 }
  0x19   :  { %5110 = vmatprep.subr.mxu1 %v174_v9 }
  0x1a   :  { %5111 = vmatpush3.msra.mxu1 %v174_v9 }
  0x82   :  { %v5734_v10 = vpop.permute.xlu0 %185 }
  0x83   :  { %5112 = vmatprep.mubr.msk.f32.mxu1 %vm92_vm0, %v5734_v10 }
  0x86   :  { %v5738_v11 = vpop.permute.xlu0 %187 }
  0x87   :  { %5113 = vmatmul.mubr.msk.f32.vlgmr.msra.gmra.mxu1 %vm92_vm0, %v5738_v11 }
  0xd8   :  { %v5103_v13 = vpop.f32.mrf.mxu0 }
  0xd9   :  { %v171_v14 = vadd.f32 %v5103_v13, %v4713_v12 }
  0xda   :  { %v165_v15 = vpop.f32.mrf.mxu0 }
  0xdb   :  { %360 = vrot.lane.b32.xlu1 %v171_v14, %s5627_s15  ;;  %v166_v16 = vadd.f32 %v4713_v12, %v165_v15 }
  0xdd   :  { %451 = vrot.lane.b32.xlu0 %v166_v16, %s5628_s16  ;;  %5119 = vmatprep.mubr.msk.f32.mxu0 %vm268_vm1, %v166_v16 }
  0xdf   :  { %358 = vrot.lane.b32.xlu1 %v166_v16, %s5627_s15 }
 0x147   :  { %v5114_v18 = vpop.f32.mrf.mxu1 }
 0x148   :  { %v5752_v19 = vadd.f32 %v5114_v18, %v4716_v17 }
 0x149   :  { %v259_v20 = vpop.f32.mrf.mxu1 }
 0x14a   :  { %v5754_v21 = vadd.f32 %v4716_v17, %v259_v20  ;;  %5115 = vmatprep.subr.msk.mxu0 %vm268_vm1, %v5752_v19  ;;  %457 = vrot.lane.b32.xlu0 %v5752_v19, %s5628_s16 }
 0x14b   :  { %364 = vrot.lane.b32.xlu1 %v5752_v19, %s5627_s15  ;;  %5116 = vmatpush3.xpose.msk.msra.mxu0 %vm268_vm1, %v5752_v19 }
 0x14c   :  { %5117 = vmatprep.subr.msk.mxu0 %vm268_vm1, %v5754_v21 }
 0x14d   :  { %v361_v22 = vpop.permute.xlu1 %360 }
 0x14e   :  { %550 = vrot.lane.b32.xlu0 %v5752_v19, %s5629_s19 }
 0x14f   :  { %362 = vrot.lane.b32.xlu1 %v5754_v21, %s5627_s15  ;;  %5118 = vmatpush3.xpose.msk.msra.mxu0 %vm268_vm1, %v5754_v21  ;;  %v452_v23 = vpop.permute.xlu0 %451 }
 0x151   :  { %v359_v24 = vpop.permute.xlu1 %358 }
 0x152   :  { %455 = vrot.lane.b32.xlu0 %v5754_v21, %s5628_s16  ;;  %5120 = vmatmul.mubr.msk.f32.vlgmr.msra.gmra.mxu0 %vm268_vm1, %v171_v14 }
 0x153   :  { %453 = vrot.lane.b32.xlu1 %v171_v14, %s5628_s16  ;;  %5126 = vmatprep.mubr.msk.f32.mxu1 %vm268_vm1, %v359_v24 }
 0x154   :  { %5133 = vmatprep.mubr.msk.f32.mxu0 %vm268_vm1, %v452_v23 }
 0x156   :  { %544 = vrot.lane.b32.xlu0 %v166_v16, %s5629_s19 }
 0x157   :  { %548 = vrot.lane.b32.xlu1 %v5754_v21, %s5629_s19 }
 0x15b   :  { %546 = vrot.lane.b32.xlu1 %v171_v14, %s5629_s19 }
 0x1bc   :  { %v458_v25 = vpop.permute.xlu0 %457 }
 0x1bd   :  { %v365_v26 = vpop.permute.xlu1 %364  ;;  %5129 = vmatprep.subr.msk.mxu0 %vm268_vm1, %v458_v25 }
 0x1be   :  { %5122 = vmatprep.subr.msk.mxu1 %vm268_vm1, %v365_v26  ;;  %5130 = vmatpush3.xpose.msk.msra.mxu0 %vm268_vm1, %v458_v25 }
 0x1bf   :  { %5123 = vmatpush3.xpose.msk.msra.mxu1 %vm268_vm1, %v365_v26 }
 0x1c0   :  { %v551_v27 = vpop.permute.xlu0 %550 }
 0x1c1   :  { %v363_v28 = vpop.permute.xlu1 %362 }
 0x1c2   :  { %5124 = vmatprep.subr.msk.mxu1 %vm268_vm1, %v363_v28 }
 0x1c3   :  { %5125 = vmatpush3.xpose.msk.msra.mxu1 %vm268_vm1, %v363_v28 }
 0x1c4   :  { %5136 = vmatprep.subr.msk.mxu1 %vm268_vm1, %v551_v27  ;;  %v456_v29 = vpop.permute.xlu0 %455 }
 0x1c5   :  { %v454_v30 = vpop.permute.xlu1 %453  ;;  %5131 = vmatprep.subr.msk.mxu0 %vm268_vm1, %v456_v29 }
 0x1c6   :  { %5127 = vmatmul.mubr.msk.f32.vlgmr.msra.gmra.mxu1 %vm268_vm1, %v361_v22  ;;  %5132 = vmatpush3.xpose.msk.msra.mxu0 %vm268_vm1, %v456_v29 }
 0x1c7   :  { %5137 = vmatpush3.xpose.msk.msra.mxu1 %vm268_vm1, %v551_v27 }
 0x1c8   :  { %v545_v31 = vpop.permute.xlu0 %544 }
 0x1c9   :  { %v549_v32 = vpop.permute.xlu1 %548  ;;  %5134 = vmatmul.mubr.msk.f32.vlgmr.msra.gmra.mxu0 %vm268_vm1, %v454_v30  ;;  %5140 = vmatprep.mubr.msk.f32.mxu1 %vm268_vm1, %v545_v31 }
 0x1ca   :  { %5138 = vmatprep.subr.msk.mxu1 %vm268_vm1, %v549_v32 }
 0x1cb   :  { %5139 = vmatpush3.xpose.msk.msra.mxu1 %vm268_vm1, %v549_v32 }
 0x1cd   :  { %v547_v33 = vpop.permute.xlu1 %546 }
 0x1ce   :  { %5141 = vmatmul.mubr.msk.f32.vlgmr.msra.gmra.mxu1 %vm268_vm1, %v547_v33 }
 0x212   :  { %v5121_v36 = vpop.f32.mrf.mxu0 }
 0x213   :  { %v357_v37 = vsel %vm53_vm2, %v5121_v36, -1e+30 }
 0x214   :  { %v347_v38 = vpop.f32.mrf.mxu0  ;;  %v640_v39 = vsel %vm56_vm3, %v357_v37, -inf }
 0x215   :  { %v356_v40 = vsel %vm52_vm4, %v347_v38, -1e+30  ;;  %641 = vmax.xlane.f32.xlu1 %v640_v39 }
 0x216   :  { %v637_v41 = vsel %vm56_vm3, %v356_v40, -inf }
 0x217   :  { %638 = vmax.xlane.f32.xlu0 %v637_v41 }
 0x286   :  { %v5128_v42 = vpop.f32.mrf.mxu1 }
 0x287   :  { %v450_v43 = vsel %vm53_vm2, %v5128_v42, -1e+30 }
 0x288   :  { %v440_v44 = vpop.f32.mrf.mxu1  ;;  %v646_v45 = vsel %vm56_vm3, %v450_v43, -inf }
 0x289   :  { %v449_v46 = vsel %vm52_vm4, %v440_v44, -1e+30  ;;  %647 = vmax.xlane.f32.xlu0 %v646_v45  ;;  %v5135_v47 = vpop.f32.mrf.mxu0 }
 0x28a   :  { %v643_v50 = vsel %vm56_vm3, %v449_v46, -inf  ;;  %v543_v51 = vsel %vm53_vm2, %v5135_v47, -1e+30 }
 0x28b   :  { %v533_v48 = vpop.f32.mrf.mxu0  ;;  %v652_v55 = vsel %vm56_vm3, %v543_v51, -inf }
 0x28c   :  { %v542_v49 = vsel %vm52_vm4, %v533_v48, -1e+30 }
 0x28d   :  { %644 = vmax.xlane.f32.xlu0 %v643_v50  ;;  %v649_v52 = vsel %vm56_vm3, %v542_v49, -inf }
 0x28e   :  { %v5142_v53 = vpop.f32.mrf.mxu1  ;;  %650 = vmax.xlane.f32.xlu1 %v649_v52 }
 0x28f   :  { %v636_v56 = vsel %vm53_vm2, %v5142_v53, -1e+30 }
 0x290   :  { %v626_v54 = vpop.f32.mrf.mxu1  ;;  %v658_v59 = vsel %vm56_vm3, %v636_v56, -inf }
 0x291   :  { %v635_v57 = vsel %vm52_vm4, %v626_v54, -1e+30  ;;  %653 = vmax.xlane.f32.xlu0 %v652_v55  ;;  %v60_v55 = vsel %vm56_vm3, %v5801_v34, 0.0 }
 0x292   :  { %v655_v58 = vsel %vm56_vm3, %v635_v57, -inf }
 0x293   :  { %656 = vmax.xlane.f32.xlu1 %v655_v58 }
 0x295   :  { %659 = vmax.xlane.f32.xlu0 %v658_v59 }
 0x29e   :  { %v642_v60 = vpop.xlane.xlu1 %641 }
 0x29f   :  { %v662_v61 = vsub.f32 %v357_v37, %v642_v60 }
 0x2a0   :  { %v639_v62 = vpop.xlane.xlu0 %638 }
 0x2a1   :  { %v671_v63 = vmul.f32 1.442695, %v662_v61  ;;  %v661_v1 = vsub.f32 %v356_v40, %v639_v62 }
 0x2a3   :  { %5463 = vpow2.f32 %v671_v63  ;;  %v669_v2 = vmul.f32 1.442695, %v661_v1 }
 0x2a4   :  { %727 = vrot.lane.b32.xlu1 %v5752_v19, %s5626_s17 }
 0x2a5   :  { %5465 = vpow2.f32 %v669_v2 }
 0x2a8   :  { %814 = vrot.lane.b32.xlu1 %v5752_v19, %s5630_s24 }
 0x2ab   :  { %725 = vrot.lane.b32.xlu0 %v5754_v21, %s5626_s17 }
 0x2ac   :  { %812 = vrot.lane.b32.xlu1 %v5754_v21, %s5630_s24 }
 0x2af   :  { %901 = vrot.lane.b32.xlu0 %v5752_v19, %s5631_s25 }
 0x2b0   :  { %988 = vrot.lane.b32.xlu1 %v5752_v19, %s5632_s26  ;;  %v5846_v4 = vpop.eup %5463 }
 0x2b1   :  { %v688_v5 = vsel %vm56_vm3, %v5846_v4, 0.0 }
 0x2b2   :  { %v5850_v6 = vpop.eup %5465 }
 0x2b3   :  { %v685_v7 = vsel %vm56_vm3, %v5850_v6, 0.0 }
 0x2ce   :  { %689 = vadd.xlane.f32.xlu0 %v688_v5 }
 0x2d4   :  { %686 = vadd.xlane.f32.xlu1 %v685_v7 }
 0x312   :  { %v648_v8 = vpop.xlane.xlu0 %647 }
 0x313   :  { %v664_v9 = vsub.f32 %v450_v43, %v648_v8 }
 0x315   :  { %v675_v12 = vmul.f32 1.442695, %v664_v9  ;;  %v4749_v9 = vld [vmem:[%s6625_s1 + $0x38] sm:$0xff] }
 0x316   :  { %v645_v13 = vpop.xlane.xlu0 %644 }
 0x317   :  { %5467 = vpow2.f32 %v675_v12  ;;  %v663_v14 = vsub.f32 %v449_v46, %v645_v13  ;;  %v651_v15 = vpop.xlane.xlu1 %650 }
 0x318   :  { %v665_v16 = vsub.f32 %v542_v49, %v651_v15 }
 0x319   :  { %v673_v17 = vmul.f32 1.442695, %v663_v14 }
 0x31a   :  { %v677_v18 = vmul.f32 1.442695, %v665_v16  ;;  %v654_v19 = vpop.xlane.xlu0 %653 }
 0x31b   :  { %5469 = vpow2.f32 %v673_v17  ;;  %v666_v20 = vsub.f32 %v543_v51, %v654_v19  ;;  %v4748_v17 = vld [vmem:[%s6625_s1 + $0x30] sm:$0xff]  ;;  %v4746_v19 = vld [vmem:[%s6625_s1 + $0x20] sm:$0xff] }
 0x31c   :  { %v657_v22 = vpop.xlane.xlu1 %656  ;;  %5471 = vpow2.f32 %v677_v18  ;;  %v4747_v18 = vld [vmem:[%s6625_s1 + $0x28] sm:$0xff] }
 0x31d   :  { %v679_v23 = vmul.f32 1.442695, %v666_v20  ;;  %v667_v24 = vsub.f32 %v635_v57, %v657_v22 }
 0x31e   :  { %v660_v25 = vpop.xlane.xlu0 %659 }
 0x31f   :  { %5473 = vpow2.f32 %v679_v23  ;;  %v681_v26 = vmul.f32 1.442695, %v667_v24  ;;  %v668_v27 = vsub.f32 %v636_v56, %v660_v25  ;;  %v57_v56 = vsel %vm56_vm3, %v5806_v35, 0.0 }
 0x320   :  { %v728_v28 = vpop.permute.xlu1 %727 }
 0x321   :  { %5475 = vpow2.f32 %v681_v26  ;;  %v683_v29 = vmul.f32 1.442695, %v668_v27  ;;  %5143 = vmatprep.subr.mxu1 %v728_v28  ;;  %v1126_v27 = vld [vmem:[%s6629_s5 + $0x10] sm:$0xff] }
 0x322   :  { %5144 = vmatpush3.msra.mxu1 %v728_v28  ;;  %v726_v30 = vpop.permute.xlu0 %725 }
 0x323   :  { %5477 = vpow2.f32 %v683_v29  ;;  %5145 = vmatprep.subr.mxu1 %v726_v30  ;;  %v1125_v29 = vld [vmem:[%s6629_s5 + $0x8] sm:$0xff] }
 0x324   :  { %v5854_v31 = vpop.eup %5467  ;;  %v815_v32 = vpop.permute.xlu1 %814  ;;  %5146 = vmatpush3.msra.mxu1 %v726_v30  ;;  %v1124_v30 = vld [vmem:[%s6629_s5] sm:$0xff] }
 0x325   :  { %5150 = vmatprep.subr.mxu1 %v815_v32  ;;  %v694_v33 = vsel %vm56_vm3, %v5854_v31, 0.0 }
 0x326   :  { %695 = vadd.xlane.f32.xlu0 %v694_v33  ;;  %v902_v36 = vpop.permute.xlu0 %901 }
 0x327   :  { %5157 = vmatprep.subr.mxu0 %v902_v36 }
 0x328   :  { %v5470_v37 = vpop.eup %5469  ;;  %5158 = vmatpush3.msra.mxu0 %v902_v36  ;;  %v813_v47 = vpop.permute.xlu1 %812 }
 0x329   :  { %v691_v38 = vsel %vm56_vm3, %v5470_v37, 0.0  ;;  %v5472_v39 = vpop.eup %5471 }
 0x32a   :  { %692 = vadd.xlane.f32.xlu1 %v691_v38  ;;  %v697_v41 = vsel %vm56_vm3, %v5472_v39, 0.0  ;;  %v4757_v38 = vld [vmem:[%s6627_s3 + $0x38] sm:$0xff] }
 0x32c   :  { %v5474_v40 = vpop.eup %5473  ;;  %v989_v48 = vpop.permute.xlu1 %988 }
 0x32d   :  { %v700_v42 = vsel %vm56_vm3, %v5474_v40, 0.0 }
 0x32e   :  { %v5861_v43 = vpop.eup %5475  ;;  %698 = vadd.xlane.f32.xlu1 %v697_v41  ;;  %701 = vadd.xlane.f32.xlu0 %v700_v42 }
 0x32f   :  { %v703_v45 = vsel %vm56_vm3, %v5861_v43, 0.0 }
 0x330   :  { %v5863_v44 = vpop.eup %5477 }
 0x331   :  { %v706_v46 = vsel %vm56_vm3, %v5863_v44, 0.0 }
 0x332   :  { %704 = vadd.xlane.f32.xlu1 %v703_v45  ;;  %707 = vadd.xlane.f32.xlu0 %v706_v46 }
 0x343   :  { %986 = vrot.lane.b32.xlu1 %v5754_v21, %s5632_s26 }
 0x348   :  { %899 = vrot.lane.b32.xlu0 %v5754_v21, %s5631_s25 }
 0x357   :  { %v690_v49 = vpop.xlane.xlu0 %689 }
 0x358   :  { %5479 = vrcp.f32 %v690_v49 }
 0x35d   :  { %v687_v50 = vpop.xlane.xlu1 %686 }
 0x35e   :  { %5481 = vrcp.f32 %v687_v50 }
 0x365   :  { %v5480_v51 = vpop.eup %5479 }
 0x366   :  { %v718_v54 = vmul.f32 %v5480_v51, %v5846_v4 }
 0x367   :  { %61 = vadd.xlane.f32.xlu1 %v60_v55  ;;  %58 = vadd.xlane.f32.xlu0 %v57_v56 }
 0x36b   :  { %v5482_v52 = vpop.eup %5481 }
 0x36c   :  { %v717_v53 = vmul.f32 %v5482_v52, %v5850_v6 }
 0x36e   :  { %5147 = vmatprep.mubr.msk.f32.mxu1 %vm56_vm3, %v717_v53 }
 0x36f   :  { %5148 = vmatmul.mubr.msk.f32.vlgmr.msra.gmra.mxu1 %vm56_vm3, %v718_v54 }
 0x370   :  { %5151 = vmatpush3.msra.mxu1 %v815_v32 }
 0x371   :  { %5152 = vmatprep.subr.mxu1 %v813_v47 }
 0x372   :  { %5153 = vmatpush3.msra.mxu1 %v813_v47 }
 0x373   :  { %5164 = vmatprep.subr.mxu1 %v989_v48 }
 0x3af   :  { %v696_v21 = vpop.xlane.xlu0 %695 }
 0x3b0   :  { %5483 = vrcp.f32 %v696_v21 }
 0x3b3   :  { %v693_v57 = vpop.xlane.xlu1 %692 }
 0x3b4   :  { %5485 = vrcp.f32 %v693_v57 }
 0x3b7   :  { %v699_v58 = vpop.xlane.xlu1 %698  ;;  %v702_v59 = vpop.xlane.xlu0 %701 }
 0x3b8   :  { %5487 = vrcp.f32 %v699_v58 }
 0x3b9   :  { %5489 = vrcp.f32 %v702_v59 }
 0x3bb   :  { %v705_v60 = vpop.xlane.xlu1 %704  ;;  %v708_v61 = vpop.xlane.xlu0 %707 }
 0x3bc   :  { %5491 = vrcp.f32 %v705_v60 }
 0x3bd   :  { %5493 = vrcp.f32 %v708_v61  ;;  %v5484_v63 = vpop.eup %5483 }
 0x3be   :  { %v720_v4 = vmul.f32 %v5484_v63, %v5854_v31  ;;  %v4751_v31 = vld [vmem:[%s6626_s2 + $0x1] ss:$0 sm:$0xff] }
 0x3bf   :  { %v900_v62 = vpop.permute.xlu0 %899  ;;  %v987_v7 = vpop.permute.xlu1 %986 }
 0x3c0   :  { %5159 = vmatprep.subr.mxu0 %v900_v62 }
 0x3c1   :  { %v5486_v1 = vpop.eup %5485  ;;  %5160 = vmatpush3.msra.mxu0 %v900_v62 }
 0x3c2   :  { %v719_v2 = vmul.f32 %v5486_v1, %v5470_v37 }
 0x3c4   :  { %5154 = vmatprep.mubr.msk.f32.mxu1 %vm56_vm3, %v719_v2 }
 0x3c5   :  { %v5488_v5 = vpop.eup %5487  ;;  %5155 = vmatmul.mubr.msk.f32.vlgmr.msra.gmra.mxu1 %vm56_vm3, %v720_v4 }
 0x3c6   :  { %v5490_v6 = vpop.eup %5489  ;;  %5165 = vmatpush3.msra.mxu1 %v989_v48  ;;  %v721_v8 = vmul.f32 %v5488_v5, %v5472_v39  ;;  %v5636_v48 = vmov 0.0  }
 0x3c7   :  { %5166 = vmatprep.subr.mxu1 %v987_v7  ;;  %v722_v12 = vmul.f32 %v5490_v6, %v5474_v40 }
 0x3c8   :  { %5167 = vmatpush3.msra.mxu1 %v987_v7  ;;  %5161 = vmatprep.mubr.msk.f32.mxu0 %vm56_vm3, %v721_v8 }
 0x3c9   :  { %v5492_v13 = vpop.eup %5491  ;;  %5162 = vmatmul.mubr.msk.f32.vlgmr.msra.gmra.mxu0 %vm56_vm3, %v722_v12  ;;  %5182 = vmatprep.subr.mxu1 %v4749_v9 }
 0x3ca   :  { %v5494_v14 = vpop.eup %5493  ;;  %v723_v15 = vmul.f32 %v5492_v13, %v5861_v43 }
 0x3cb   :  { %v724_v16 = vmul.f32 %v5494_v14, %v5863_v44 }
 0x3cc   :  { %5168 = vmatprep.mubr.msk.f32.mxu1 %vm56_vm3, %v723_v15  ;;  %v4756_v15 = vld [vmem:[%s6627_s3 + $0x30] sm:$0xff] }
 0x3cd   :  { %5169 = vmatmul.mubr.msk.f32.vlgmr.msra.gmra.mxu1 %vm56_vm3, %v724_v16  ;;  %v4755_v16 = vld [vmem:[%s6627_s3 + $0x28] sm:$0xff] }
 0x3ce   :  { %5183 = vmatpush3.msra.mxu1 %v4749_v9  ;;  %5190 = vmatprep.mubr.msk.f32.mxu1 %vm92_vm0, %v5734_v10 }
 0x3cf   :  { %5184 = vmatprep.subr.mxu1 %v4748_v17 }
 0x3d0   :  { %5185 = vmatpush3.msra.mxu1 %v4748_v17 }
 0x3d1   :  { %5186 = vmatprep.subr.mxu1 %v4747_v18 }
 0x3d2   :  { %5187 = vmatpush3.msra.mxu1 %v4747_v18  ;;  %v4754_v18 = vld [vmem:[%s6627_s3 + $0x20] sm:$0xff] }
 0x3d3   :  { %5188 = vmatprep.subr.mxu1 %v4746_v19 }
 0x3d4   :  { %5189 = vmatpush3.msra.mxu1 %v4746_v19 }
 0x3d5   :  { %5191 = vmatmul.mubr.msk.f32.vlgmr.msra.gmra.mxu1 %vm92_vm0, %v5738_v11  ;;  %v1127_v11 = vld [vmem:[%s6629_s5 + $0x18] sm:$0xff] }
 0x3d6   :  { %5171 = vmatprep.subr.mxu0 %v1127_v11 }
 0x3d7   :  { %5172 = vmatpush3.msra.mxu0 %v1127_v11 }
 0x3d8   :  { %5173 = vmatprep.subr.mxu0 %v1126_v27 }
 0x3d9   :  { %5174 = vmatpush3.msra.mxu0 %v1126_v27 }
 0x3da   :  { %5175 = vmatprep.subr.mxu0 %v1125_v29 }
 0x3db   :  { %5176 = vmatpush3.msra.mxu0 %v1125_v29 }
 0x3dc   :  { %5177 = vmatprep.subr.mxu0 %v1124_v30 }
 0x3dd   :  { %5178 = vmatpush3.msra.mxu0 %v1124_v30 }
 0x3de   :  { %5193 = vmatprep.subr.mxu0 %v4757_v38 }
 0x3f0   :  { %v62_v39 = vpop.xlane.xlu1 %61  ;;  %v59_v40 = vpop.xlane.xlu0 %58 }
 0x3f1   :  { %vm64_vm5 = vcmp.gt.f32.partialorder %v62_v39, 0.0  ;;  %vm63_vm7 = vcmp.gt.f32.partialorder %v59_v40, 0.0 }
 0x3f2   :  { %v5945_v49 = vsel %vm64_vm5, 1.0, %v5636_v48  ;;  %v5952_v21 = vsel %vm63_vm7, 1.0, %v5636_v48 }
 0x42f   :  { %v5149_v20 = vpop.f32.mrf.mxu1 }
 0x431   :  { %v803_v22 = vpop.f32.mrf.mxu1 }
 0x485   :  { %v5156_v10 = vpop.f32.mrf.mxu1 }
 0x486   :  { %1077 = vrot.lane.b32.xlu1 %v5156_v10, %s5633_s14 }
 0x487   :  { %v890_v23 = vpop.f32.mrf.mxu1 }
 0x488   :  { %1075 = vrot.lane.b32.xlu0 %v890_v23, %s5633_s14 }
 0x489   :  { %v5163_v24 = vpop.f32.mrf.mxu0 }
 0x48a   :  { %1085 = vrot.lane.b32.xlu1 %v5163_v24, %s5634_s7 }
 0x48b   :  { %v977_v25 = vpop.f32.mrf.mxu0 }
 0x48c   :  { %1083 = vrot.lane.b32.xlu0 %v977_v25, %s5634_s7 }
 0x48d   :  { %v5170_v26 = vpop.f32.mrf.mxu1 }
 0x48e   :  { %1093 = vrot.lane.b32.xlu1 %v5170_v26, %s5635_s18 }
 0x48f   :  { %v1064_v28 = vpop.f32.mrf.mxu1 }
 0x490   :  { %1091 = vrot.lane.b32.xlu0 %v1064_v28, %s5635_s18 }
 0x495   :  { %v5192_v32 = vpop.f32.mrf.mxu1 }
 0x496   :  { %v5927_v33 = vadd.f32 %v5192_v32, %v4751_v31 }
 0x497   :  { %v1305_v36 = vpop.f32.mrf.mxu1 }
 0x498   :  { %v5929_v37 = vadd.f32 %v4751_v31, %v1305_v36  ;;  %1493 = vrot.lane.b32.xlu1 %v5927_v33, %s5627_s15  ;;  %v6031_v36 = vld [vmem:[%s6632_s8 + $0x18] sm:$0xff] }
 0x499   :  { %vm55_vm8 = vcmp.gt.f32.partialorder %v6031_v36, 0.0 }
 0x49a   :  { %5208 = vmatprep.mubr.msk.f32.mxu1 %vm268_vm1, %v5929_v37  ;;  %1584 = vrot.lane.b32.xlu0 %v5929_v37, %s5628_s16 }
 0x49c   :  { %1491 = vrot.lane.b32.xlu1 %v5929_v37, %s5627_s15 }
 0x4f8   :  { %v1078_v41 = vpop.permute.xlu1 %1077 }
 0x4f9   :  { %v1098_v45 = vsel %vm268_vm1, %v5149_v20, %v1078_v41 }
 0x4fa   :  { %v1076_v42 = vpop.permute.xlu0 %1075 }
 0x4fb   :  { %v1097_v50 = vsel %vm268_vm1, %v803_v22, %v1076_v42  ;;  %v4759_v22 = vld [vmem:[%s6628_s4 + $0x1] ss:$0 sm:$0xff] }
 0x4fc   :  { %v1086_v43 = vpop.permute.xlu1 %1085 }
 0x4fd   :  { %v1100_v46 = vsel %vm56_vm3, %v1098_v45, %v1086_v43 }
 0x4fe   :  { %v1084_v44 = vpop.permute.xlu0 %1083 }
 0x4ff   :  { %v1099_v52 = vsel %vm56_vm3, %v1097_v50, %v1084_v44 }
 0x500   :  { %v1094_v47 = vpop.permute.xlu1 %1093 }
 0x501   :  { %v1103_v51 = vsel %vm1101_vm6, %v1100_v46, %v1094_v47 }
 0x502   :  { %v1105_v53 = vmul.f32 %v5945_v49, %v1103_v51  ;;  %v1092_v54 = vpop.permute.xlu0 %1091 }
 0x503   :  { %v1102_v55 = vsel %vm1101_vm6, %v1099_v52, %v1092_v54 }
 0x504   :  { %v1109_v56 = vmul.f32 0.044715, %v1105_v53  ;;  %v1104_v57 = vmul.f32 %v5952_v21, %v1102_v55  ;;  %v1107_v12 = vmul.f32 0.5, %v1105_v53 }
 0x506   :  { %v1111_v58 = vmul.f32 %v1109_v56, %v1105_v53  ;;  %v1108_v59 = vmul.f32 0.044715, %v1104_v57  ;;  %v1106_v8 = vmul.f32 0.5, %v1104_v57 }
 0x508   :  { %v1113_v60 = vmul.f32 %v1111_v58, %v1105_v53  ;;  %v1110_v61 = vmul.f32 %v1108_v59, %v1104_v57 }
 0x50a   :  { %v1115_v62 = vadd.f32 %v1113_v60, %v1105_v53  ;;  %v1112_v63 = vmul.f32 %v1110_v61, %v1104_v57  ;;  %v1494_v17 = vpop.permute.xlu1 %1493 }
 0x50c   :  { %v1117_v1 = vmul.f32 0.7978846, %v1115_v62  ;;  %v1114_v2 = vadd.f32 %v1112_v63, %v1104_v57 }
 0x50e   :  { %5495 = vtanh.f32 %v1117_v1  ;;  %v1116_v4 = vmul.f32 0.7978846, %v1114_v2  ;;  %v1492_v19 = vpop.permute.xlu1 %1491 }
 0x510   :  { %5497 = vtanh.f32 %v1116_v4 }
 0x51b   :  { %v5496_v5 = vpop.eup %5495 }
 0x51c   :  { %v1121_v7 = vadd.f32 1.0, %v5496_v5 }
 0x51d   :  { %v5498_v6 = vpop.eup %5497 }
 0x51e   :  { %v1120_v9 = vadd.f32 1.0, %v5498_v6  ;;  %v1123_v14 = vmul.f32 %v1121_v7, %v1107_v12 }
 0x520   :  { %v1122_v13 = vmul.f32 %v1120_v9, %v1106_v8 }
 0x522   :  { %5179 = vmatprep.mubr.msk.f32.mxu0 %vm92_vm0, %v1122_v13 }
 0x523   :  { %5180 = vmatmul.mubr.msk.f32.vlgmr.msra.gmra.mxu0 %vm92_vm0, %v1123_v14 }
 0x524   :  { %5194 = vmatpush3.msra.mxu0 %v4757_v38  ;;  %5201 = vmatprep.mubr.msk.f32.mxu0 %vm92_vm0, %v5695_v0 }
 0x525   :  { %5195 = vmatprep.subr.mxu0 %v4756_v15 }
 0x526   :  { %5196 = vmatpush3.msra.mxu0 %v4756_v15 }
 0x527   :  { %5197 = vmatprep.subr.mxu0 %v4755_v16 }
 0x528   :  { %5198 = vmatpush3.msra.mxu0 %v4755_v16 }
 0x529   :  { %5199 = vmatprep.subr.mxu0 %v4754_v18 }
 0x52a   :  { %5200 = vmatpush3.msra.mxu0 %v4754_v18 }
 0x52b   :  { %5202 = vmatmul.mubr.msk.f32.vlgmr.msra.gmra.mxu0 %vm92_vm0, %v5708_v3  ;;  %v1585_v3 = vpop.permute.xlu0 %1584 }
 0x52c   :  { %5215 = vmatprep.mubr.msk.f32.mxu0 %vm268_vm1, %v1492_v19 }
 0x5e3   :  { %v5972_v20 = vpop.f32.mrf.mxu0 }
 0x5e5   :  { %v5974_v0 = vpop.f32.mrf.mxu0 }
 0x5eb   :  { %v5203_v10 = vpop.f32.mrf.mxu0 }
 0x5ec   :  { %v5979_v23 = vadd.f32 %v5203_v10, %v4759_v22 }
 0x5ed   :  { %v1393_v24 = vpop.f32.mrf.mxu0 }
 0x5ee   :  { %v5981_v25 = vadd.f32 %v4759_v22, %v1393_v24  ;;  %1497 = vrot.lane.b32.xlu0 %v5979_v23, %s5627_s15  ;;  %5204 = vmatprep.subr.msk.mxu1 %vm268_vm1, %v5979_v23 }
 0x5ef   :  { %5205 = vmatpush3.xpose.msk.msra.mxu1 %vm268_vm1, %v5979_v23 }
 0x5f0   :  { %1495 = vrot.lane.b32.xlu1 %v5981_v25, %s5627_s15  ;;  %5206 = vmatprep.subr.msk.mxu1 %vm268_vm1, %v5981_v25 }
 0x5f2   :  { %1590 = vrot.lane.b32.xlu0 %v5979_v23, %s5628_s16 }
 0x5f3   :  { %5207 = vmatpush3.xpose.msk.msra.mxu1 %vm268_vm1, %v5981_v25 }
 0x5f4   :  { %1586 = vrot.lane.b32.xlu1 %v5927_v33, %s5628_s16 }
 0x5f6   :  { %1683 = vrot.lane.b32.xlu0 %v5979_v23, %s5629_s19  ;;  %5209 = vmatmul.mubr.msk.f32.vlgmr.msra.gmra.mxu1 %vm268_vm1, %v5927_v33 }
 0x5f7   :  { %5222 = vmatprep.mubr.msk.f32.mxu1 %vm268_vm1, %v1585_v3 }
 0x5f8   :  { %1681 = vrot.lane.b32.xlu1 %v5981_v25, %s5629_s19 }
 0x5fa   :  { %1588 = vrot.lane.b32.xlu0 %v5981_v25, %s5628_s16 }
 0x5fc   :  { %1679 = vrot.lane.b32.xlu1 %v5927_v33, %s5629_s19 }
 0x5fe   :  { %1677 = vrot.lane.b32.xlu0 %v5929_v37, %s5629_s19  ;;  %v6036_v37 = vld [vmem:[%s6632_s8 + $0x10] sm:$0xff] }
 0x5ff   :  { %vm54_vm9 = vcmp.gt.f32.partialorder %v6036_v37, 0.0 }
 0x660   :  { %v1498_v26 = vpop.permute.xlu0 %1497 }
 0x661   :  { %5211 = vmatprep.subr.msk.mxu0 %vm268_vm1, %v1498_v26 }
 0x662   :  { %v1496_v11 = vpop.permute.xlu1 %1495  ;;  %5212 = vmatpush3.xpose.msk.msra.mxu0 %vm268_vm1, %v1498_v26 }
 0x663   :  { %5213 = vmatprep.subr.msk.mxu0 %vm268_vm1, %v1496_v11 }
 0x664   :  { %v1591_v27 = vpop.permute.xlu0 %1590 }
 0x665   :  { %5218 = vmatprep.subr.msk.mxu1 %vm268_vm1, %v1591_v27 }
 0x666   :  { %v1587_v28 = vpop.permute.xlu1 %1586  ;;  %5214 = vmatpush3.xpose.msk.msra.mxu0 %vm268_vm1, %v1496_v11  ;;  %5219 = vmatpush3.xpose.msk.msra.mxu1 %vm268_vm1, %v1591_v27 }
 0x668   :  { %v1684_v29 = vpop.permute.xlu0 %1683 }
 0x669   :  { %5216 = vmatmul.mubr.msk.f32.vlgmr.msra.gmra.mxu0 %vm268_vm1, %v1494_v17  ;;  %5225 = vmatprep.subr.msk.mxu0 %vm268_vm1, %v1684_v29 }
 0x66a   :  { %v1682_v30 = vpop.permute.xlu1 %1681  ;;  %5226 = vmatpush3.xpose.msk.msra.mxu0 %vm268_vm1, %v1684_v29 }
 0x66b   :  { %5227 = vmatprep.subr.msk.mxu0 %vm268_vm1, %v1682_v30 }
 0x66c   :  { %v1589_v31 = vpop.permute.xlu0 %1588 }
 0x66d   :  { %5220 = vmatprep.subr.msk.mxu1 %vm268_vm1, %v1589_v31 }
 0x66e   :  { %5221 = vmatpush3.xpose.msk.msra.mxu1 %vm268_vm1, %v1589_v31  ;;  %5228 = vmatpush3.xpose.msk.msra.mxu0 %vm268_vm1, %v1682_v30  ;;  %v1680_v33 = vpop.permute.xlu1 %1679 }
 0x670   :  { %v1678_v32 = vpop.permute.xlu0 %1677 }
 0x671   :  { %5223 = vmatmul.mubr.msk.f32.vlgmr.msra.gmra.mxu1 %vm268_vm1, %v1587_v28  ;;  %5229 = vmatprep.mubr.msk.f32.mxu0 %vm268_vm1, %v1678_v32 }
 0x672   :  { %5230 = vmatmul.mubr.msk.f32.vlgmr.msra.gmra.mxu0 %vm268_vm1, %v1680_v33 }
 0x6b6   :  { %v5210_v38 = vpop.f32.mrf.mxu1 }
 0x6b7   :  { %v1490_v39 = vsel %vm55_vm8, %v5210_v38, -1e+30 }
 0x6b8   :  { %v1480_v40 = vpop.f32.mrf.mxu1  ;;  %v1773_v41 = vsel %vm56_vm3, %v1490_v39, -inf }
 0x6b9   :  { %v1489_v42 = vsel %vm54_vm9, %v1480_v40, -1e+30  ;;  %1774 = vmax.xlane.f32.xlu1 %v1773_v41 }
 0x6ba   :  { %v1770_v43 = vsel %vm56_vm3, %v1489_v42, -inf }
 0x6bb   :  { %1771 = vmax.xlane.f32.xlu0 %v1770_v43 }
 0x729   :  { %v5217_v44 = vpop.f32.mrf.mxu0 }
 0x72a   :  { %v1583_v45 = vsel %vm55_vm8, %v5217_v44, -1e+30 }
 0x72b   :  { %v1573_v46 = vpop.f32.mrf.mxu0  ;;  %v1779_v47 = vsel %vm56_vm3, %v1583_v45, -inf }
 0x72c   :  { %v1582_v50 = vsel %vm54_vm9, %v1573_v46, -1e+30  ;;  %1780 = vmax.xlane.f32.xlu0 %v1779_v47 }
 0x72d   :  { %v1776_v51 = vsel %vm56_vm3, %v1582_v50, -inf }
 0x730   :  { %1777 = vmax.xlane.f32.xlu0 %v1776_v51 }
 0x731   :  { %v5224_v52 = vpop.f32.mrf.mxu1 }
 0x732   :  { %v1676_v53 = vsel %vm55_vm8, %v5224_v52, -1e+30  ;;  %v5231_v54 = vpop.f32.mrf.mxu0 }
 0x733   :  { %v1666_v55 = vpop.f32.mrf.mxu1  ;;  %v1785_v56 = vsel %vm56_vm3, %v1676_v53, -inf  ;;  %v1769_v57 = vsel %vm55_vm8, %v5231_v54, -1e+30 }
 0x734   :  { %v1675_v58 = vsel %vm54_vm9, %v1666_v55, -1e+30  ;;  %1786 = vmax.xlane.f32.xlu0 %v1785_v56  ;;  %v1759_v59 = vpop.f32.mrf.mxu0  ;;  %v1791_v62 = vsel %vm56_vm3, %v1769_v57, -inf }
 0x735   :  { %v1782_v60 = vsel %vm56_vm3, %v1675_v58, -inf  ;;  %v1768_v61 = vsel %vm54_vm9, %v1759_v59, -1e+30 }
 0x736   :  { %1783 = vmax.xlane.f32.xlu1 %v1782_v60  ;;  %v1788_v63 = vsel %vm56_vm3, %v1768_v61, -inf }
 0x738   :  { %1792 = vmax.xlane.f32.xlu0 %v1791_v62 }
 0x73a   :  { %1789 = vmax.xlane.f32.xlu1 %v1788_v63  ;;  %v72_v63 = vsel %vm56_vm3, %v6031_v36, 0.0 }
 0x742   :  { %v1775_v1 = vpop.xlane.xlu1 %1774 }
 0x743   :  { %v1795_v2 = vsub.f32 %v1490_v39, %v1775_v1  ;;  %v69_v1 = vsel %vm56_vm3, %v6036_v37, 0.0 }
 0x744   :  { %v1772_v5 = vpop.xlane.xlu0 %1771 }
 0x745   :  { %v1804_v4 = vmul.f32 1.442695, %v1795_v2  ;;  %v1794_v6 = vsub.f32 %v1489_v42, %v1772_v5 }
 0x747   :  { %5499 = vpow2.f32 %v1804_v4  ;;  %v1802_v7 = vmul.f32 1.442695, %v1794_v6 }
 0x749   :  { %5501 = vpow2.f32 %v1802_v7 }
 0x74b   :  { %1860 = vrot.lane.b32.xlu1 %v5979_v23, %s5626_s17 }
 0x74e   :  { %1858 = vrot.lane.b32.xlu0 %v5981_v25, %s5626_s17 }
 0x74f   :  { %1947 = vrot.lane.b32.xlu1 %v5979_v23, %s5630_s24 }
 0x752   :  { %2034 = vrot.lane.b32.xlu0 %v5979_v23, %s5631_s25 }
 0x753   :  { %1945 = vrot.lane.b32.xlu1 %v5981_v25, %s5630_s24 }
 0x754   :  { %v6076_v8 = vpop.eup %5499 }
 0x755   :  { %v1821_v9 = vsel %vm56_vm3, %v6076_v8, 0.0 }
 0x756   :  { %v6080_v12 = vpop.eup %5501 }
 0x757   :  { %2121 = vrot.lane.b32.xlu1 %v5979_v23, %s5632_s26  ;;  %v1818_v13 = vsel %vm56_vm3, %v6080_v12, 0.0 }
 0x771   :  { %1822 = vadd.xlane.f32.xlu0 %v1821_v9 }
 0x77b   :  { %1819 = vadd.xlane.f32.xlu1 %v1818_v13 }
 0x7b5   :  { %v1781_v14 = vpop.xlane.xlu0 %1780 }
 0x7b6   :  { %v1797_v15 = vsub.f32 %v1583_v45, %v1781_v14 }
 0x7b8   :  { %v1808_v16 = vmul.f32 1.442695, %v1797_v15 }
 0x7b9   :  { %v1778_v17 = vpop.xlane.xlu0 %1777 }
 0x7ba   :  { %5503 = vpow2.f32 %v1808_v16  ;;  %v1796_v18 = vsub.f32 %v1582_v50, %v1778_v17 }
 0x7bc   :  { %v1806_v19 = vmul.f32 1.442695, %v1796_v18 }
 0x7bd   :  { %v1787_v22 = vpop.xlane.xlu0 %1786 }
 0x7be   :  { %5505 = vpow2.f32 %v1806_v19  ;;  %v1799_v10 = vsub.f32 %v1676_v53, %v1787_v22 }
 0x7bf   :  { %v1784_v23 = vpop.xlane.xlu1 %1783 }
 0x7c0   :  { %v1812_v24 = vmul.f32 1.442695, %v1799_v10  ;;  %v1798_v3 = vsub.f32 %v1675_v58, %v1784_v23 }
 0x7c1   :  { %v1793_v26 = vpop.xlane.xlu0 %1792 }
 0x7c2   :  { %5507 = vpow2.f32 %v1812_v24  ;;  %v1810_v11 = vmul.f32 1.442695, %v1798_v3  ;;  %v1801_v27 = vsub.f32 %v1769_v57, %v1793_v26 }
 0x7c3   :  { %v1790_v28 = vpop.xlane.xlu1 %1789 }
 0x7c4   :  { %5509 = vpow2.f32 %v1810_v11  ;;  %v1816_v29 = vmul.f32 1.442695, %v1801_v27  ;;  %v1800_v30 = vsub.f32 %v1768_v61, %v1790_v28 }
 0x7c5   :  { %v1859_v31 = vpop.permute.xlu0 %1858 }
 0x7c6   :  { %5511 = vpow2.f32 %v1816_v29  ;;  %v1814_v32 = vmul.f32 1.442695, %v1800_v30  ;;  %v4798_v30 = vld [vmem:[%s6625_s1 + $0x58] sm:$0xff] }
 0x7c7   :  { %v6084_v33 = vpop.eup %5503  ;;  %v1861_v38 = vpop.permute.xlu1 %1860 }
 0x7c8   :  { %5513 = vpow2.f32 %v1814_v32  ;;  %5232 = vmatprep.subr.mxu1 %v1861_v38  ;;  %v1827_v39 = vsel %vm56_vm3, %v6084_v33, 0.0  ;;  %v4797_v32 = vld [vmem:[%s6625_s1 + $0x50] sm:$0xff] }
 0x7c9   :  { %5233 = vmatpush3.msra.mxu1 %v1861_v38  ;;  %1828 = vadd.xlane.f32.xlu0 %v1827_v39  ;;  %v2035_v40 = vpop.permute.xlu0 %2034  ;;  %v4788_v38 = vld [vmem:[%s6629_s5 + $0x30] sm:$0xff]  ;;  %v4796_v39 = vld [vmem:[%s6625_s1 + $0x48] sm:$0xff] }
 0x7ca   :  { %5234 = vmatprep.subr.mxu1 %v1859_v31  ;;  %5246 = vmatprep.subr.mxu0 %v2035_v40 }
 0x7cb   :  { %v5506_v41 = vpop.eup %5505  ;;  %v1948_v42 = vpop.permute.xlu1 %1947  ;;  %5235 = vmatpush3.msra.mxu1 %v1859_v31  ;;  %5247 = vmatpush3.msra.mxu0 %v2035_v40  ;;  %v4789_v31 = vld [vmem:[%s6629_s5 + $0x38] sm:$0xff]  ;;  %v5607_v40 = vld [vmem:[%s6624_s0 + $0x8] sm:$0xff] }
 0x7cc   :  { %5239 = vmatprep.subr.mxu1 %v1948_v42  ;;  %v1824_v43 = vsel %vm56_vm3, %v5506_v41, 0.0 }
 0x7cd   :  { %1825 = vadd.xlane.f32.xlu1 %v1824_v43  ;;  %v5608_v43 = vld [vmem:[%s6624_s0] sm:$0xff] }
 0x7cf   :  { %v5508_v44 = vpop.eup %5507  ;;  %v1946_v54 = vpop.permute.xlu1 %1945 }
 0x7d0   :  { %v1833_v45 = vsel %vm56_vm3, %v5508_v44, 0.0 }
 0x7d1   :  { %v5510_v46 = vpop.eup %5509  ;;  %1834 = vadd.xlane.f32.xlu0 %v1833_v45  ;;  %v4806_v45 = vld [vmem:[%s6627_s3 + $0x58] sm:$0xff] }
 0x7d2   :  { %v1830_v47 = vsel %vm56_vm3, %v5510_v46, 0.0 }
 0x7d3   :  { %v6091_v50 = vpop.eup %5511  ;;  %1831 = vadd.xlane.f32.xlu1 %v1830_v47  ;;  %v2122_v55 = vpop.permute.xlu1 %2121 }
 0x7d4   :  { %v1839_v51 = vsel %vm56_vm3, %v6091_v50, 0.0 }
 0x7d5   :  { %v5514_v52 = vpop.eup %5513  ;;  %1840 = vadd.xlane.f32.xlu0 %v1839_v51 }
 0x7d6   :  { %v1836_v53 = vsel %vm56_vm3, %v5514_v52, 0.0 }
 0x7d7   :  { %1837 = vadd.xlane.f32.xlu1 %v1836_v53 }
 0x7e8   :  { %2119 = vrot.lane.b32.xlu1 %v5981_v25, %s5632_s26 }
 0x7eb   :  { %2032 = vrot.lane.b32.xlu0 %v5981_v25, %s5631_s25 }
 0x7fa   :  { %v1823_v56 = vpop.xlane.xlu0 %1822 }
 0x7fb   :  { %5515 = vrcp.f32 %v1823_v56 }
 0x804   :  { %v1820_v57 = vpop.xlane.xlu1 %1819 }
 0x805   :  { %5517 = vrcp.f32 %v1820_v57 }
 0x808   :  { %v5516_v58 = vpop.eup %5515 }
 0x809   :  { %v1851_v61 = vmul.f32 %v5516_v58, %v6076_v8 }
 0x80a   :  { %70 = vadd.xlane.f32.xlu0 %v69_v1 }
 0x80c   :  { %73 = vadd.xlane.f32.xlu1 %v72_v63 }
 0x812   :  { %v5518_v59 = vpop.eup %5517 }
 0x813   :  { %v1850_v60 = vmul.f32 %v5518_v59, %v6080_v12 }
 0x815   :  { %5236 = vmatprep.mubr.msk.f32.mxu1 %vm56_vm3, %v1850_v60 }
 0x816   :  { %5237 = vmatmul.mubr.msk.f32.vlgmr.msra.gmra.mxu1 %vm56_vm3, %v1851_v61 }
 0x817   :  { %5240 = vmatpush3.msra.mxu1 %v1948_v42  ;;  %v4795_v42 = vld [vmem:[%s6625_s1 + $0x40] sm:$0xff] }
 0x818   :  { %5241 = vmatprep.subr.mxu1 %v1946_v54 }
 0x819   :  { %5242 = vmatpush3.msra.mxu1 %v1946_v54 }
 0x81a   :  { %5253 = vmatprep.subr.mxu1 %v2122_v55 }
 0x852   :  { %v1829_v25 = vpop.xlane.xlu0 %1828 }
 0x853   :  { %5519 = vrcp.f32 %v1829_v25 }
 0x856   :  { %v1826_v62 = vpop.xlane.xlu1 %1825 }
 0x857   :  { %5521 = vrcp.f32 %v1826_v62 }
 0x85a   :  { %v1835_v2 = vpop.xlane.xlu0 %1834 }
 0x85b   :  { %5523 = vrcp.f32 %v1835_v2 }
 0x85c   :  { %v1832_v4 = vpop.xlane.xlu1 %1831 }
 0x85d   :  { %5525 = vrcp.f32 %v1832_v4 }
 0x85e   :  { %v1841_v5 = vpop.xlane.xlu0 %1840 }
 0x85f   :  { %5527 = vrcp.f32 %v1841_v5 }
 0x860   :  { %v1838_v6 = vpop.xlane.xlu1 %1837  ;;  %v5520_v8 = vpop.eup %5519 }
 0x861   :  { %5529 = vrcp.f32 %v1838_v6  ;;  %v1853_v13 = vmul.f32 %v5520_v8, %v6084_v33 }
 0x862   :  { %v2033_v7 = vpop.permute.xlu0 %2032 }
 0x863   :  { %5248 = vmatprep.subr.mxu0 %v2033_v7 }
 0x864   :  { %v5522_v9 = vpop.eup %5521  ;;  %5249 = vmatpush3.msra.mxu0 %v2033_v7  ;;  %v2120_v15 = vpop.permute.xlu1 %2119 }
 0x865   :  { %v1852_v12 = vmul.f32 %v5522_v9, %v5506_v41  ;;  %5260 = vmatprep.subr.mxu0 %v4789_v31  ;;  %v4787_v41 = vld [vmem:[%s6629_s5 + $0x28] sm:$0xff] }
 0x867   :  { %5243 = vmatprep.mubr.msk.f32.mxu1 %vm56_vm3, %v1852_v12 }
 0x868   :  { %5244 = vmatmul.mubr.msk.f32.vlgmr.msra.gmra.mxu1 %vm56_vm3, %v1853_v13  ;;  %v5524_v14 = vpop.eup %5523 }
 0x869   :  { %5254 = vmatpush3.msra.mxu1 %v2122_v55  ;;  %v1855_v18 = vmul.f32 %v5524_v14, %v5508_v44  ;;  %v4786_v44 = vld [vmem:[%s6629_s5 + $0x20] sm:$0xff] }
 0x86a   :  { %v5526_v16 = vpop.eup %5525  ;;  %5255 = vmatprep.subr.mxu1 %v2120_v15 }
 0x86b   :  { %5256 = vmatpush3.msra.mxu1 %v2120_v15  ;;  %v1854_v17 = vmul.f32 %v5526_v16, %v5510_v46 }
 0x86c   :  { %v5528_v19 = vpop.eup %5527  ;;  %5271 = vmatprep.subr.mxu1 %v4798_v30 }
 0x86d   :  { %5250 = vmatprep.mubr.msk.f32.mxu0 %vm56_vm3, %v1854_v17  ;;  %v1857_v23 = vmul.f32 %v5528_v19, %v6091_v50 }
 0x86e   :  { %v5530_v22 = vpop.eup %5529  ;;  %5251 = vmatmul.mubr.msk.f32.vlgmr.msra.gmra.mxu0 %vm56_vm3, %v1855_v18 }
 0x86f   :  { %v1856_v10 = vmul.f32 %v5530_v22, %v5514_v52  ;;  %5261 = vmatpush3.msra.mxu0 %v4789_v31 }
 0x870   :  { %5262 = vmatprep.subr.mxu0 %v4788_v38 }
 0x871   :  { %5257 = vmatprep.mubr.msk.f32.mxu1 %vm56_vm3, %v1856_v10  ;;  %5263 = vmatpush3.msra.mxu0 %v4788_v38 }
 0x872   :  { %5258 = vmatmul.mubr.msk.f32.vlgmr.msra.gmra.mxu1 %vm56_vm3, %v1857_v23  ;;  %5264 = vmatprep.subr.mxu0 %v4787_v41 }
 0x873   :  { %5272 = vmatpush3.msra.mxu1 %v4798_v30  ;;  %5265 = vmatpush3.msra.mxu0 %v4787_v41 }
 0x874   :  { %5273 = vmatprep.subr.mxu1 %v4797_v32  ;;  %5266 = vmatprep.subr.mxu0 %v4786_v44 }
 0x875   :  { %5274 = vmatpush3.msra.mxu1 %v4797_v32  ;;  %5267 = vmatpush3.msra.mxu0 %v4786_v44 }
 0x876   :  { %5275 = vmatprep.subr.mxu1 %v4796_v39  ;;  %5282 = vmatprep.subr.mxu0 %v4806_v45 }
 0x877   :  { %5276 = vmatpush3.msra.mxu1 %v4796_v39 }
 0x878   :  { %5277 = vmatprep.subr.mxu1 %v4795_v42 }
 0x879   :  { %5278 = vmatpush3.msra.mxu1 %v4795_v42 }
 0x893   :  { %v71_v47 = vpop.xlane.xlu0 %70 }
 0x894   :  { %vm75_vm11 = vcmp.gt.f32.partialorder %v71_v47, 0.0 }
 0x895   :  { %v74_v46 = vpop.xlane.xlu1 %73  ;;  %v6169_v62 = vsel %vm75_vm11, 1.0, %v5636_v48 }
 0x896   :  { %vm76_vm10 = vcmp.gt.f32.partialorder %v74_v46, 0.0 }
 0x897   :  { %v6162_v57 = vsel %vm76_vm10, 1.0, %v5636_v48 }
 0x8d6   :  { %v5238_v24 = vpop.f32.mrf.mxu1 }
 0x8d8   :  { %v1936_v3 = vpop.f32.mrf.mxu1 }
 0x928   :  { %v5245_v26 = vpop.f32.mrf.mxu1 }
 0x929   :  { %2210 = vrot.lane.b32.xlu1 %v5245_v26, %s5633_s14 }
 0x92a   :  { %v2023_v11 = vpop.f32.mrf.mxu1 }
 0x92b   :  { %2208 = vrot.lane.b32.xlu0 %v2023_v11, %s5633_s14  ;;  %v4805_v11 = vld [vmem:[%s6627_s3 + $0x50] sm:$0xff] }
 0x92e   :  { %v5252_v27 = vpop.f32.mrf.mxu0 }
 0x92f   :  { %2218 = vrot.lane.b32.xlu1 %v5252_v27, %s5634_s7  ;;  %v4804_v27 = vld [vmem:[%s6627_s3 + $0x48] sm:$0xff] }
 0x930   :  { %v2110_v28 = vpop.f32.mrf.mxu0 }
 0x931   :  { %2216 = vrot.lane.b32.xlu0 %v2110_v28, %s5634_s7  ;;  %v4803_v28 = vld [vmem:[%s6627_s3 + $0x40] sm:$0xff] }
 0x932   :  { %v5259_v29 = vpop.f32.mrf.mxu1 }
 0x933   :  { %2226 = vrot.lane.b32.xlu1 %v5259_v29, %s5635_s18  ;;  %v4800_v29 = vld [vmem:[%s6626_s2 + $0x2] ss:$0 sm:$0xff] }
 0x934   :  { %v2197_v33 = vpop.f32.mrf.mxu1 }
 0x935   :  { %2224 = vrot.lane.b32.xlu0 %v2197_v33, %s5635_s18 }
 0x937   :  { %2479 = vrot.lane.b32.xlu1 %v5607_v40, %s5637_s13 }
 0x939   :  { %2477 = vrot.lane.b32.xlu0 %v5608_v43, %s5637_s13 }
 0x93b   :  { %2383 = vrot.lane.b32.xlu1 %v5607_v40, %s5638_s30  ;;  %v4808_v40 = vld [vmem:[%s6628_s4 + $0x2] ss:$0 sm:$0xff] }
 0x93d   :  { %2381 = vrot.lane.b32.xlu0 %v5608_v43, %s5638_s30 }
 0x99b   :  { %v2211_v50 = vpop.permute.xlu1 %2210 }
 0x99c   :  { %v2231_v54 = vsel %vm268_vm1, %v5238_v24, %v2211_v50 }
 0x99d   :  { %v2209_v51 = vpop.permute.xlu0 %2208 }
 0x99e   :  { %v2230_v58 = vsel %vm268_vm1, %v1936_v3, %v2209_v51 }
 0x9a1   :  { %v2219_v52 = vpop.permute.xlu1 %2218 }
 0x9a2   :  { %v2233_v55 = vsel %vm56_vm3, %v2231_v54, %v2219_v52 }
 0x9a3   :  { %v2217_v53 = vpop.permute.xlu0 %2216 }
 0x9a4   :  { %v2232_v60 = vsel %vm56_vm3, %v2230_v58, %v2217_v53 }
 0x9a5   :  { %v2227_v56 = vpop.permute.xlu1 %2226 }
 0x9a6   :  { %v2235_v59 = vsel %vm1101_vm6, %v2233_v55, %v2227_v56 }
 0x9a7   :  { %v2237_v61 = vmul.f32 %v6162_v57, %v2235_v59  ;;  %v2225_v25 = vpop.permute.xlu0 %2224 }
 0x9a8   :  { %v2234_v63 = vsel %vm1101_vm6, %v2232_v60, %v2225_v25 }
 0x9a9   :  { %v2241_v1 = vmul.f32 0.044715, %v2237_v61  ;;  %v2236_v2 = vmul.f32 %v6169_v62, %v2234_v63  ;;  %v6173_v4 = vpop.permute.xlu1 %2479  ;;  %v2239_v24 = vmul.f32 0.5, %v2237_v61 }
 0x9ab   :  { %v2243_v5 = vmul.f32 %v2241_v1, %v2237_v61  ;;  %v2240_v6 = vmul.f32 0.044715, %v2236_v2  ;;  %v6175_v7 = vpop.permute.xlu0 %2477  ;;  %v2238_v10 = vmul.f32 0.5, %v2236_v2 }
 0x9ad   :  { %v2245_v8 = vmul.f32 %v2243_v5, %v2237_v61  ;;  %v2242_v9 = vmul.f32 %v2240_v6, %v2236_v2  ;;  %v6177_v12 = vpop.permute.xlu1 %2383 }
 0x9af   :  { %v2247_v13 = vadd.f32 %v2245_v8, %v2237_v61  ;;  %v2244_v14 = vmul.f32 %v2242_v9, %v2236_v2  ;;  %v6179_v15 = vpop.permute.xlu0 %2381 }
 0x9b0   :  { %5279 = vmatprep.mubr.msk.f32.mxu1 %vm92_vm0, %v6179_v15 }
 0x9b1   :  { %v2249_v48 = vmul.f32 0.7978846, %v2247_v13  ;;  %5280 = vmatmul.mubr.msk.f32.vlgmr.msra.gmra.mxu1 %vm92_vm0, %v6177_v12  ;;  %v2246_v16 = vadd.f32 %v2244_v14, %v2236_v2 }
 0x9b3   :  { %5531 = vtanh.f32 %v2249_v48  ;;  %v2248_v17 = vmul.f32 0.7978846, %v2246_v16 }
 0x9b5   :  { %5533 = vtanh.f32 %v2248_v17 }
 0x9c0   :  { %v5532_v18 = vpop.eup %5531 }
 0x9c1   :  { %v2253_v22 = vadd.f32 1.0, %v5532_v18 }
 0x9c2   :  { %v5534_v19 = vpop.eup %5533 }
 0x9c3   :  { %v2252_v23 = vadd.f32 1.0, %v5534_v19  ;;  %v2255_v26 = vmul.f32 %v2253_v22, %v2239_v24 }
 0x9c5   :  { %v2254_v3 = vmul.f32 %v2252_v23, %v2238_v10 }
 0x9c7   :  { %5268 = vmatprep.mubr.msk.f32.mxu0 %vm92_vm0, %v2254_v3 }
 0x9c8   :  { %5269 = vmatmul.mubr.msk.f32.vlgmr.msra.gmra.mxu0 %vm92_vm0, %v2255_v26 }
 0x9c9   :  { %5283 = vmatpush3.msra.mxu0 %v4806_v45  ;;  %5290 = vmatprep.mubr.msk.f32.mxu0 %vm92_vm0, %v6175_v7 }
 0x9ca   :  { %5284 = vmatprep.subr.mxu0 %v4805_v11 }
 0x9cb   :  { %5285 = vmatpush3.msra.mxu0 %v4805_v11 }
 0x9cc   :  { %5286 = vmatprep.subr.mxu0 %v4804_v27 }
 0x9cd   :  { %5287 = vmatpush3.msra.mxu0 %v4804_v27 }
 0x9ce   :  { %5288 = vmatprep.subr.mxu0 %v4803_v28 }
 0x9cf   :  { %5289 = vmatpush3.msra.mxu0 %v4803_v28 }
 0x9d0   :  { %5291 = vmatmul.mubr.msk.f32.vlgmr.msra.gmra.mxu0 %vm92_vm0, %v6173_v4 }
 0xa71   :  { %v5281_v30 = vpop.f32.mrf.mxu1 }
 0xa72   :  { %v2461_v31 = vadd.f32 %v5281_v30, %v4800_v29 }
 0xa73   :  { %v2455_v32 = vpop.f32.mrf.mxu1 }
 0xa74   :  { %2651 = vrot.lane.b32.xlu1 %v2461_v31, %s5627_s15  ;;  %v2456_v33 = vadd.f32 %v4800_v29, %v2455_v32 }
 0xa76   :  { %2742 = vrot.lane.b32.xlu0 %v2456_v33, %s5628_s16  ;;  %5297 = vmatprep.mubr.msk.f32.mxu1 %vm268_vm1, %v2456_v33 }
 0xa78   :  { %2649 = vrot.lane.b32.xlu1 %v2456_v33, %s5627_s15 }
 0xa88   :  { %v6207_v38 = vpop.f32.mrf.mxu0 }
 0xa8a   :  { %v6209_v39 = vpop.f32.mrf.mxu0 }
 0xa90   :  { %v5292_v41 = vpop.f32.mrf.mxu0 }
 0xa91   :  { %v6214_v42 = vadd.f32 %v5292_v41, %v4808_v40 }
 0xa92   :  { %v2551_v43 = vpop.f32.mrf.mxu0 }
 0xa93   :  { %v6216_v44 = vadd.f32 %v4808_v40, %v2551_v43  ;;  %5293 = vmatprep.subr.msk.mxu1 %vm268_vm1, %v6214_v42  ;;  %2655 = vrot.lane.b32.xlu0 %v6214_v42, %s5627_s15 }
 0xa94   :  { %5294 = vmatpush3.xpose.msk.msra.mxu1 %vm268_vm1, %v6214_v42 }
 0xa95   :  { %5295 = vmatprep.subr.msk.mxu1 %vm268_vm1, %v6216_v44  ;;  %2653 = vrot.lane.b32.xlu1 %v6216_v44, %s5627_s15 }
 0xa97   :  { %2748 = vrot.lane.b32.xlu0 %v6214_v42, %s5628_s16 }
 0xa98   :  { %5296 = vmatpush3.xpose.msk.msra.mxu1 %vm268_vm1, %v6216_v44 }
 0xa99   :  { %2744 = vrot.lane.b32.xlu1 %v2461_v31, %s5628_s16 }
 0xa9b   :  { %2841 = vrot.lane.b32.xlu0 %v6214_v42, %s5629_s19  ;;  %5298 = vmatmul.mubr.msk.f32.vlgmr.msra.gmra.mxu1 %vm268_vm1, %v2461_v31 }
 0xa9d   :  { %2839 = vrot.lane.b32.xlu1 %v6216_v44, %s5629_s19 }
 0xa9f   :  { %2746 = vrot.lane.b32.xlu0 %v6216_v44, %s5628_s16 }
 0xaa1   :  { %2837 = vrot.lane.b32.xlu1 %v2461_v31, %s5629_s19 }
 0xaa3   :  { %2835 = vrot.lane.b32.xlu0 %v2456_v33, %s5629_s19 }
 0xae6   :  { %v2652_v45 = vpop.permute.xlu1 %2651 }
 0xae8   :  { %v2743_v46 = vpop.permute.xlu0 %2742 }
 0xae9   :  { %5311 = vmatprep.mubr.msk.f32.mxu1 %vm268_vm1, %v2743_v46 }
 0xaea   :  { %v2650_v47 = vpop.permute.xlu1 %2649 }
 0xaeb   :  { %5304 = vmatprep.mubr.msk.f32.mxu0 %vm268_vm1, %v2650_v47 }
 0xb05   :  { %v2656_v50 = vpop.permute.xlu0 %2655 }
 0xb06   :  { %5300 = vmatprep.subr.msk.mxu0 %vm268_vm1, %v2656_v50 }
 0xb07   :  { %5301 = vmatpush3.xpose.msk.msra.mxu0 %vm268_vm1, %v2656_v50  ;;  %v2654_v51 = vpop.permute.xlu1 %2653 }
 0xb08   :  { %5302 = vmatprep.subr.msk.mxu0 %vm268_vm1, %v2654_v51 }
 0xb09   :  { %v2749_v52 = vpop.permute.xlu0 %2748 }
 0xb0a   :  { %5307 = vmatprep.subr.msk.mxu1 %vm268_vm1, %v2749_v52 }
 0xb0b   :  { %5303 = vmatpush3.xpose.msk.msra.mxu0 %vm268_vm1, %v2654_v51  ;;  %v2745_v53 = vpop.permute.xlu1 %2744  ;;  %5308 = vmatpush3.xpose.msk.msra.mxu1 %vm268_vm1, %v2749_v52 }
 0xb0d   :  { %v2842_v54 = vpop.permute.xlu0 %2841 }
 0xb0e   :  { %5305 = vmatmul.mubr.msk.f32.vlgmr.msra.gmra.mxu0 %vm268_vm1, %v2652_v45  ;;  %5314 = vmatprep.subr.msk.mxu0 %vm268_vm1, %v2842_v54 }
 0xb0f   :  { %5315 = vmatpush3.xpose.msk.msra.mxu0 %vm268_vm1, %v2842_v54  ;;  %v2840_v55 = vpop.permute.xlu1 %2839 }
 0xb10   :  { %5316 = vmatprep.subr.msk.mxu0 %vm268_vm1, %v2840_v55 }
 0xb11   :  { %v2747_v56 = vpop.permute.xlu0 %2746 }
 0xb12   :  { %5309 = vmatprep.subr.msk.mxu1 %vm268_vm1, %v2747_v56 }
 0xb13   :  { %5317 = vmatpush3.xpose.msk.msra.mxu0 %vm268_vm1, %v2840_v55  ;;  %5310 = vmatpush3.xpose.msk.msra.mxu1 %vm268_vm1, %v2747_v56  ;;  %v2838_v59 = vpop.permute.xlu1 %2837 }
 0xb15   :  { %v2836_v58 = vpop.permute.xlu0 %2835 }
 0xb16   :  { %5312 = vmatmul.mubr.msk.f32.vlgmr.msra.gmra.mxu1 %vm268_vm1, %v2745_v53  ;;  %5318 = vmatprep.mubr.msk.f32.mxu0 %vm268_vm1, %v2836_v58 }
 0xb17   :  { %5319 = vmatmul.mubr.msk.f32.vlgmr.msra.gmra.mxu0 %vm268_vm1, %v2838_v59 }
 0xb5b   :  { %v5299_v60 = vpop.f32.mrf.mxu1 }
 0xb5c   :  { %v2648_v61 = vsel %vm53_vm2, %v5299_v60, -1e+30 }
 0xb5d   :  { %v2931_v25 = vsel %vm56_vm3, %v2648_v61, -inf  ;;  %v2638_v63 = vpop.f32.mrf.mxu1 }
 0xb5e   :  { %v2647_v1 = vsel %vm52_vm4, %v2638_v63, -1e+30  ;;  %2932 = vmax.xlane.f32.xlu1 %v2931_v25 }
 0xb5f   :  { %v2928_v2 = vsel %vm56_vm3, %v2647_v1, -inf }
 0xb60   :  { %2929 = vmax.xlane.f32.xlu0 %v2928_v2 }
 0xbce   :  { %v5306_v5 = vpop.f32.mrf.mxu0 }
 0xbcf   :  { %v2741_v6 = vsel %vm53_vm2, %v5306_v5, -1e+30 }
 0xbd0   :  { %v2937_v8 = vsel %vm56_vm3, %v2741_v6, -inf  ;;  %v2731_v9 = vpop.f32.mrf.mxu0 }
 0xbd1   :  { %v2740_v13 = vsel %vm52_vm4, %v2731_v9, -1e+30  ;;  %2938 = vmax.xlane.f32.xlu0 %v2937_v8 }
 0xbd2   :  { %v2934_v14 = vsel %vm56_vm3, %v2740_v13, -inf }
 0xbd5   :  { %2935 = vmax.xlane.f32.xlu0 %v2934_v14 }
 0xbd6   :  { %v5313_v48 = vpop.f32.mrf.mxu1 }
 0xbd7   :  { %v2834_v16 = vsel %vm53_vm2, %v5313_v48, -1e+30  ;;  %v5320_v17 = vpop.f32.mrf.mxu0 }
 0xbd8   :  { %v2943_v18 = vsel %vm56_vm3, %v2834_v16, -inf  ;;  %v2824_v19 = vpop.f32.mrf.mxu1  ;;  %v2927_v22 = vsel %vm53_vm2, %v5320_v17, -1e+30 }
 0xbd9   :  { %v2833_v10 = vsel %vm52_vm4, %v2824_v19, -1e+30  ;;  %v2917_v23 = vpop.f32.mrf.mxu0  ;;  %2944 = vmax.xlane.f32.xlu0 %v2943_v18  ;;  %v2949_v26 = vsel %vm56_vm3, %v2927_v22, -inf }
 0xbda   :  { %v2940_v24 = vsel %vm56_vm3, %v2833_v10, -inf  ;;  %v2926_v3 = vsel %vm52_vm4, %v2917_v23, -1e+30 }
 0xbdb   :  { %2941 = vmax.xlane.f32.xlu1 %v2940_v24  ;;  %v2946_v11 = vsel %vm56_vm3, %v2926_v3, -inf }
 0xbdd   :  { %2950 = vmax.xlane.f32.xlu0 %v2949_v26 }
 0xbdf   :  { %2947 = vmax.xlane.f32.xlu1 %v2946_v11 }
 0xbe7   :  { %v2933_v34 = vpop.xlane.xlu1 %2932 }
 0xbe8   :  { %v2953_v35 = vsub.f32 %v2648_v61, %v2933_v34 }
 0xbe9   :  { %v2930_v28 = vpop.xlane.xlu0 %2929 }
 0xbea   :  { %v2962_v27 = vmul.f32 1.442695, %v2953_v35  ;;  %v2952_v29 = vsub.f32 %v2647_v1, %v2930_v28 }
 0xbec   :  { %5535 = vpow2.f32 %v2962_v27  ;;  %v2960_v30 = vmul.f32 1.442695, %v2952_v29 }
 0xbee   :  { %5537 = vpow2.f32 %v2960_v30 }
 0xbf0   :  { %3018 = vrot.lane.b32.xlu1 %v6214_v42, %s5626_s17 }
 0xbf3   :  { %3016 = vrot.lane.b32.xlu0 %v6216_v44, %s5626_s17 }
 0xbf4   :  { %3105 = vrot.lane.b32.xlu1 %v6214_v42, %s5630_s24 }
 0xbf7   :  { %3192 = vrot.lane.b32.xlu0 %v6214_v42, %s5631_s25 }
 0xbf8   :  { %3103 = vrot.lane.b32.xlu1 %v6216_v44, %s5630_s24 }
 0xbf9   :  { %v6296_v31 = vpop.eup %5535 }
 0xbfa   :  { %v2979_v32 = vsel %vm56_vm3, %v6296_v31, 0.0 }
 0xbfb   :  { %v6300_v33 = vpop.eup %5537 }
 0xbfc   :  { %3279 = vrot.lane.b32.xlu1 %v6214_v42, %s5632_s26  ;;  %v2976_v40 = vsel %vm56_vm3, %v6300_v33, 0.0 }
 0xc16   :  { %2980 = vadd.xlane.f32.xlu0 %v2979_v32 }
 0xc20   :  { %2977 = vadd.xlane.f32.xlu1 %v2976_v40 }
 0xc5a   :  { %v2939_v41 = vpop.xlane.xlu0 %2938 }
 0xc5b   :  { %v2955_v42 = vsub.f32 %v2741_v6, %v2939_v41 }
 0xc5d   :  { %v2966_v43 = vmul.f32 1.442695, %v2955_v42 }
 0xc5e   :  { %v2936_v45 = vpop.xlane.xlu0 %2935 }
 0xc5f   :  { %5539 = vpow2.f32 %v2966_v43  ;;  %v2954_v46 = vsub.f32 %v2740_v13, %v2936_v45 }
 0xc61   :  { %v2964_v47 = vmul.f32 1.442695, %v2954_v46 }
 0xc62   :  { %v2945_v50 = vpop.xlane.xlu0 %2944 }
 0xc63   :  { %5541 = vpow2.f32 %v2964_v47  ;;  %v2957_v51 = vsub.f32 %v2834_v16, %v2945_v50  ;;  %v4847_v47 = vld [vmem:[%s6625_s1 + $0x78] sm:$0xff] }
 0xc64   :  { %v2942_v52 = vpop.xlane.xlu1 %2941 }
 0xc65   :  { %v2970_v53 = vmul.f32 1.442695, %v2957_v51  ;;  %v2956_v54 = vsub.f32 %v2833_v10, %v2942_v52 }
 0xc66   :  { %v2951_v55 = vpop.xlane.xlu0 %2950 }
 0xc67   :  { %5543 = vpow2.f32 %v2970_v53  ;;  %v2968_v56 = vmul.f32 1.442695, %v2956_v54  ;;  %v2959_v58 = vsub.f32 %v2927_v22, %v2951_v55 }
 0xc68   :  { %v2948_v59 = vpop.xlane.xlu1 %2947 }
 0xc69   :  { %5545 = vpow2.f32 %v2968_v56  ;;  %v2974_v60 = vmul.f32 1.442695, %v2959_v58  ;;  %v2958_v61 = vsub.f32 %v2926_v3, %v2948_v59  ;;  %v4846_v58 = vld [vmem:[%s6625_s1 + $0x70] sm:$0xff]  ;;  %v4845_v59 = vld [vmem:[%s6625_s1 + $0x68] sm:$0xff] }
 0xc6a   :  { %v3017_v25 = vpop.permute.xlu0 %3016 }
 0xc6b   :  { %5547 = vpow2.f32 %v2974_v60  ;;  %v2972_v63 = vmul.f32 1.442695, %v2958_v61  ;;  %v4844_v60 = vld [vmem:[%s6625_s1 + $0x60] sm:$0xff] }
 0xc6c   :  { %v6304_v1 = vpop.eup %5539  ;;  %v3019_v2 = vpop.permute.xlu1 %3018 }
 0xc6d   :  { %5549 = vpow2.f32 %v2972_v63  ;;  %5321 = vmatprep.subr.mxu1 %v3019_v2  ;;  %v2985_v5 = vsel %vm56_vm3, %v6304_v1, 0.0 }
 0xc6e   :  { %5322 = vmatpush3.msra.mxu1 %v3019_v2  ;;  %2986 = vadd.xlane.f32.xlu0 %v2985_v5  ;;  %v3193_v6 = vpop.permute.xlu0 %3192 }
 0xc6f   :  { %5323 = vmatprep.subr.mxu1 %v3017_v25  ;;  %5335 = vmatprep.subr.mxu0 %v3193_v6 }
 0xc70   :  { %v5542_v8 = vpop.eup %5541  ;;  %v3106_v9 = vpop.permute.xlu1 %3105  ;;  %5324 = vmatpush3.msra.mxu1 %v3017_v25  ;;  %5336 = vmatpush3.msra.mxu0 %v3193_v6  ;;  %v4837_v6 = vld [vmem:[%s6629_s5 + $0x50] sm:$0xff] }
 0xc71   :  { %5328 = vmatprep.subr.mxu1 %v3106_v9  ;;  %v2982_v13 = vsel %vm56_vm3, %v5542_v8, 0.0 }
 0xc72   :  { %2983 = vadd.xlane.f32.xlu1 %v2982_v13  ;;  %v4835_v13 = vld [vmem:[%s6629_s5 + $0x40] sm:$0xff] }
 0xc74   :  { %v5544_v14 = vpop.eup %5543  ;;  %v3104_v23 = vpop.permute.xlu1 %3103 }
 0xc75   :  { %v2991_v48 = vsel %vm56_vm3, %v5544_v14, 0.0 }
 0xc76   :  { %v5546_v16 = vpop.eup %5545  ;;  %2992 = vadd.xlane.f32.xlu0 %v2991_v48 }
 0xc77   :  { %v2988_v17 = vsel %vm56_vm3, %v5546_v16, 0.0 }
 0xc78   :  { %v5548_v18 = vpop.eup %5547  ;;  %2989 = vadd.xlane.f32.xlu1 %v2988_v17  ;;  %v3280_v24 = vpop.permute.xlu1 %3279 }
 0xc79   :  { %v2997_v19 = vsel %vm56_vm3, %v5548_v18, 0.0 }
 0xc7a   :  { %v5550_v22 = vpop.eup %5549  ;;  %2998 = vadd.xlane.f32.xlu0 %v2997_v19  ;;  %v4855_v19 = vld [vmem:[%s6627_s3 + $0x78] sm:$0xff] }
 0xc7b   :  { %v2994_v10 = vsel %vm56_vm3, %v5550_v22, 0.0 }
 0xc7c   :  { %2995 = vadd.xlane.f32.xlu1 %v2994_v10 }
 0xc8d   :  { %3277 = vrot.lane.b32.xlu1 %v6216_v44, %s5632_s26 }
 0xc90   :  { %3190 = vrot.lane.b32.xlu0 %v6216_v44, %s5631_s25 }
 0xc9f   :  { %v2981_v3 = vpop.xlane.xlu0 %2980 }
 0xca0   :  { %5551 = vrcp.f32 %v2981_v3 }
 0xca9   :  { %v2978_v26 = vpop.xlane.xlu1 %2977 }
 0xcaa   :  { %5553 = vrcp.f32 %v2978_v26 }
 0xcad   :  { %v5552_v11 = vpop.eup %5551 }
 0xcae   :  { %v3009_v27 = vmul.f32 %v5552_v11, %v6296_v31 }
 0xcb7   :  { %v5554_v34 = vpop.eup %5553 }
 0xcb8   :  { %v3008_v35 = vmul.f32 %v5554_v34, %v6300_v33 }
 0xcba   :  { %5325 = vmatprep.mubr.msk.f32.mxu1 %vm56_vm3, %v3008_v35 }
 0xcbb   :  { %5326 = vmatmul.mubr.msk.f32.vlgmr.msra.gmra.mxu1 %vm56_vm3, %v3009_v27 }
 0xcbc   :  { %5329 = vmatpush3.msra.mxu1 %v3106_v9  ;;  %v4836_v9 = vld [vmem:[%s6629_s5 + $0x48] sm:$0xff] }
 0xcbd   :  { %5330 = vmatprep.subr.mxu1 %v3104_v23 }
 0xcbe   :  { %5331 = vmatpush3.msra.mxu1 %v3104_v23 }
 0xcbf   :  { %5342 = vmatprep.subr.mxu1 %v3280_v24 }
 0xcf7   :  { %v2987_v44 = vpop.xlane.xlu0 %2986 }
 0xcf8   :  { %5555 = vrcp.f32 %v2987_v44 }
 0xcfb   :  { %v2984_v28 = vpop.xlane.xlu1 %2983 }
 0xcfc   :  { %5557 = vrcp.f32 %v2984_v28 }
 0xcff   :  { %v2993_v29 = vpop.xlane.xlu0 %2992 }
 0xd00   :  { %5559 = vrcp.f32 %v2993_v29 }
 0xd01   :  { %v2990_v30 = vpop.xlane.xlu1 %2989 }
 0xd02   :  { %5561 = vrcp.f32 %v2990_v30 }
 0xd03   :  { %v2999_v32 = vpop.xlane.xlu0 %2998 }
 0xd04   :  { %5563 = vrcp.f32 %v2999_v32 }
 0xd05   :  { %v2996_v33 = vpop.xlane.xlu1 %2995  ;;  %v5556_v40 = vpop.eup %5555 }
 0xd06   :  { %5565 = vrcp.f32 %v2996_v33  ;;  %v3011_v43 = vmul.f32 %v5556_v40, %v6304_v1 }
 0xd07   :  { %v3191_v31 = vpop.permute.xlu0 %3190 }
 0xd08   :  { %5337 = vmatprep.subr.mxu0 %v3191_v31 }
 0xd09   :  { %v5558_v41 = vpop.eup %5557  ;;  %5338 = vmatpush3.msra.mxu0 %v3191_v31  ;;  %v3278_v46 = vpop.permute.xlu1 %3277 }
 0xd0a   :  { %v3010_v42 = vmul.f32 %v5558_v41, %v5542_v8 }
 0xd0c   :  { %5332 = vmatprep.mubr.msk.f32.mxu1 %vm56_vm3, %v3010_v42 }
 0xd0d   :  { %5333 = vmatmul.mubr.msk.f32.vlgmr.msra.gmra.mxu1 %vm56_vm3, %v3011_v43  ;;  %v5560_v45 = vpop.eup %5559 }
 0xd0e   :  { %5343 = vmatpush3.msra.mxu1 %v3280_v24  ;;  %v3013_v52 = vmul.f32 %v5560_v45, %v5544_v14  ;;  %v4849_v14 = vld [vmem:[%s6626_s2 + $0x3] ss:$0 sm:$0xff] }
 0xd0f   :  { %v5562_v50 = vpop.eup %5561  ;;  %5344 = vmatprep.subr.mxu1 %v3278_v46 }
 0xd10   :  { %5345 = vmatpush3.msra.mxu1 %v3278_v46  ;;  %v3012_v51 = vmul.f32 %v5562_v50, %v5546_v16 }
 0xd11   :  { %5360 = vmatprep.subr.mxu1 %v4847_v47  ;;  %v5564_v53 = vpop.eup %5563 }
 0xd12   :  { %5339 = vmatprep.mubr.msk.f32.mxu0 %vm56_vm3, %v3012_v51  ;;  %v3015_v56 = vmul.f32 %v5564_v53, %v5548_v18 }
 0xd13   :  { %v5566_v54 = vpop.eup %5565  ;;  %5340 = vmatmul.mubr.msk.f32.vlgmr.msra.gmra.mxu0 %vm56_vm3, %v3013_v52 }
 0xd14   :  { %v3014_v55 = vmul.f32 %v5566_v54, %v5550_v22 }
 0xd16   :  { %5346 = vmatprep.mubr.msk.f32.mxu1 %vm56_vm3, %v3014_v55 }
 0xd17   :  { %5347 = vmatmul.mubr.msk.f32.vlgmr.msra.gmra.mxu1 %vm56_vm3, %v3015_v56 }
 0xd18   :  { %5361 = vmatpush3.msra.mxu1 %v4847_v47  ;;  %5368 = vmatprep.mubr.msk.f32.mxu1 %vm92_vm0, %v6175_v7 }
 0xd19   :  { %5362 = vmatprep.subr.mxu1 %v4846_v58 }
 0xd1a   :  { %5363 = vmatpush3.msra.mxu1 %v4846_v58  ;;  %v4853_v58 = vld [vmem:[%s6627_s3 + $0x68] sm:$0xff] }
 0xd1b   :  { %5364 = vmatprep.subr.mxu1 %v4845_v59 }
 0xd1c   :  { %5365 = vmatpush3.msra.mxu1 %v4845_v59 }
 0xd1d   :  { %5366 = vmatprep.subr.mxu1 %v4844_v60 }
 0xd1e   :  { %5367 = vmatpush3.msra.mxu1 %v4844_v60  ;;  %v4852_v60 = vld [vmem:[%s6627_s3 + $0x60] sm:$0xff] }
 0xd1f   :  { %5369 = vmatmul.mubr.msk.f32.vlgmr.msra.gmra.mxu1 %vm92_vm0, %v6173_v4  ;;  %v4838_v4 = vld [vmem:[%s6629_s5 + $0x58] sm:$0xff] }
 0xd20   :  { %5349 = vmatprep.subr.mxu0 %v4838_v4 }
 0xd21   :  { %5350 = vmatpush3.msra.mxu0 %v4838_v4 }
 0xd22   :  { %5351 = vmatprep.subr.mxu0 %v4837_v6 }
 0xd23   :  { %5352 = vmatpush3.msra.mxu0 %v4837_v6 }
 0xd24   :  { %5353 = vmatprep.subr.mxu0 %v4836_v9 }
 0xd25   :  { %5354 = vmatpush3.msra.mxu0 %v4836_v9 }
 0xd26   :  { %5355 = vmatprep.subr.mxu0 %v4835_v13 }
 0xd27   :  { %5356 = vmatpush3.msra.mxu0 %v4835_v13 }
 0xd28   :  { %5371 = vmatprep.subr.mxu0 %v4855_v19 }
 0xd7b   :  { %v5327_v61 = vpop.f32.mrf.mxu1 }
 0xd7d   :  { %v3094_v25 = vpop.f32.mrf.mxu1 }
 0xdcd   :  { %v5334_v7 = vpop.f32.mrf.mxu1 }
 0xdce   :  { %3368 = vrot.lane.b32.xlu1 %v5334_v7, %s5633_s14  ;;  %v4857_v7 = vld [vmem:[%s6628_s4 + $0x3] ss:$0 sm:$0xff]  ;;  %s6531_s4 = sld [smem:[#allocation2 + $0x2]] }
 0xdcf   :  { %v3181_v63 = vpop.f32.mrf.mxu1 }
 0xdd0   :  { %3366 = vrot.lane.b32.xlu0 %v3181_v63, %s5633_s14 }
 0xdd3   :  { %v5341_v1 = vpop.f32.mrf.mxu0 }
 0xdd4   :  { %3376 = vrot.lane.b32.xlu1 %v5341_v1, %s5634_s7 }
 0xdd5   :  { %v3268_v2 = vpop.f32.mrf.mxu0 }
 0xdd6   :  { %3374 = vrot.lane.b32.xlu0 %v3268_v2, %s5634_s7 }
 0xdd7   :  { %v5348_v5 = vpop.f32.mrf.mxu1 }
 0xdd8   :  { %3384 = vrot.lane.b32.xlu1 %v5348_v5, %s5635_s18 }
 0xdd9   :  { %v3355_v8 = vpop.f32.mrf.mxu1 }
 0xdda   :  { %3382 = vrot.lane.b32.xlu0 %v3355_v8, %s5635_s18 }
 0xddf   :  { %v5370_v48 = vpop.f32.mrf.mxu1 }
 0xde0   :  { %v6365_v16 = vadd.f32 %v5370_v48, %v4849_v14 }
 0xde1   :  { %v3605_v17 = vpop.f32.mrf.mxu1 }
 0xde2   :  { %v6367_v18 = vadd.f32 %v4849_v14, %v3605_v17  ;;  %3793 = vrot.lane.b32.xlu1 %v6365_v16, %s5627_s15 }
 0xde4   :  { %5386 = vmatprep.mubr.msk.f32.mxu1 %vm268_vm1, %v6367_v18  ;;  %3884 = vrot.lane.b32.xlu0 %v6367_v18, %s5628_s16 }
 0xde6   :  { %3791 = vrot.lane.b32.xlu1 %v6367_v18, %s5627_s15 }
 0xe40   :  { %v3369_v22 = vpop.permute.xlu1 %3368 }
 0xe41   :  { %v3389_v3 = vsel %vm268_vm1, %v5327_v61, %v3369_v22 }
 0xe42   :  { %v3367_v10 = vpop.permute.xlu0 %3366 }
 0xe43   :  { %v3388_v34 = vsel %vm268_vm1, %v3094_v25, %v3367_v10 }
 0xe46   :  { %v3377_v23 = vpop.permute.xlu1 %3376 }
 0xe47   :  { %v3391_v26 = vsel %vm56_vm3, %v3389_v3, %v3377_v23 }
 0xe48   :  { %v3375_v24 = vpop.permute.xlu0 %3374 }
 0xe49   :  { %v3390_v27 = vsel %vm56_vm3, %v3388_v34, %v3375_v24 }
 0xe4a   :  { %v3385_v11 = vpop.permute.xlu1 %3384 }
 0xe4b   :  { %v3393_v35 = vsel %vm1101_vm6, %v3391_v26, %v3385_v11 }
 0xe4c   :  { %v3395_v44 = vmul.f32 %v5945_v49, %v3393_v35  ;;  %v3383_v28 = vpop.permute.xlu0 %3382 }
 0xe4d   :  { %v3392_v29 = vsel %vm1101_vm6, %v3390_v27, %v3383_v28 }
 0xe4e   :  { %v3399_v30 = vmul.f32 0.044715, %v3395_v44  ;;  %v3394_v32 = vmul.f32 %v5952_v21, %v3392_v29  ;;  %v3397_v54 = vmul.f32 0.5, %v3395_v44  ;;  %v4854_v21 = vld [vmem:[%s6627_s3 + $0x70] sm:$0xff]  ;;  %s6528_s3 = sld [smem:[#allocation2 + $0x1]] }
 0xe50   :  { %v3401_v33 = vmul.f32 %v3399_v30, %v3395_v44  ;;  %v3398_v31 = vmul.f32 0.044715, %v3394_v32  ;;  %v3396_v52 = vmul.f32 0.5, %v3394_v32 }
 0xe52   :  { %v3403_v40 = vmul.f32 %v3401_v33, %v3395_v44  ;;  %v3400_v41 = vmul.f32 %v3398_v31, %v3394_v32 }
 0xe54   :  { %v3405_v42 = vadd.f32 %v3403_v40, %v3395_v44  ;;  %v3402_v43 = vmul.f32 %v3400_v41, %v3394_v32  ;;  %v3794_v59 = vpop.permute.xlu1 %3793 }
 0xe56   :  { %v3407_v45 = vmul.f32 0.7978846, %v3405_v42  ;;  %v3404_v46 = vadd.f32 %v3402_v43, %v3394_v32 }
 0xe58   :  { %5567 = vtanh.f32 %v3407_v45  ;;  %v3406_v47 = vmul.f32 0.7978846, %v3404_v46  ;;  %v3792_v61 = vpop.permute.xlu1 %3791 }
 0xe5a   :  { %5569 = vtanh.f32 %v3406_v47 }
 0xe65   :  { %v5568_v50 = vpop.eup %5567 }
 0xe66   :  { %v3411_v49 = vadd.f32 1.0, %v5568_v50 }
 0xe67   :  { %v5570_v51 = vpop.eup %5569 }
 0xe68   :  { %v3410_v53 = vadd.f32 1.0, %v5570_v51  ;;  %v3413_v56 = vmul.f32 %v3411_v49, %v3397_v54 }
 0xe6a   :  { %v3412_v55 = vmul.f32 %v3410_v53, %v3396_v52 }
 0xe6c   :  { %5357 = vmatprep.mubr.msk.f32.mxu0 %vm92_vm0, %v3412_v55 }
 0xe6d   :  { %5358 = vmatmul.mubr.msk.f32.vlgmr.msra.gmra.mxu0 %vm92_vm0, %v3413_v56 }
 0xe6e   :  { %5372 = vmatpush3.msra.mxu0 %v4855_v19  ;;  %5379 = vmatprep.mubr.msk.f32.mxu0 %vm92_vm0, %v6179_v15 }
 0xe6f   :  { %5373 = vmatprep.subr.mxu0 %v4854_v21 }
 0xe70   :  { %5374 = vmatpush3.msra.mxu0 %v4854_v21 }
 0xe71   :  { %5375 = vmatprep.subr.mxu0 %v4853_v58 }
 0xe72   :  { %5376 = vmatpush3.msra.mxu0 %v4853_v58 }
 0xe73   :  { %5377 = vmatprep.subr.mxu0 %v4852_v60 }
 0xe74   :  { %5378 = vmatpush3.msra.mxu0 %v4852_v60 }
 0xe75   :  { %5380 = vmatmul.mubr.msk.f32.vlgmr.msra.gmra.mxu0 %vm92_vm0, %v6177_v12  ;;  %v3885_v12 = vpop.permute.xlu0 %3884 }
 0xe76   :  { %5393 = vmatprep.mubr.msk.f32.mxu0 %vm268_vm1, %v3792_v61 }
 0xf2d   :  { %v6404_v15 = vpop.f32.mrf.mxu0 }
 0xf2f   :  { %v6406_v25 = vpop.f32.mrf.mxu0 }
 0xf35   :  { %v5381_v63 = vpop.f32.mrf.mxu0 }
 0xf36   :  { %v6411_v1 = vadd.f32 %v5381_v63, %v4857_v7 }
 0xf37   :  { %v3693_v2 = vpop.f32.mrf.mxu0 }
 0xf38   :  { %v6413_v5 = vadd.f32 %v4857_v7, %v3693_v2  ;;  %3797 = vrot.lane.b32.xlu0 %v6411_v1, %s5627_s15  ;;  %5382 = vmatprep.subr.msk.mxu1 %vm268_vm1, %v6411_v1 }
 0xf39   :  { %5383 = vmatpush3.xpose.msk.msra.mxu1 %vm268_vm1, %v6411_v1 }
 0xf3a   :  { %3795 = vrot.lane.b32.xlu1 %v6413_v5, %s5627_s15  ;;  %5384 = vmatprep.subr.msk.mxu1 %vm268_vm1, %v6413_v5  ;;  %s2354_s15 = ssub.f32 1.0, %s6528_s3 }
 0xf3c   :  { %3890 = vrot.lane.b32.xlu0 %v6411_v1, %s5628_s16 }
 0xf3d   :  { %5385 = vmatpush3.xpose.msk.msra.mxu1 %vm268_vm1, %v6413_v5 }
 0xf3e   :  { %3886 = vrot.lane.b32.xlu1 %v6365_v16, %s5628_s16 }
 0xf40   :  { %3983 = vrot.lane.b32.xlu0 %v6411_v1, %s5629_s19  ;;  %5387 = vmatmul.mubr.msk.f32.vlgmr.msra.gmra.mxu1 %vm268_vm1, %v6365_v16 }
 0xf41   :  { %5400 = vmatprep.mubr.msk.f32.mxu1 %vm268_vm1, %v3885_v12 }
 0xf42   :  { %3981 = vrot.lane.b32.xlu1 %v6413_v5, %s5629_s19 }
 0xf44   :  { %3888 = vrot.lane.b32.xlu0 %v6413_v5, %s5628_s16  ;;  %s6535_s16 = sld [smem:[#allocation2 + $0x3]] }
 0xf46   :  { %3979 = vrot.lane.b32.xlu1 %v6365_v16, %s5629_s19 }
 0xf48   :  { %3977 = vrot.lane.b32.xlu0 %v6367_v18, %s5629_s19  ;;  %s3512_s19 = ssub.f32 1.0, %s6531_s4 }
 0xfaa   :  { %v3798_v4 = vpop.permute.xlu0 %3797 }
 0xfab   :  { %5389 = vmatprep.subr.msk.mxu0 %vm268_vm1, %v3798_v4 }
 0xfac   :  { %v3796_v6 = vpop.permute.xlu1 %3795  ;;  %5390 = vmatpush3.xpose.msk.msra.mxu0 %vm268_vm1, %v3798_v4 }
 0xfad   :  { %5391 = vmatprep.subr.msk.mxu0 %vm268_vm1, %v3796_v6 }
 0xfae   :  { %v3891_v8 = vpop.permute.xlu0 %3890 }
 0xfaf   :  { %5396 = vmatprep.subr.msk.mxu1 %vm268_vm1, %v3891_v8 }
 0xfb0   :  { %v3887_v9 = vpop.permute.xlu1 %3886  ;;  %5392 = vmatpush3.xpose.msk.msra.mxu0 %vm268_vm1, %v3796_v6  ;;  %5397 = vmatpush3.xpose.msk.msra.mxu1 %vm268_vm1, %v3891_v8 }
 0xfb2   :  { %v3984_v13 = vpop.permute.xlu0 %3983 }
 0xfb3   :  { %5394 = vmatmul.mubr.msk.f32.vlgmr.msra.gmra.mxu0 %vm268_vm1, %v3794_v59  ;;  %5403 = vmatprep.subr.msk.mxu0 %vm268_vm1, %v3984_v13 }
 0xfb4   :  { %v3982_v14 = vpop.permute.xlu1 %3981  ;;  %5404 = vmatpush3.xpose.msk.msra.mxu0 %vm268_vm1, %v3984_v13 }
 0xfb5   :  { %5405 = vmatprep.subr.msk.mxu0 %vm268_vm1, %v3982_v14 }
 0xfb6   :  { %v3889_v48 = vpop.permute.xlu0 %3888 }
 0xfb7   :  { %5398 = vmatprep.subr.msk.mxu1 %vm268_vm1, %v3889_v48 }
 0xfb8   :  { %5399 = vmatpush3.xpose.msk.msra.mxu1 %vm268_vm1, %v3889_v48  ;;  %5406 = vmatpush3.xpose.msk.msra.mxu0 %vm268_vm1, %v3982_v14  ;;  %v3980_v17 = vpop.permute.xlu1 %3979 }
 0xfba   :  { %v3978_v16 = vpop.permute.xlu0 %3977 }
 0xfbb   :  { %5401 = vmatmul.mubr.msk.f32.vlgmr.msra.gmra.mxu1 %vm268_vm1, %v3887_v9  ;;  %5407 = vmatprep.mubr.msk.f32.mxu0 %vm268_vm1, %v3978_v16 }
 0xfbc   :  { %5408 = vmatmul.mubr.msk.f32.vlgmr.msra.gmra.mxu0 %vm268_vm1, %v3980_v17 }
0x1000   :  { %v5388_v18 = vpop.f32.mrf.mxu1 }
0x1001   :  { %v3790_v19 = vsel %vm55_vm8, %v5388_v18, -1e+30 }
0x1002   :  { %v4073_v22 = vsel %vm56_vm3, %v3790_v19, -inf  ;;  %v3780_v10 = vpop.f32.mrf.mxu1 }
0x1003   :  { %v3789_v23 = vsel %vm54_vm9, %v3780_v10, -1e+30  ;;  %4074 = vmax.xlane.f32.xlu1 %v4073_v22 }
0x1004   :  { %v4070_v24 = vsel %vm56_vm3, %v3789_v23, -inf }
0x1005   :  { %4071 = vmax.xlane.f32.xlu0 %v4070_v24 }
0x1073   :  { %v5395_v3 = vpop.f32.mrf.mxu0 }
0x1074   :  { %v3883_v26 = vsel %vm55_vm8, %v5395_v3, -1e+30 }
0x1075   :  { %v4079_v11 = vsel %vm56_vm3, %v3883_v26, -inf  ;;  %v3873_v34 = vpop.f32.mrf.mxu0 }
0x1076   :  { %v3882_v35 = vsel %vm54_vm9, %v3873_v34, -1e+30  ;;  %4080 = vmax.xlane.f32.xlu0 %v4079_v11 }
0x1077   :  { %v4076_v27 = vsel %vm56_vm3, %v3882_v35, -inf }
0x107a   :  { %4077 = vmax.xlane.f32.xlu0 %v4076_v27 }
0x107b   :  { %v5402_v44 = vpop.f32.mrf.mxu1 }
0x107c   :  { %v3976_v28 = vsel %vm55_vm8, %v5402_v44, -1e+30  ;;  %v5409_v29 = vpop.f32.mrf.mxu0 }
0x107d   :  { %v4085_v30 = vsel %vm56_vm3, %v3976_v28, -inf  ;;  %v3966_v32 = vpop.f32.mrf.mxu1  ;;  %v4069_v33 = vsel %vm55_vm8, %v5409_v29, -1e+30 }
0x107e   :  { %v3975_v31 = vsel %vm54_vm9, %v3966_v32, -1e+30  ;;  %4086 = vmax.xlane.f32.xlu0 %v4085_v30  ;;  %v4059_v40 = vpop.f32.mrf.mxu0  ;;  %v4091_v43 = vsel %vm56_vm3, %v4069_v33, -inf }
0x107f   :  { %v4082_v41 = vsel %vm56_vm3, %v3975_v31, -inf  ;;  %v4068_v42 = vsel %vm54_vm9, %v4059_v40, -1e+30 }
0x1080   :  { %4083 = vmax.xlane.f32.xlu1 %v4082_v41  ;;  %v4088_v45 = vsel %vm56_vm3, %v4068_v42, -inf }
0x1082   :  { %4092 = vmax.xlane.f32.xlu0 %v4091_v43 }
0x1084   :  { %4089 = vmax.xlane.f32.xlu1 %v4088_v45 }
0x108c   :  { %v4075_v36 = vpop.xlane.xlu1 %4074 }
0x108d   :  { %v4095_v37 = vsub.f32 %v3790_v19, %v4075_v36 }
0x108e   :  { %v4072_v47 = vpop.xlane.xlu0 %4071 }
0x108f   :  { %v4104_v46 = vmul.f32 1.442695, %v4095_v37  ;;  %v4094_v50 = vsub.f32 %v3789_v23, %v4072_v47 }
0x1091   :  { %5571 = vpow2.f32 %v4104_v46  ;;  %v4102_v51 = vmul.f32 1.442695, %v4094_v50 }
0x1093   :  { %5573 = vpow2.f32 %v4102_v51 }
0x1095   :  { %4160 = vrot.lane.b32.xlu1 %v6411_v1, %s5626_s17 }
0x1098   :  { %4158 = vrot.lane.b32.xlu0 %v6413_v5, %s5626_s17 }
0x1099   :  { %4247 = vrot.lane.b32.xlu1 %v6411_v1, %s5630_s24 }
0x109c   :  { %4334 = vrot.lane.b32.xlu0 %v6411_v1, %s5631_s25 }
0x109d   :  { %4245 = vrot.lane.b32.xlu1 %v6413_v5, %s5630_s24 }
0x109e   :  { %v6496_v49 = vpop.eup %5571 }
0x109f   :  { %v4121_v52 = vsel %vm56_vm3, %v6496_v49, 0.0 }
0x10a0   :  { %v6500_v53 = vpop.eup %5573 }
0x10a1   :  { %4421 = vrot.lane.b32.xlu1 %v6411_v1, %s5632_s26  ;;  %v4118_v54 = vsel %vm56_vm3, %v6500_v53, 0.0 }
0x10bb   :  { %4122 = vadd.xlane.f32.xlu0 %v4121_v52 }
0x10c5   :  { %4119 = vadd.xlane.f32.xlu1 %v4118_v54 }
0x10ff   :  { %v4081_v55 = vpop.xlane.xlu0 %4080 }
0x1100   :  { %v4097_v56 = vsub.f32 %v3883_v26, %v4081_v55 }
0x1102   :  { %v4108_v21 = vmul.f32 1.442695, %v4097_v56 }
0x1103   :  { %v4078_v58 = vpop.xlane.xlu0 %4077 }
0x1104   :  { %5575 = vpow2.f32 %v4108_v21  ;;  %v4096_v59 = vsub.f32 %v3882_v35, %v4078_v58 }
0x1106   :  { %v4106_v60 = vmul.f32 1.442695, %v4096_v59 }
0x1107   :  { %v4087_v61 = vpop.xlane.xlu0 %4086 }
0x1108   :  { %5577 = vpow2.f32 %v4106_v60  ;;  %v4099_v7 = vsub.f32 %v3976_v28, %v4087_v61 }
0x1109   :  { %v4084_v63 = vpop.xlane.xlu1 %4083 }
0x110a   :  { %v4112_v1 = vmul.f32 1.442695, %v4099_v7  ;;  %v4098_v2 = vsub.f32 %v3975_v31, %v4084_v63 }
0x110b   :  { %v4093_v12 = vpop.xlane.xlu0 %4092 }
0x110c   :  { %5579 = vpow2.f32 %v4112_v1  ;;  %v4110_v4 = vmul.f32 1.442695, %v4098_v2  ;;  %v4101_v6 = vsub.f32 %v4069_v33, %v4093_v12 }
0x110d   :  { %v4090_v8 = vpop.xlane.xlu1 %4089 }
0x110e   :  { %5581 = vpow2.f32 %v4110_v4  ;;  %v4116_v9 = vmul.f32 1.442695, %v4101_v6  ;;  %v4100_v13 = vsub.f32 %v4068_v42, %v4090_v8  ;;  %v2355_v4 = vstv %s2354_s15  ;;  %v6544_v8 = vld [vmem:[%s6624_s0 + $0x8] sm:$0xff] }
0x110f   :  { %v4159_v14 = vpop.permute.xlu0 %4158 }
0x1110   :  { %5583 = vpow2.f32 %v4116_v9  ;;  %v4114_v48 = vmul.f32 1.442695, %v4100_v13  ;;  %v2357_v9 = vmul.f32 %v6544_v8, %v2355_v4  ;;  %v4887_v13 = vld [vmem:[%s6629_s5 + $0x78] sm:$0xff] }
0x1111   :  { %v6504_v16 = vpop.eup %5575  ;;  %v4161_v17 = vpop.permute.xlu1 %4160 }
0x1112   :  { %5585 = vpow2.f32 %v4114_v48  ;;  %5410 = vmatprep.subr.mxu1 %v4161_v17  ;;  %v4127_v18 = vsel %vm56_vm3, %v6504_v16, 0.0 }
0x1113   :  { %5411 = vmatpush3.msra.mxu1 %v4161_v17  ;;  %4128 = vadd.xlane.f32.xlu0 %v4127_v18  ;;  %v4335_v19 = vpop.permute.xlu0 %4334  ;;  %v6558_v17 = vld [vmem:[%s6624_s0] sm:$0xff] }
0x1114   :  { %5412 = vmatprep.subr.mxu1 %v4159_v14  ;;  %5424 = vmatprep.subr.mxu0 %v4335_v19  ;;  %v2356_v18 = vmul.f32 %v6558_v17, %v2355_v4 }
0x1115   :  { %v5578_v22 = vpop.eup %5577  ;;  %v4248_v10 = vpop.permute.xlu1 %4247  ;;  %5413 = vmatpush3.msra.mxu1 %v4159_v14  ;;  %5425 = vmatpush3.msra.mxu0 %v4335_v19  ;;  %v4886_v14 = vld [vmem:[%s6629_s5 + $0x70] sm:$0xff]  ;;  %v4885_v19 = vld [vmem:[%s6629_s5 + $0x68] sm:$0xff] }
0x1116   :  { %5417 = vmatprep.subr.mxu1 %v4248_v10  ;;  %v4124_v23 = vsel %vm56_vm3, %v5578_v22, 0.0 }
0x1117   :  { %4125 = vadd.xlane.f32.xlu1 %v4124_v23 }
0x1119   :  { %v5580_v24 = vpop.eup %5579  ;;  %v4246_v28 = vpop.permute.xlu1 %4245 }
0x111a   :  { %v4133_v3 = vsel %vm56_vm3, %v5580_v24, 0.0 }
0x111b   :  { %v5582_v26 = vpop.eup %5581  ;;  %4134 = vadd.xlane.f32.xlu0 %v4133_v3 }
0x111c   :  { %v4130_v11 = vsel %vm56_vm3, %v5582_v26, 0.0 }
0x111d   :  { %v5584_v34 = vpop.eup %5583  ;;  %4131 = vadd.xlane.f32.xlu1 %v4130_v11  ;;  %v4422_v29 = vpop.permute.xlu1 %4421 }
0x111e   :  { %v4139_v35 = vsel %vm56_vm3, %v5584_v34, 0.0 }
0x111f   :  { %v5586_v27 = vpop.eup %5585  ;;  %4140 = vadd.xlane.f32.xlu0 %v4139_v35  ;;  %v4791_v35 = vld [vmem:[%s6630_s6 + $0x1] ss:$0 sm:$0xff] }
0x1120   :  { %v4136_v44 = vsel %vm56_vm3, %v5586_v27, 0.0 }
0x1121   :  { %4137 = vadd.xlane.f32.xlu1 %v4136_v44 }
0x1132   :  { %4419 = vrot.lane.b32.xlu1 %v6413_v5, %s5632_s26 }
0x1135   :  { %4332 = vrot.lane.b32.xlu0 %v6413_v5, %s5631_s25 }
0x1144   :  { %v4123_v30 = vpop.xlane.xlu0 %4122 }
0x1145   :  { %5587 = vrcp.f32 %v4123_v30  ;;  %v4840_v30 = vld [vmem:[%s6630_s6 + $0x2] ss:$0 sm:$0xff] }
0x114e   :  { %v4120_v32 = vpop.xlane.xlu1 %4119 }
0x114f   :  { %5589 = vrcp.f32 %v4120_v32 }
0x1152   :  { %v5588_v33 = vpop.eup %5587 }
0x1153   :  { %v4151_v41 = vmul.f32 %v5588_v33, %v6496_v49 }
0x115c   :  { %v5590_v31 = vpop.eup %5589 }
0x115d   :  { %v4150_v40 = vmul.f32 %v5590_v31, %v6500_v53  ;;  %v2351_v31 = vstv %s6528_s3 }
0x115f   :  { %5414 = vmatprep.mubr.msk.f32.mxu1 %vm56_vm3, %v4150_v40  ;;  %v2342_v40 = vadd.f32 %v4791_v35, %v6209_v39  ;;  %v3500_v39 = vadd.f32 %v4840_v30, %v6406_v25 }
0x1160   :  { %5415 = vmatmul.mubr.msk.f32.vlgmr.msra.gmra.mxu1 %vm56_vm3, %v4151_v41 }
0x1161   :  { %5418 = vmatpush3.msra.mxu1 %v4248_v10  ;;  %v4884_v10 = vld [vmem:[%s6629_s5 + $0x60] sm:$0xff] }
0x1162   :  { %5419 = vmatprep.subr.mxu1 %v4246_v28 }
0x1163   :  { %5420 = vmatpush3.msra.mxu1 %v4246_v28  ;;  %v2347_v28 = vadd.f32 %v6207_v38, %v4791_v35 }
0x1164   :  { %5431 = vmatprep.subr.mxu1 %v4422_v29 }
0x119c   :  { %v4129_v5 = vpop.xlane.xlu0 %4128 }
0x119d   :  { %5591 = vrcp.f32 %v4129_v5 }
0x11a0   :  { %v4126_v42 = vpop.xlane.xlu1 %4125 }
0x11a1   :  { %5593 = vrcp.f32 %v4126_v42 }
0x11a4   :  { %v4135_v43 = vpop.xlane.xlu0 %4134 }
0x11a5   :  { %5595 = vrcp.f32 %v4135_v43 }
0x11a6   :  { %v4132_v45 = vpop.xlane.xlu1 %4131 }
0x11a7   :  { %5597 = vrcp.f32 %v4132_v45  ;;  %v3505_v45 = vadd.f32 %v6404_v15, %v4840_v30 }
0x11a8   :  { %v4141_v36 = vpop.xlane.xlu0 %4140 }
0x11a9   :  { %5599 = vrcp.f32 %v4141_v36 }
0x11aa   :  { %v4138_v37 = vpop.xlane.xlu1 %4137  ;;  %v5592_v47 = vpop.eup %5591 }
0x11ab   :  { %5601 = vrcp.f32 %v4138_v37  ;;  %v4153_v49 = vmul.f32 %v5592_v47, %v6504_v16  ;;  %v3513_v16 = vstv %s3512_s19  ;;  %v2353_v37 = vmul.f32 %v2351_v31, %v2347_v28 }
0x11ac   :  { %v4333_v46 = vpop.permute.xlu0 %4332 }
0x11ad   :  { %5426 = vmatprep.subr.mxu0 %v4333_v46 }
0x11ae   :  { %v5594_v50 = vpop.eup %5593  ;;  %5427 = vmatpush3.msra.mxu0 %v4333_v46  ;;  %v4420_v53 = vpop.permute.xlu1 %4419 }
0x11af   :  { %v4152_v51 = vmul.f32 %v5594_v50, %v5578_v22  ;;  %5438 = vmatprep.subr.mxu0 %v4887_v13  ;;  %v3515_v22 = vmul.f32 %v6544_v8, %v3513_v16 }
0x11b1   :  { %5421 = vmatprep.mubr.msk.f32.mxu1 %vm56_vm3, %v4152_v51  ;;  %v3509_v51 = vstv %s6531_s4 }
0x11b2   :  { %5422 = vmatmul.mubr.msk.f32.vlgmr.msra.gmra.mxu1 %vm56_vm3, %v4153_v49  ;;  %v5596_v52 = vpop.eup %5595 }
0x11b3   :  { %5432 = vmatpush3.msra.mxu1 %v4422_v29  ;;  %v4155_v56 = vmul.f32 %v5596_v52, %v5580_v24  ;;  %v3514_v24 = vmul.f32 %v6558_v17, %v3513_v16  ;;  %v2352_v52 = vmul.f32 %v2351_v31, %v2342_v40 }
0x11b4   :  { %v5598_v54 = vpop.eup %5597  ;;  %5433 = vmatprep.subr.mxu1 %v4420_v53 }
0x11b5   :  { %5434 = vmatpush3.msra.mxu1 %v4420_v53  ;;  %v4154_v55 = vmul.f32 %v5598_v54, %v5582_v26 }
0x11b6   :  { %v5600_v21 = vpop.eup %5599 }
0x11b7   :  { %5428 = vmatprep.mubr.msk.f32.mxu0 %vm56_vm3, %v4154_v55  ;;  %v4157_v60 = vmul.f32 %v5600_v21, %v5584_v34 }
0x11b8   :  { %v5602_v58 = vpop.eup %5601  ;;  %5429 = vmatmul.mubr.msk.f32.vlgmr.msra.gmra.mxu0 %vm56_vm3, %v4155_v56 }
0x11b9   :  { %v4156_v59 = vmul.f32 %v5602_v58, %v5586_v27  ;;  %5439 = vmatpush3.msra.mxu0 %v4887_v13 }
0x11ba   :  { %5440 = vmatprep.subr.mxu0 %v4886_v14 }
0x11bb   :  { %5435 = vmatprep.mubr.msk.f32.mxu1 %vm56_vm3, %v4156_v59  ;;  %5441 = vmatpush3.msra.mxu0 %v4886_v14 }
0x11bc   :  { %5436 = vmatmul.mubr.msk.f32.vlgmr.msra.gmra.mxu1 %vm56_vm3, %v4157_v60  ;;  %5442 = vmatprep.subr.mxu0 %v4885_v19 }
0x11bd   :  { %5443 = vmatpush3.msra.mxu0 %v4885_v19 }
0x11be   :  { %5444 = vmatprep.subr.mxu0 %v4884_v10 }
0x11bf   :  { %5445 = vmatpush3.msra.mxu0 %v4884_v10 }
0x1220   :  { %v5416_v61 = vpop.f32.mrf.mxu1 }
0x1222   :  { %v4236_v7 = vpop.f32.mrf.mxu1 }
0x1272   :  { %v5423_v63 = vpop.f32.mrf.mxu1 }
0x1273   :  { %4510 = vrot.lane.b32.xlu1 %v5423_v63, %s5633_s14 }
0x1274   :  { %v4323_v1 = vpop.f32.mrf.mxu1 }
0x1275   :  { %4508 = vrot.lane.b32.xlu0 %v4323_v1, %s5633_s14 }
0x1278   :  { %v5430_v2 = vpop.f32.mrf.mxu0 }
0x1279   :  { %4518 = vrot.lane.b32.xlu1 %v5430_v2, %s5634_s7 }
0x127a   :  { %v4410_v12 = vpop.f32.mrf.mxu0 }
0x127b   :  { %4516 = vrot.lane.b32.xlu0 %v4410_v12, %s5634_s7  ;;  %s4654_s7 = ssub.f32 1.0, %s6535_s16 }
0x127c   :  { %v5437_v6 = vpop.f32.mrf.mxu1 }
0x127d   :  { %4526 = vrot.lane.b32.xlu1 %v5437_v6, %s5635_s18  ;;  %v4655_v23 = vstv %s4654_s7 }
0x127e   :  { %v4497_v48 = vpop.f32.mrf.mxu1  ;;  %v4657_v3 = vmul.f32 %v6544_v8, %v4655_v23  ;;  %v4656_v26 = vmul.f32 %v6558_v17, %v4655_v23 }
0x127f   :  { %4524 = vrot.lane.b32.xlu0 %v4497_v48, %s5635_s18 }
0x1281   :  { %2362 = vrot.lane.b32.xlu1 %v2357_v9, %s5626_s17 }
0x1283   :  { %2360 = vrot.lane.b32.xlu0 %v2356_v18, %s5626_s17  ;;  %v4889_v18 = vld [vmem:[%s6630_s6 + $0x3] ss:$0 sm:$0xff] }
0x1285   :  { %3520 = vrot.lane.b32.xlu1 %v3515_v22, %s5638_s30  ;;  %v4651_v22 = vstv %s6535_s16 }
0x1287   :  { %3518 = vrot.lane.b32.xlu0 %v3514_v24, %s5638_s30 }
0x1289   :  { %4662 = vrot.lane.b32.xlu1 %v4657_v3, %s5637_s13 }
0x128b   :  { %4660 = vrot.lane.b32.xlu0 %v4656_v26, %s5637_s13 }
0x12e5   :  { %v4511_v11 = vpop.permute.xlu1 %4510 }
0x12e6   :  { %v4531_v29 = vsel %vm268_vm1, %v5416_v61, %v4511_v11 }
0x12e7   :  { %v4509_v34 = vpop.permute.xlu0 %4508 }
0x12e8   :  { %v4530_v41 = vsel %vm268_vm1, %v4236_v7, %v4509_v34 }
0x12eb   :  { %v4519_v27 = vpop.permute.xlu1 %4518 }
0x12ec   :  { %v4533_v32 = vsel %vm56_vm3, %v4531_v29, %v4519_v27 }
0x12ed   :  { %v4517_v44 = vpop.permute.xlu0 %4516 }
0x12ee   :  { %v4532_v42 = vsel %vm56_vm3, %v4530_v41, %v4517_v44  ;;  %v4743_v44 = vld [vmem:[%s6630_s6] ss:$0 sm:$0xff] }
0x12ef   :  { %v4527_v33 = vpop.permute.xlu1 %4526  ;;  %v1213_v28 = vadd.f32 %v5972_v20, %v4743_v44 }
0x12f0   :  { %v4535_v5 = vsel %vm1101_vm6, %v4533_v32, %v4527_v33  ;;  %v1208_v33 = vadd.f32 %v4743_v44, %v5974_v0 }
0x12f1   :  { %v4537_v38 = vmul.f32 %v6162_v57, %v4535_v5  ;;  %v4525_v43 = vpop.permute.xlu0 %4524  ;;  %v3511_v57 = vmul.f32 %v3509_v51, %v3505_v45 }
0x12f2   :  { %v4534_v36 = vsel %vm1101_vm6, %v4532_v42, %v4525_v43 }
0x12f3   :  { %v4541_v46 = vmul.f32 0.044715, %v4537_v38  ;;  %v4536_v47 = vmul.f32 %v6169_v62, %v4534_v36  ;;  %v2363_v50 = vpop.permute.xlu1 %2362  ;;  %v3510_v62 = vmul.f32 %v3509_v51, %v3500_v39  ;;  %v4539_v14 = vmul.f32 0.5, %v4537_v38 }
0x12f4   :  { %v2367_v49 = vadd.f32 %v2363_v50, %v2353_v37 }
0x12f5   :  { %v4543_v53 = vmul.f32 %v4541_v46, %v4537_v38  ;;  %v4540_v54 = vmul.f32 0.044715, %v4536_v47  ;;  %v2361_v55 = vpop.permute.xlu0 %2360  ;;  %v4538_v9 = vmul.f32 0.5, %v4536_v47 }
0x12f6   :  { %v2366_v56 = vadd.f32 %v2361_v55, %v2352_v52  ;;  %4672 = vrot.lane.b32.xlu1 %v2367_v49, %s5637_s13 }
0x12f7   :  { %v4545_v15 = vmul.f32 %v4543_v53, %v4537_v38  ;;  %v4542_v21 = vmul.f32 %v4540_v54, %v4536_v47  ;;  %v3521_v58 = vpop.permute.xlu1 %3520 }
0x12f8   :  { %v3525_v59 = vadd.f32 %v3521_v58, %v3511_v57  ;;  %4670 = vrot.lane.b32.xlu0 %v2366_v56, %s5637_s13 }
0x12f9   :  { %v4547_v60 = vadd.f32 %v4545_v15, %v4537_v38  ;;  %v4544_v61 = vmul.f32 %v4542_v21, %v4536_v47  ;;  %v3519_v7 = vpop.permute.xlu0 %3518 }
0x12fa   :  { %v3524_v25 = vadd.f32 %v3519_v7, %v3510_v62  ;;  %4680 = vrot.lane.b32.xlu1 %v3525_v59, %s5638_s30 }
0x12fb   :  { %v4549_v63 = vmul.f32 0.7978846, %v4547_v60  ;;  %v4546_v1 = vadd.f32 %v4544_v61, %v4536_v47  ;;  %v4663_v26 = vpop.permute.xlu1 %4662 }
0x12fc   :  { %4678 = vrot.lane.b32.xlu0 %v3524_v25, %s5638_s30  ;;  %s1216_s30 = sld [smem:[#allocation2]] }
0x12fd   :  { %5603 = vtanh.f32 %v4549_v63  ;;  %v4548_v2 = vmul.f32 0.7978846, %v4546_v1  ;;  %v4661_v35 = vpop.permute.xlu0 %4660 }
0x12ff   :  { %5605 = vtanh.f32 %v4548_v2 }
0x1302   :  { %s1220_s8 = ssub.f32 1.0, %s1216_s30  ;;  %v1217_v29 = vstv %s1216_s30 }
0x1303   :  { %v1219_v40 = vmul.f32 %v1217_v29, %v1213_v28  ;;  %v1218_v5 = vmul.f32 %v1217_v29, %v1208_v33 }
0x1304   :  { %v1221_v30 = vstv %s1220_s8 }
0x1305   :  { %v1223_v41 = vmul.f32 %v6544_v8, %v1221_v30  ;;  %v1222_v42 = vmul.f32 %v6558_v17, %v1221_v30 }
0x1307   :  { %v1225_v43 = vadd.f32 %v1223_v41, %v1219_v40  ;;  %v1224_v36 = vadd.f32 %v1222_v42, %v1218_v5 }
0x130a   :  { %v5604_v12 = vpop.eup %5603 }
0x130b   :  { %v4553_v6 = vadd.f32 1.0, %v5604_v12 }
0x130c   :  { %v5606_v4 = vpop.eup %5605 }
0x130d   :  { %v4552_v13 = vadd.f32 1.0, %v5606_v4  ;;  %v4555_v16 = vmul.f32 %v4553_v6, %v4539_v14 }
0x130f   :  { %v4554_v48 = vmul.f32 %v4552_v13, %v4538_v9 }
0x1311   :  { %5446 = vmatprep.mubr.msk.f32.mxu0 %vm92_vm0, %v4554_v48 }
0x1312   :  { %5447 = vmatmul.mubr.msk.f32.vlgmr.msra.gmra.mxu0 %vm92_vm0, %v4555_v16 }
0x1368   :  { %v4673_v32 = vpop.permute.xlu1 %4672 }
0x1369   :  { %v4693_v20 = vsel %vm92_vm0, %v1225_v43, %v4673_v32 }
0x136a   :  { %v4671_v31 = vpop.permute.xlu0 %4670 }
0x136b   :  { %v4692_v47 = vsel %vm92_vm0, %v1224_v36, %v4671_v31 }
0x136c   :  { %v4681_v38 = vpop.permute.xlu1 %4680 }
0x136d   :  { %v4696_v37 = vsel %vm4694_vm12, %v4693_v20, %v4681_v38 }
0x136e   :  { %v4679_v45 = vpop.permute.xlu0 %4678 }
0x136f   :  { %v4695_v50 = vsel %vm4694_vm12, %v4692_v47, %v4679_v45 }
0x13d2   :  { %v5448_v19 = vpop.f32.mrf.mxu0 }
0x13d3   :  { %v4647_v10 = vadd.f32 %v5448_v19, %v4889_v18 }
0x13d4   :  { %v4641_v23 = vpop.f32.mrf.mxu0 }
0x13d5   :  { %v4653_v24 = vmul.f32 %v4651_v22, %v4647_v10  ;;  %v4642_v3 = vadd.f32 %v4889_v18, %v4641_v23 }
0x13d7   :  { %v4667_v11 = vadd.f32 %v4663_v26, %v4653_v24  ;;  %v4652_v34 = vmul.f32 %v4651_v22, %v4642_v3 }
0x13d9   :  { %v4666_v27 = vadd.f32 %v4661_v35, %v4652_v34  ;;  %4688 = vrot.lane.b32.xlu1 %v4667_v11, %s5626_s17 }
0x13db   :  { %4686 = vrot.lane.b32.xlu0 %v4666_v27, %s5626_s17 }
0x144b   :  { %v4689_v46 = vpop.permute.xlu1 %4688 }
0x144c   :  { %v4699_v0 = vsel %vm4697_vm13, %v4696_v37, %v4689_v46 }
0x144d   :  { %4701 = vst [vmem:[%s6633_s9 + $0x8] sm:$0xff] %v4699_v0  ;;  %v4687_v8 = vpop.permute.xlu0 %4686 }
0x144e   :  { %v4698_v17 = vsel %vm4697_vm13, %v4695_v50, %v4687_v8 }
0x144f   :  { %4700 = vst [vmem:[%s6633_s9] sm:$0xff] %v4698_v17 }
0x1450   :  { %4706 = vsyncpa [#allocation3], 1 }

</bundles_post_ra>
